<compile_context>
chip_gen: v7x
topology: tpu7x:2x2x1
jax: 0.10.0
libtpu: 0.0.40
codegen_flags: <defaults>
</compile_context>

<pallas_src>
import functools

import jax
import jax.numpy as jnp
import numpy as np
from jax.experimental import pallas as pl
from jax.experimental.pallas import tpu as pltpu


def _round_up(v, m):
    return ((v + m - 1) // m) * m


def conv_module_kernel(x_ref, ln_g, ln_b, w1, b1, wd, bn_shift, w2, b2,
                       o_ref, z_ref, *, kernel_size, halo_pad, n_true,
                       eps_ln=1e-5):
    """One (batch, sequence-tile) grid step.

    x_ref : (TN + 2*halo_pad, C)  overlapped tile (halo_pad rows each side)
    z_ref : VMEM scratch (TN + 2*halo_pad, 2C) holding the GLU output window
    o_ref : (TN, C)
    """
    p = kernel_size // 2
    hp = halo_pad
    tile_i = pl.program_id(1)
    tn, _ = o_ref.shape
    c2 = z_ref.shape[-1]

    # ---- LayerNorm + 1x1 expansion conv + GLU, once over the whole window ----
    xv = x_ref[...].astype(jnp.float32)
    mu = jnp.mean(xv, axis=-1, keepdims=True)
    var = jnp.mean(jnp.square(xv - mu), axis=-1, keepdims=True)
    xn = ((xv - mu) * jax.lax.rsqrt(var + eps_ln)) * ln_g[0] + ln_b[0]
    y1 = jnp.dot(xn.astype(jnp.bfloat16), w1[...],
                 preferred_element_type=jnp.float32) + b1[0]
    # GLU: lane slice at 2C (multiple of 128, so the split is free on the tile value).
    z = y1[:, :c2] * jax.nn.sigmoid(y1[:, c2:])

    # ---- store the GLU output window; zero rows outside [0, N) (== F.pad before
    #      the depthwise conv).  Interior tiles take the unmasked fast path. ----
    need_mask = jnp.logical_or(tile_i == 0, (tile_i + 1) * tn + hp > n_true)

    @pl.when(need_mask)
    def _():
        pos = tile_i * tn - hp + jax.lax.broadcasted_iota(
            jnp.int32, (tn + 2 * hp, 1), 0)
        valid = jnp.logical_and(pos >= 0, pos < n_true)
        z_ref[...] = jnp.where(valid, z, 0.0).astype(z_ref.dtype)

    @pl.when(jnp.logical_not(need_mask))
    def _():
        z_ref[...] = z.astype(z_ref.dtype)

    # ---- DepthWiseCNN: k tap multiply-adds; BN scale is pre-folded into wd ----
    # TODO(synk): if the bundle dump shows per-tap sublane-realignment filler here,
    # restructure to aligned 8-row superblock loads + pltpu.roll (XLU has slack).
    base = hp - p
    acc = z_ref[pl.ds(base, tn), :] * wd[0, :]
    for t in range(1, kernel_size):
        acc = acc + z_ref[pl.ds(base + t, tn), :] * wd[t, :]

    # ---- BatchNorm1d (eval, folded into shift) + Swish + 1x1 projection conv ----
    yb = acc.astype(jnp.float32) + bn_shift[0]
    s = (yb * jax.nn.sigmoid(yb)).astype(jnp.bfloat16)
    out = jnp.dot(s, w2[...], preferred_element_type=jnp.float32) + b2[0]
    # Dropout: identity at inference.
    o_ref[...] = out.astype(o_ref.dtype)


def _tpu_vmem_capacity_bytes():
    try:
        return int(pltpu.get_tpu_info().vmem_capacity_bytes)
    except Exception:
        return 64 * 1024 * 1024      # conservative (v7x-sized) fallback


def _device_kind():
    try:
        return jax.devices()[0].device_kind.lower().replace(" ", "")
    except Exception:
        return ""


def conv_module_forward(x, params, kernel_size, *, tile_n=None,
                        eps_ln=1e-5, eps_bn=1e-5):
    assert kernel_size % 2 == 1 and kernel_size >= 3, \
        "Conformer ConvModule expects an odd kernel size >= 3"
    B, N, C = x.shape
    C2 = 2 * C
    p = kernel_size // 2
    HP = _round_up(p, 8)             # halo rows per side (sublane aligned)

    (ln_g, ln_b, w1t, b1, wd, bd, bn_g, bn_b, bn_m, bn_v, w2t, b2) = params

    kind = _device_kind()
    vmem_cap = _tpu_vmem_capacity_bytes()
    is_v7 = ("v7" in kind) or ("7x" in kind)
    # bf16 depthwise math only where the VPU has bf16 lanes (v6e / v7x); f32 on v5e-.
    use_bf16_dw = any(tag in kind for tag in ("v6", "6e", "v7", "7x"))
    dw_dtype = jnp.bfloat16 if use_bf16_dw else jnp.float32

    # ---- one-time parameter prep (BN folding / layout plumbing, not compute) ----
    w1b16 = w1t.astype(jnp.bfloat16)                      # (C, 4C)
    w2b16 = w2t.astype(jnp.bfloat16)                      # (2C, C)
    bn_scale = bn_g * jax.lax.rsqrt(bn_v + eps_bn)
    wd_s = (wd * bn_scale).astype(dw_dtype)               # BN scale folded into taps
    bn_shift = (bd - bn_m) * bn_scale + bn_b              # depthwise bias folded too

    # ---- sequence tiling: overlapped tiles of TN rows + HP halo rows per side ----
    if tile_n is None:
        tile_n = 256 if vmem_cap <= 80 * 1024 * 1024 else 512
    TN = _round_up(min(tile_n, _round_up(N, 8)), 8)
    TN = max(TN, 2 * HP)
    num_tiles = -(-N // TN)
    if is_v7 and B == 1 and num_tiles == 1 and N > 2 * HP:
        # keep both v7x TensorCores busy rather than maximizing TN
        TN = max(2 * HP, _round_up(-(-N // 2), 8))
        num_tiles = -(-N // TN)
    N_pad = num_tiles * TN

    # Overlapped tiles built with two strided reshapes of one padded copy of x
    # (no python slice/stack loop, no separate halo array).
    xp = jnp.pad(x, ((0, 0), (HP, N_pad - N + HP), (0, 0)))      # (B, N_pad+2HP, C)
    part1 = xp[:, :num_tiles * TN].reshape(B, num_tiles, TN, C)
    tail = jnp.pad(xp[:, TN:], ((0, 0), (0, TN - 2 * HP), (0, 0)))
    part2 = tail.reshape(B, num_tiles, TN, C)[:, :, :2 * HP]
    xt = jnp.concatenate([part1, part2], axis=2)                 # (B, nt, TN+2HP, C)

    def _run(single_buffer_consts):
        def const_spec(shape):
            nd = len(shape)
            imap = lambda b, i, _nd=nd: (0,) * _nd
            if single_buffer_consts:
                # constant index map -> never re-fetched; one VMEM buffer is enough
                return pl.BlockSpec(shape, imap, pipeline_mode=pl.Buffered(1))
            return pl.BlockSpec(shape, imap)

        grid_spec = pltpu.PrefetchScalarGridSpec(
            num_scalar_prefetch=0,
            grid=(B, num_tiles),
            in_specs=[
                pl.BlockSpec((None, None, TN + 2 * HP, C),
                             lambda b, i: (b, i, 0, 0)),
                const_spec(ln_g.shape), const_spec(ln_b.shape),
                const_spec(w1b16.shape), const_spec(b1.shape),
                const_spec(wd_s.shape), const_spec(bn_shift.shape),
                const_spec(w2b16.shape), const_spec(b2.shape),
            ],
            out_specs=pl.BlockSpec((None, TN, C), lambda b, i: (b, i, 0)),
            scratch_shapes=[pltpu.VMEM((TN + 2 * HP, C2), dw_dtype)],
        )

        rows_full = B * num_tiles * (TN + 2 * HP)
        rows_main = B * num_tiles * TN
        cost = pl.CostEstimate(
            flops=int(2 * rows_full * C * (4 * C)        # expansion gemm
                      + 2 * rows_main * C2 * kernel_size  # depthwise conv
                      + 2 * rows_main * C2 * C),          # projection gemm
            transcendentals=int(rows_full * C2 + rows_main * C2),
            bytes_accessed=int(xt.size * xt.dtype.itemsize
                               + B * N_pad * C * x.dtype.itemsize
                               + (w1b16.size + w2b16.size) * 2
                               + (b1.size + bn_shift.size + ln_g.size
                                  + ln_b.size + b2.size) * 4
                               + wd_s.size * wd_s.dtype.itemsize),
        )

        return pl.pallas_call(
            functools.partial(conv_module_kernel, kernel_size=kernel_size,
                              halo_pad=HP, n_true=N, eps_ln=eps_ln),
            out_shape=jax.ShapeDtypeStruct((B, N_pad, C), x.dtype),
            grid_spec=grid_spec,
            compiler_params=pltpu.CompilerParams(
                dimension_semantics=("parallel", "parallel"),
                vmem_limit_bytes=int(vmem_cap * 0.8)),   # ~20% headroom for Mosaic
            cost_estimate=cost,
        )(xt, ln_g, ln_b, w1b16, b1, wd_s, bn_shift, w2b16, b2)

    try:
        out = _run(True)
    except Exception:
        # pl.Buffered(1) unsupported on this jax/libtpu combo -> default buffering
        out = _run(False)

    return out if N_pad == N else out[:, :N]


def conv_module_reference(x, params, kernel_size):
    """Pure-JAX f32 reference with the PyTorch module's semantics."""
    (ln_g, ln_b, w1t, b1, wd, bd, bn_g, bn_b, bn_m, bn_v, w2t, b2) = params
    mu = jnp.mean(x, -1, keepdims=True)
    var = jnp.mean(jnp.square(x - mu), -1, keepdims=True)
    xn = (x - mu) / jnp.sqrt(var + 1e-5) * ln_g[0] + ln_b[0]
    y = xn @ w1t + b1[0]
    c2 = y.shape[-1] // 2
    z = y[..., :c2] * jax.nn.sigmoid(y[..., c2:])
    p = kernel_size // 2
    zp = jnp.pad(z, ((0, 0), (p, p), (0, 0)))
    n_out = x.shape[1] + 2 * p - kernel_size + 1
    acc = jnp.broadcast_to(bd[0], (x.shape[0], n_out, c2))
    for j in range(kernel_size):
        acc = acc + zp[:, j:j + n_out, :] * wd[j]
    bn = (acc - bn_m[0]) / jnp.sqrt(bn_v[0] + 1e-5) * bn_g[0] + bn_b[0]
    s = bn * jax.nn.sigmoid(bn)
    return s @ w2t + b2[0]


def init_params(key, d_model, kernel_size):
    C = d_model
    k = jax.random.split(key, 6)
    scale = 0.05
    ln_g = jnp.ones((1, C), jnp.float32)
    ln_b = jnp.zeros((1, C), jnp.float32)
    # Conv1d(d_model, 4*d_model, 1): weight (4C, C, 1) -> pre-transposed (C, 4C)
    w1t = scale * jax.random.normal(k[0], (C, 4 * C), jnp.float32)
    b1 = scale * jax.random.normal(k[1], (1, 4 * C), jnp.float32)
    # DepthwiseCNN Conv1d(2C, 2C, kernel, groups=2C): weight (2C, 1, k) -> (k, 2C)
    wd = scale * jax.random.normal(k[2], (kernel_size, 2 * C), jnp.float32)
    bd = scale * jax.random.normal(k[3], (1, 2 * C), jnp.float32)
    # BatchNorm1d(2C) with fresh running stats
    bn_g = jnp.ones((1, 2 * C), jnp.float32)
    bn_b = jnp.zeros((1, 2 * C), jnp.float32)
    bn_m = jnp.zeros((1, 2 * C), jnp.float32)
    bn_v = jnp.ones((1, 2 * C), jnp.float32)
    # Conv1d(2*d_model, d_model, 1): weight (C, 2C, 1) -> pre-transposed (2C, C)
    w2t = scale * jax.random.normal(k[4], (2 * C, C), jnp.float32)
    b2 = scale * jax.random.normal(k[5], (1, C), jnp.float32)
    return (ln_g, ln_b, w1t, b1, wd, bd, bn_g, bn_b, bn_m, bn_v, w2t, b2)


if __name__ == "__main__":
    # Small but lane-dense demo (C=128 keeps output stores unmasked).  tile_n=32
    # with N=90 gives 3 sequence tiles per batch: tile 0 (left-pad mask), tile 1
    # (unmasked fast path) and tile 2 (right-pad mask + N % TN != 0 tail) are all
    # exercised.
    B, N, d_model, kernel_size = 2, 90, 128, 15
    key = jax.random.PRNGKey(0)
    kx, kp = jax.random.split(key)
    x = jax.random.normal(kx, (B, N, d_model), jnp.float32)
    params = init_params(kp, d_model, kernel_size)

    out = conv_module_forward(x, params, kernel_size, tile_n=32)
    out = jax.block_until_ready(out)

    ref = conv_module_reference(x, params, kernel_size)
    np.testing.assert_allclose(np.asarray(out), np.asarray(ref),
                               rtol=5e-2, atol=1e-2)
    print("KERNEL_OK")
</pallas_src>

<mosaic_0001>
module attributes {stable_mosaic.version = 11 : i64} {
  func.func @conv_module_kernel(%arg0: i32, %arg1: i32, %arg2: memref<1x1x48x128xf32, #tpu.memory_space<vmem>>, %arg3: memref<1x128xf32, #tpu.memory_space<vmem>>, %arg4: memref<1x128xf32, #tpu.memory_space<vmem>>, %arg5: memref<128x512xbf16, #tpu.memory_space<vmem>>, %arg6: memref<1x512xf32, #tpu.memory_space<vmem>>, %arg7: memref<15x256xf32, #tpu.memory_space<vmem>>, %arg8: memref<1x256xf32, #tpu.memory_space<vmem>>, %arg9: memref<256x128xbf16, #tpu.memory_space<vmem>>, %arg10: memref<1x128xf32, #tpu.memory_space<vmem>>, %arg11: memref<1x32x128xf32, #tpu.memory_space<vmem>>, %arg12: memref<48x256xf32, #tpu.memory_space<vmem>>) attributes {dimension_semantics = [#tpu.dimension_semantics<parallel>, #tpu.dimension_semantics<parallel>], iteration_bounds = array<i64: 2, 3>, scalar_prefetch = 0 : i64, scratch_operands = 1 : i64, tpu.core_type = #tpu.core_type<tc>, window_params = [{transform_indices = @transform_0, window_bounds = array<i64: 1, 1, 48, 128>}, {pipeline_mode = #tpu.pipeline_mode<synchronous>, transform_indices = @transform_1, window_bounds = array<i64: 1, 128>}, {pipeline_mode = #tpu.pipeline_mode<synchronous>, transform_indices = @transform_2, window_bounds = array<i64: 1, 128>}, {pipeline_mode = #tpu.pipeline_mode<synchronous>, transform_indices = @transform_3, window_bounds = array<i64: 128, 512>}, {pipeline_mode = #tpu.pipeline_mode<synchronous>, transform_indices = @transform_4, window_bounds = array<i64: 1, 512>}, {pipeline_mode = #tpu.pipeline_mode<synchronous>, transform_indices = @transform_5, window_bounds = array<i64: 15, 256>}, {pipeline_mode = #tpu.pipeline_mode<synchronous>, transform_indices = @transform_6, window_bounds = array<i64: 1, 256>}, {pipeline_mode = #tpu.pipeline_mode<synchronous>, transform_indices = @transform_7, window_bounds = array<i64: 256, 128>}, {pipeline_mode = #tpu.pipeline_mode<synchronous>, transform_indices = @transform_8, window_bounds = array<i64: 1, 128>}, {transform_indices = @transform_9, window_bounds = array<i64: 1, 32, 128>}]} {
    %c0 = arith.constant 0 : index
    %c0_0 = arith.constant 0 : index
    %c0_1 = arith.constant 0 : index
    %c0_2 = arith.constant 0 : index
    %0 = vector.load %arg2[%c0, %c0_0, %c0_1, %c0_2] : memref<1x1x48x128xf32, #tpu.memory_space<vmem>>, vector<1x1x48x128xf32>
    %1 = vector.shape_cast %0 : vector<1x1x48x128xf32> to vector<48x128xf32>
    %cst = arith.constant dense<0.000000e+00> : vector<48xf32>
    %2 = vector.multi_reduction <add>, %1, %cst [1] : vector<48x128xf32> to vector<48xf32>
    %3 = vector.shape_cast %2 : vector<48xf32> to vector<48x1xf32>
    %cst_3 = arith.constant 1.280000e+02 : f32
    %4 = vector.broadcast %cst_3 : f32 to vector<48x1xf32>
    %5 = arith.divf %3, %4 : vector<48x1xf32>
    %6 = vector.broadcast %5 : vector<48x1xf32> to vector<48x128xf32>
    %7 = arith.subf %1, %6 : vector<48x128xf32>
    %8 = arith.mulf %7, %7 : vector<48x128xf32>
    %cst_4 = arith.constant dense<0.000000e+00> : vector<48xf32>
    %9 = vector.multi_reduction <add>, %8, %cst_4 [1] : vector<48x128xf32> to vector<48xf32>
    %10 = vector.shape_cast %9 : vector<48xf32> to vector<48x1xf32>
    %cst_5 = arith.constant 1.280000e+02 : f32
    %11 = vector.broadcast %cst_5 : f32 to vector<48x1xf32>
    %12 = arith.divf %10, %11 : vector<48x1xf32>
    %13 = vector.broadcast %5 : vector<48x1xf32> to vector<48x128xf32>
    %14 = arith.subf %1, %13 : vector<48x128xf32>
    %cst_6 = arith.constant 9.99999974E-6 : f32
    %15 = vector.broadcast %cst_6 : f32 to vector<48x1xf32>
    %16 = arith.addf %12, %15 : vector<48x1xf32>
    %17 = math.rsqrt %16 : vector<48x1xf32>
    %18 = vector.broadcast %17 : vector<48x1xf32> to vector<48x128xf32>
    %19 = arith.mulf %14, %18 : vector<48x128xf32>
    %c0_7 = arith.constant 0 : index
    %c0_8 = arith.constant 0 : index
    %20 = vector.load %arg3[%c0_7, %c0_8] : memref<1x128xf32, #tpu.memory_space<vmem>>, vector<1x128xf32>
    %21 = vector.shape_cast %20 : vector<1x128xf32> to vector<128xf32>
    %22 = vector.shape_cast %21 : vector<128xf32> to vector<1x128xf32>
    %23 = vector.broadcast %22 : vector<1x128xf32> to vector<48x128xf32>
    %24 = arith.mulf %19, %23 : vector<48x128xf32>
    %c0_9 = arith.constant 0 : index
    %c0_10 = arith.constant 0 : index
    %25 = vector.load %arg4[%c0_9, %c0_10] : memref<1x128xf32, #tpu.memory_space<vmem>>, vector<1x128xf32>
    %26 = vector.shape_cast %25 : vector<1x128xf32> to vector<128xf32>
    %27 = vector.shape_cast %26 : vector<128xf32> to vector<1x128xf32>
    %28 = vector.broadcast %27 : vector<1x128xf32> to vector<48x128xf32>
    %29 = arith.addf %24, %28 : vector<48x128xf32>
    %30 = arith.truncf %29 : vector<48x128xf32> to vector<48x128xbf16>
    %c0_11 = arith.constant 0 : index
    %c0_12 = arith.constant 0 : index
    %31 = vector.load %arg5[%c0_11, %c0_12] : memref<128x512xbf16, #tpu.memory_space<vmem>>, vector<128x512xbf16>
    %cst_13 = arith.constant dense<0.000000e+00> : vector<48x512xf32>
    %32 = tpu.matmul %30, %31, %cst_13 {dimension_numbers = #tpu.dot_dimension_numbers<[1], [0], [0], [1], [0, 0, 1, 1], [], []>} : vector<48x128xbf16>, vector<128x512xbf16>, vector<48x512xf32> -> vector<48x512xf32>
    %c0_14 = arith.constant 0 : index
    %c0_15 = arith.constant 0 : index
    %33 = vector.load %arg6[%c0_14, %c0_15] : memref<1x512xf32, #tpu.memory_space<vmem>>, vector<1x512xf32>
    %34 = vector.shape_cast %33 : vector<1x512xf32> to vector<512xf32>
    %35 = vector.shape_cast %34 : vector<512xf32> to vector<1x512xf32>
    %36 = vector.broadcast %35 : vector<1x512xf32> to vector<48x512xf32>
    %37 = arith.addf %32, %36 : vector<48x512xf32>
    %38 = vector.extract_strided_slice %37 {offsets = [0, 0], sizes = [48, 256], strides = [1, 1]} : vector<48x512xf32> to vector<48x256xf32>
    %39 = vector.extract_strided_slice %37 {offsets = [0, 256], sizes = [48, 256], strides = [1, 1]} : vector<48x512xf32> to vector<48x256xf32>
    %40 = arith.negf %39 : vector<48x256xf32>
    %41 = math.exp %40 : vector<48x256xf32>
    %cst_16 = arith.constant 1.000000e+00 : f32
    %42 = vector.broadcast %cst_16 : f32 to vector<48x256xf32>
    %43 = arith.addf %42, %41 : vector<48x256xf32>
    %44 = arith.divf %42, %43 : vector<48x256xf32>
    %45 = arith.mulf %38, %44 : vector<48x256xf32>
    %c0_i32 = arith.constant 0 : i32
    %46 = arith.cmpi eq, %arg1, %c0_i32 : i32
    %c1_i32 = arith.constant 1 : i32
    %47 = arith.addi %arg1, %c1_i32 : i32
    %c32_i32 = arith.constant 32 : i32
    %48 = arith.muli %47, %c32_i32 : i32
    %c8_i32 = arith.constant 8 : i32
    %49 = arith.addi %48, %c8_i32 : i32
    %c90_i32 = arith.constant 90 : i32
    %50 = arith.cmpi sgt, %49, %c90_i32 : i32
    %51 = arith.ori %46, %50 : i1
    %52 = arith.extui %51 : i1 to i32
    %c0_i32_17 = arith.constant 0 : i32
    %53 = arith.cmpi ne, %52, %c0_i32_17 : i32
    scf.if %53 {
      %c32_i32_75 = arith.constant 32 : i32
      %183 = arith.muli %arg1, %c32_i32_75 : i32
      %c8_i32_76 = arith.constant 8 : i32
      %184 = arith.subi %183, %c8_i32_76 : i32
      %185 = tpu.iota {dimensions = array<i32: 0>} : vector<48x1xi32>
      %186 = vector.broadcast %184 : i32 to vector<48x1xi32>
      %187 = arith.addi %186, %185 : vector<48x1xi32>
      %c0_i32_77 = arith.constant 0 : i32
      %188 = vector.broadcast %c0_i32_77 : i32 to vector<48x1xi32>
      %189 = arith.cmpi sge, %187, %188 : vector<48x1xi32>
      %c90_i32_78 = arith.constant 90 : i32
      %190 = vector.broadcast %c90_i32_78 : i32 to vector<48x1xi32>
      %191 = arith.cmpi slt, %187, %190 : vector<48x1xi32>
      %192 = arith.andi %189, %191 : vector<48x1xi1>
      %cst_79 = arith.constant 0.000000e+00 : f32
      %193 = vector.shape_cast %192 : vector<48x1xi1> to vector<48x1xi1>
      %194 = vector.broadcast %193 : vector<48x1xi1> to vector<48x256xi1>
      %195 = vector.broadcast %cst_79 : f32 to vector<48x256xf32>
      %196 = arith.select %194, %45, %195 : vector<48x256xi1>, vector<48x256xf32>
      %c0_80 = arith.constant 0 : index
      %c0_81 = arith.constant 0 : index
      %197 = vector.load %arg12[%c0_80, %c0_81] : memref<48x256xf32, #tpu.memory_space<vmem>>, vector<48x256xf32>
      tpu.vector_store %arg12[%c0_80, %c0_81], %196 {strides = array<i32>} : memref<48x256xf32, #tpu.memory_space<vmem>>, vector<48x256xf32>,
    } else {
    }
    %true = arith.constant true
    %54 = arith.xori %51, %true : i1
    %55 = arith.extui %54 : i1 to i32
    %c0_i32_18 = arith.constant 0 : i32
    %56 = arith.cmpi ne, %55, %c0_i32_18 : i32
    scf.if %56 {
      %c0_75 = arith.constant 0 : index
      %c0_76 = arith.constant 0 : index
      %183 = vector.load %arg12[%c0_75, %c0_76] : memref<48x256xf32, #tpu.memory_space<vmem>>, vector<48x256xf32>
      tpu.vector_store %arg12[%c0_75, %c0_76], %45 {strides = array<i32>} : memref<48x256xf32, #tpu.memory_space<vmem>>, vector<48x256xf32>,
    } else {
    }
    %c1 = arith.constant 1 : index
    %c0_19 = arith.constant 0 : index
    %57 = vector.load %arg12[%c1, %c0_19] : memref<48x256xf32, #tpu.memory_space<vmem>>, vector<32x256xf32>
    %c0_20 = arith.constant 0 : index
    %c0_21 = arith.constant 0 : index
    %58 = vector.load %arg7[%c0_20, %c0_21] : memref<15x256xf32, #tpu.memory_space<vmem>>, vector<1x256xf32>
    %59 = vector.shape_cast %58 : vector<1x256xf32> to vector<256xf32>
    %60 = vector.shape_cast %59 : vector<256xf32> to vector<1x256xf32>
    %61 = vector.broadcast %60 : vector<1x256xf32> to vector<32x256xf32>
    %62 = arith.mulf %57, %61 : vector<32x256xf32>
    %c2 = arith.constant 2 : index
    %c0_22 = arith.constant 0 : index
    %63 = vector.load %arg12[%c2, %c0_22] : memref<48x256xf32, #tpu.memory_space<vmem>>, vector<32x256xf32>
    %c1_23 = arith.constant 1 : index
    %c0_24 = arith.constant 0 : index
    %64 = vector.load %arg7[%c1_23, %c0_24] : memref<15x256xf32, #tpu.memory_space<vmem>>, vector<1x256xf32>
    %65 = vector.shape_cast %64 : vector<1x256xf32> to vector<256xf32>
    %66 = vector.shape_cast %65 : vector<256xf32> to vector<1x256xf32>
    %67 = vector.broadcast %66 : vector<1x256xf32> to vector<32x256xf32>
    %68 = arith.mulf %63, %67 : vector<32x256xf32>
    %69 = arith.addf %62, %68 : vector<32x256xf32>
    %c3 = arith.constant 3 : index
    %c0_25 = arith.constant 0 : index
    %70 = vector.load %arg12[%c3, %c0_25] : memref<48x256xf32, #tpu.memory_space<vmem>>, vector<32x256xf32>
    %c2_26 = arith.constant 2 : index
    %c0_27 = arith.constant 0 : index
    %71 = vector.load %arg7[%c2_26, %c0_27] : memref<15x256xf32, #tpu.memory_space<vmem>>, vector<1x256xf32>
    %72 = vector.shape_cast %71 : vector<1x256xf32> to vector<256xf32>
    %73 = vector.shape_cast %72 : vector<256xf32> to vector<1x256xf32>
    %74 = vector.broadcast %73 : vector<1x256xf32> to vector<32x256xf32>
    %75 = arith.mulf %70, %74 : vector<32x256xf32>
    %76 = arith.addf %69, %75 : vector<32x256xf32>
    %c4 = arith.constant 4 : index
    %c0_28 = arith.constant 0 : index
    %77 = vector.load %arg12[%c4, %c0_28] : memref<48x256xf32, #tpu.memory_space<vmem>>, vector<32x256xf32>
    %c3_29 = arith.constant 3 : index
    %c0_30 = arith.constant 0 : index
    %78 = vector.load %arg7[%c3_29, %c0_30] : memref<15x256xf32, #tpu.memory_space<vmem>>, vector<1x256xf32>
    %79 = vector.shape_cast %78 : vector<1x256xf32> to vector<256xf32>
    %80 = vector.shape_cast %79 : vector<256xf32> to vector<1x256xf32>
    %81 = vector.broadcast %80 : vector<1x256xf32> to vector<32x256xf32>
    %82 = arith.mulf %77, %81 : vector<32x256xf32>
    %83 = arith.addf %76, %82 : vector<32x256xf32>
    %c5 = arith.constant 5 : index
    %c0_31 = arith.constant 0 : index
    %84 = vector.load %arg12[%c5, %c0_31] : memref<48x256xf32, #tpu.memory_space<vmem>>, vector<32x256xf32>
    %c4_32 = arith.constant 4 : index
    %c0_33 = arith.constant 0 : index
    %85 = vector.load %arg7[%c4_32, %c0_33] : memref<15x256xf32, #tpu.memory_space<vmem>>, vector<1x256xf32>
    %86 = vector.shape_cast %85 : vector<1x256xf32> to vector<256xf32>
    %87 = vector.shape_cast %86 : vector<256xf32> to vector<1x256xf32>
    %88 = vector.broadcast %87 : vector<1x256xf32> to vector<32x256xf32>
    %89 = arith.mulf %84, %88 : vector<32x256xf32>
    %90 = arith.addf %83, %89 : vector<32x256xf32>
    %c6 = arith.constant 6 : index
    %c0_34 = arith.constant 0 : index
    %91 = vector.load %arg12[%c6, %c0_34] : memref<48x256xf32, #tpu.memory_space<vmem>>, vector<32x256xf32>
    %c5_35 = arith.constant 5 : index
    %c0_36 = arith.constant 0 : index
    %92 = vector.load %arg7[%c5_35, %c0_36] : memref<15x256xf32, #tpu.memory_space<vmem>>, vector<1x256xf32>
    %93 = vector.shape_cast %92 : vector<1x256xf32> to vector<256xf32>
    %94 = vector.shape_cast %93 : vector<256xf32> to vector<1x256xf32>
    %95 = vector.broadcast %94 : vector<1x256xf32> to vector<32x256xf32>
    %96 = arith.mulf %91, %95 : vector<32x256xf32>
    %97 = arith.addf %90, %96 : vector<32x256xf32>
    %c7 = arith.constant 7 : index
    %c0_37 = arith.constant 0 : index
    %98 = vector.load %arg12[%c7, %c0_37] : memref<48x256xf32, #tpu.memory_space<vmem>>, vector<32x256xf32>
    %c6_38 = arith.constant 6 : index
    %c0_39 = arith.constant 0 : index
    %99 = vector.load %arg7[%c6_38, %c0_39] : memref<15x256xf32, #tpu.memory_space<vmem>>, vector<1x256xf32>
    %100 = vector.shape_cast %99 : vector<1x256xf32> to vector<256xf32>
    %101 = vector.shape_cast %100 : vector<256xf32> to vector<1x256xf32>
    %102 = vector.broadcast %101 : vector<1x256xf32> to vector<32x256xf32>
    %103 = arith.mulf %98, %102 : vector<32x256xf32>
    %104 = arith.addf %97, %103 : vector<32x256xf32>
    %c8 = arith.constant 8 : index
    %c0_40 = arith.constant 0 : index
    %105 = vector.load %arg12[%c8, %c0_40] : memref<48x256xf32, #tpu.memory_space<vmem>>, vector<32x256xf32>
    %c7_41 = arith.constant 7 : index
    %c0_42 = arith.constant 0 : index
    %106 = vector.load %arg7[%c7_41, %c0_42] : memref<15x256xf32, #tpu.memory_space<vmem>>, vector<1x256xf32>
    %107 = vector.shape_cast %106 : vector<1x256xf32> to vector<256xf32>
    %108 = vector.shape_cast %107 : vector<256xf32> to vector<1x256xf32>
    %109 = vector.broadcast %108 : vector<1x256xf32> to vector<32x256xf32>
    %110 = arith.mulf %105, %109 : vector<32x256xf32>
    %111 = arith.addf %104, %110 : vector<32x256xf32>
    %c9 = arith.constant 9 : index
    %c0_43 = arith.constant 0 : index
    %112 = vector.load %arg12[%c9, %c0_43] : memref<48x256xf32, #tpu.memory_space<vmem>>, vector<32x256xf32>
    %c8_44 = arith.constant 8 : index
    %c0_45 = arith.constant 0 : index
    %113 = vector.load %arg7[%c8_44, %c0_45] : memref<15x256xf32, #tpu.memory_space<vmem>>, vector<1x256xf32>
    %114 = vector.shape_cast %113 : vector<1x256xf32> to vector<256xf32>
    %115 = vector.shape_cast %114 : vector<256xf32> to vector<1x256xf32>
    %116 = vector.broadcast %115 : vector<1x256xf32> to vector<32x256xf32>
    %117 = arith.mulf %112, %116 : vector<32x256xf32>
    %118 = arith.addf %111, %117 : vector<32x256xf32>
    %c10 = arith.constant 10 : index
    %c0_46 = arith.constant 0 : index
    %119 = vector.load %arg12[%c10, %c0_46] : memref<48x256xf32, #tpu.memory_space<vmem>>, vector<32x256xf32>
    %c9_47 = arith.constant 9 : index
    %c0_48 = arith.constant 0 : index
    %120 = vector.load %arg7[%c9_47, %c0_48] : memref<15x256xf32, #tpu.memory_space<vmem>>, vector<1x256xf32>
    %121 = vector.shape_cast %120 : vector<1x256xf32> to vector<256xf32>
    %122 = vector.shape_cast %121 : vector<256xf32> to vector<1x256xf32>
    %123 = vector.broadcast %122 : vector<1x256xf32> to vector<32x256xf32>
    %124 = arith.mulf %119, %123 : vector<32x256xf32>
    %125 = arith.addf %118, %124 : vector<32x256xf32>
    %c11 = arith.constant 11 : index
    %c0_49 = arith.constant 0 : index
    %126 = vector.load %arg12[%c11, %c0_49] : memref<48x256xf32, #tpu.memory_space<vmem>>, vector<32x256xf32>
    %c10_50 = arith.constant 10 : index
    %c0_51 = arith.constant 0 : index
    %127 = vector.load %arg7[%c10_50, %c0_51] : memref<15x256xf32, #tpu.memory_space<vmem>>, vector<1x256xf32>
    %128 = vector.shape_cast %127 : vector<1x256xf32> to vector<256xf32>
    %129 = vector.shape_cast %128 : vector<256xf32> to vector<1x256xf32>
    %130 = vector.broadcast %129 : vector<1x256xf32> to vector<32x256xf32>
    %131 = arith.mulf %126, %130 : vector<32x256xf32>
    %132 = arith.addf %125, %131 : vector<32x256xf32>
    %c12 = arith.constant 12 : index
    %c0_52 = arith.constant 0 : index
    %133 = vector.load %arg12[%c12, %c0_52] : memref<48x256xf32, #tpu.memory_space<vmem>>, vector<32x256xf32>
    %c11_53 = arith.constant 11 : index
    %c0_54 = arith.constant 0 : index
    %134 = vector.load %arg7[%c11_53, %c0_54] : memref<15x256xf32, #tpu.memory_space<vmem>>, vector<1x256xf32>
    %135 = vector.shape_cast %134 : vector<1x256xf32> to vector<256xf32>
    %136 = vector.shape_cast %135 : vector<256xf32> to vector<1x256xf32>
    %137 = vector.broadcast %136 : vector<1x256xf32> to vector<32x256xf32>
    %138 = arith.mulf %133, %137 : vector<32x256xf32>
    %139 = arith.addf %132, %138 : vector<32x256xf32>
    %c13 = arith.constant 13 : index
    %c0_55 = arith.constant 0 : index
    %140 = vector.load %arg12[%c13, %c0_55] : memref<48x256xf32, #tpu.memory_space<vmem>>, vector<32x256xf32>
    %c12_56 = arith.constant 12 : index
    %c0_57 = arith.constant 0 : index
    %141 = vector.load %arg7[%c12_56, %c0_57] : memref<15x256xf32, #tpu.memory_space<vmem>>, vector<1x256xf32>
    %142 = vector.shape_cast %141 : vector<1x256xf32> to vector<256xf32>
    %143 = vector.shape_cast %142 : vector<256xf32> to vector<1x256xf32>
    %144 = vector.broadcast %143 : vector<1x256xf32> to vector<32x256xf32>
    %145 = arith.mulf %140, %144 : vector<32x256xf32>
    %146 = arith.addf %139, %145 : vector<32x256xf32>
    %c14 = arith.constant 14 : index
    %c0_58 = arith.constant 0 : index
    %147 = vector.load %arg12[%c14, %c0_58] : memref<48x256xf32, #tpu.memory_space<vmem>>, vector<32x256xf32>
    %c13_59 = arith.constant 13 : index
    %c0_60 = arith.constant 0 : index
    %148 = vector.load %arg7[%c13_59, %c0_60] : memref<15x256xf32, #tpu.memory_space<vmem>>, vector<1x256xf32>
    %149 = vector.shape_cast %148 : vector<1x256xf32> to vector<256xf32>
    %150 = vector.shape_cast %149 : vector<256xf32> to vector<1x256xf32>
    %151 = vector.broadcast %150 : vector<1x256xf32> to vector<32x256xf32>
    %152 = arith.mulf %147, %151 : vector<32x256xf32>
    %153 = arith.addf %146, %152 : vector<32x256xf32>
    %c15 = arith.constant 15 : index
    %c0_61 = arith.constant 0 : index
    %154 = vector.load %arg12[%c15, %c0_61] : memref<48x256xf32, #tpu.memory_space<vmem>>, vector<32x256xf32>
    %c14_62 = arith.constant 14 : index
    %c0_63 = arith.constant 0 : index
    %155 = vector.load %arg7[%c14_62, %c0_63] : memref<15x256xf32, #tpu.memory_space<vmem>>, vector<1x256xf32>
    %156 = vector.shape_cast %155 : vector<1x256xf32> to vector<256xf32>
    %157 = vector.shape_cast %156 : vector<256xf32> to vector<1x256xf32>
    %158 = vector.broadcast %157 : vector<1x256xf32> to vector<32x256xf32>
    %159 = arith.mulf %154, %158 : vector<32x256xf32>
    %160 = arith.addf %153, %159 : vector<32x256xf32>
    %c0_64 = arith.constant 0 : index
    %c0_65 = arith.constant 0 : index
    %161 = vector.load %arg8[%c0_64, %c0_65] : memref<1x256xf32, #tpu.memory_space<vmem>>, vector<1x256xf32>
    %162 = vector.shape_cast %161 : vector<1x256xf32> to vector<256xf32>
    %163 = vector.shape_cast %162 : vector<256xf32> to vector<1x256xf32>
    %164 = vector.broadcast %163 : vector<1x256xf32> to vector<32x256xf32>
    %165 = arith.addf %160, %164 : vector<32x256xf32>
    %166 = arith.negf %165 : vector<32x256xf32>
    %167 = math.exp %166 : vector<32x256xf32>
    %cst_66 = arith.constant 1.000000e+00 : f32
    %168 = vector.broadcast %cst_66 : f32 to vector<32x256xf32>
    %169 = arith.addf %168, %167 : vector<32x256xf32>
    %170 = arith.divf %168, %169 : vector<32x256xf32>
    %171 = arith.mulf %165, %170 : vector<32x256xf32>
    %172 = arith.truncf %171 : vector<32x256xf32> to vector<32x256xbf16>
    %c0_67 = arith.constant 0 : index
    %c0_68 = arith.constant 0 : index
    %173 = vector.load %arg9[%c0_67, %c0_68] : memref<256x128xbf16, #tpu.memory_space<vmem>>, vector<256x128xbf16>
    %cst_69 = arith.constant dense<0.000000e+00> : vector<32x128xf32>
    %174 = tpu.matmul %172, %173, %cst_69 {dimension_numbers = #tpu.dot_dimension_numbers<[1], [0], [0], [1], [0, 0, 1, 1], [], []>} : vector<32x256xbf16>, vector<256x128xbf16>, vector<32x128xf32> -> vector<32x128xf32>
    %c0_70 = arith.constant 0 : index
    %c0_71 = arith.constant 0 : index
    %175 = vector.load %arg10[%c0_70, %c0_71] : memref<1x128xf32, #tpu.memory_space<vmem>>, vector<1x128xf32>
    %176 = vector.shape_cast %175 : vector<1x128xf32> to vector<128xf32>
    %177 = vector.shape_cast %176 : vector<128xf32> to vector<1x128xf32>
    %178 = vector.broadcast %177 : vector<1x128xf32> to vector<32x128xf32>
    %179 = arith.addf %174, %178 : vector<32x128xf32>
    %c0_72 = arith.constant 0 : index
    %c0_73 = arith.constant 0 : index
    %c0_74 = arith.constant 0 : index
    %180 = vector.load %arg11[%c0_72, %c0_73, %c0_74] : memref<1x32x128xf32, #tpu.memory_space<vmem>>, vector<1x32x128xf32>
    %181 = vector.shape_cast %180 : vector<1x32x128xf32> to vector<32x128xf32>
    %182 = vector.shape_cast %179 : vector<32x128xf32> to vector<1x32x128xf32>
    tpu.vector_store %arg11[%c0_72, %c0_73, %c0_74], %182 {strides = array<i32>} : memref<1x32x128xf32, #tpu.memory_space<vmem>>, vector<1x32x128xf32>,
    return
  }
  func.func @transform_0(%arg0: i32, %arg1: i32) -> (i32, i32, i32, i32) {
    %c0_i32 = arith.constant 0 : i32
    %c0_i32_0 = arith.constant 0 : i32
    %c0_i32_1 = arith.constant 0 : i32
    return %arg0, %arg1, %c0_i32, %c0_i32_0 : i32, i32, i32, i32
  }
  func.func @transform_1(%arg0: i32, %arg1: i32) -> (i32, i32) {
    %c0_i32 = arith.constant 0 : i32
    %c0_i32_0 = arith.constant 0 : i32
    %c0_i32_1 = arith.constant 0 : i32
    return %c0_i32, %c0_i32_0 : i32, i32
  }
  func.func @transform_2(%arg0: i32, %arg1: i32) -> (i32, i32) {
    %c0_i32 = arith.constant 0 : i32
    %c0_i32_0 = arith.constant 0 : i32
    %c0_i32_1 = arith.constant 0 : i32
    return %c0_i32, %c0_i32_0 : i32, i32
  }
  func.func @transform_3(%arg0: i32, %arg1: i32) -> (i32, i32) {
    %c0_i32 = arith.constant 0 : i32
    %c0_i32_0 = arith.constant 0 : i32
    %c0_i32_1 = arith.constant 0 : i32
    return %c0_i32, %c0_i32_0 : i32, i32
  }
  func.func @transform_4(%arg0: i32, %arg1: i32) -> (i32, i32) {
    %c0_i32 = arith.constant 0 : i32
    %c0_i32_0 = arith.constant 0 : i32
    %c0_i32_1 = arith.constant 0 : i32
    return %c0_i32, %c0_i32_0 : i32, i32
  }
  func.func @transform_5(%arg0: i32, %arg1: i32) -> (i32, i32) {
    %c0_i32 = arith.constant 0 : i32
    %c0_i32_0 = arith.constant 0 : i32
    %c0_i32_1 = arith.constant 0 : i32
    return %c0_i32, %c0_i32_0 : i32, i32
  }
  func.func @transform_6(%arg0: i32, %arg1: i32) -> (i32, i32) {
    %c0_i32 = arith.constant 0 : i32
    %c0_i32_0 = arith.constant 0 : i32
    %c0_i32_1 = arith.constant 0 : i32
    return %c0_i32, %c0_i32_0 : i32, i32
  }
  func.func @transform_7(%arg0: i32, %arg1: i32) -> (i32, i32) {
    %c0_i32 = arith.constant 0 : i32
    %c0_i32_0 = arith.constant 0 : i32
    %c0_i32_1 = arith.constant 0 : i32
    return %c0_i32, %c0_i32_0 : i32, i32
  }
  func.func @transform_8(%arg0: i32, %arg1: i32) -> (i32, i32) {
    %c0_i32 = arith.constant 0 : i32
    %c0_i32_0 = arith.constant 0 : i32
    %c0_i32_1 = arith.constant 0 : i32
    return %c0_i32, %c0_i32_0 : i32, i32
  }
  func.func @transform_9(%arg0: i32, %arg1: i32) -> (i32, i32, i32) {
    %c0_i32 = arith.constant 0 : i32
    %c0_i32_0 = arith.constant 0 : i32
    return %arg0, %arg1, %c0_i32 : i32, i32, i32
  }
}

module attributes {stable_mosaic.version = 11 : i64} {
  func.func @conv_module_kernel(%arg0: i32, %arg1: i32, %arg2: memref<1x1x48x128xf32, #tpu.memory_space<vmem>>, %arg3: memref<1x128xf32, #tpu.memory_space<vmem>>, %arg4: memref<1x128xf32, #tpu.memory_space<vmem>>, %arg5: memref<128x512xbf16, #tpu.memory_space<vmem>>, %arg6: memref<1x512xf32, #tpu.memory_space<vmem>>, %arg7: memref<15x256xf32, #tpu.memory_space<vmem>>, %arg8: memref<1x256xf32, #tpu.memory_space<vmem>>, %arg9: memref<256x128xbf16, #tpu.memory_space<vmem>>, %arg10: memref<1x128xf32, #tpu.memory_space<vmem>>, %arg11: memref<1x32x128xf32, #tpu.memory_space<vmem>>, %arg12: memref<48x256xf32, #tpu.memory_space<vmem>>) attributes {dimension_semantics = [#tpu.dimension_semantics<parallel>, #tpu.dimension_semantics<parallel>], iteration_bounds = array<i64: 2, 3>, scalar_prefetch = 0 : i64, scratch_operands = 1 : i64, tpu.core_type = #tpu.core_type<tc>, window_params = [{transform_indices = @transform_0, window_bounds = array<i64: 1, 1, 48, 128>}, {pipeline_mode = #tpu.pipeline_mode<synchronous>, transform_indices = @transform_1, window_bounds = array<i64: 1, 128>}, {pipeline_mode = #tpu.pipeline_mode<synchronous>, transform_indices = @transform_2, window_bounds = array<i64: 1, 128>}, {pipeline_mode = #tpu.pipeline_mode<synchronous>, transform_indices = @transform_3, window_bounds = array<i64: 128, 512>}, {pipeline_mode = #tpu.pipeline_mode<synchronous>, transform_indices = @transform_4, window_bounds = array<i64: 1, 512>}, {pipeline_mode = #tpu.pipeline_mode<synchronous>, transform_indices = @transform_5, window_bounds = array<i64: 15, 256>}, {pipeline_mode = #tpu.pipeline_mode<synchronous>, transform_indices = @transform_6, window_bounds = array<i64: 1, 256>}, {pipeline_mode = #tpu.pipeline_mode<synchronous>, transform_indices = @transform_7, window_bounds = array<i64: 256, 128>}, {pipeline_mode = #tpu.pipeline_mode<synchronous>, transform_indices = @transform_8, window_bounds = array<i64: 1, 128>}, {transform_indices = @transform_9, window_bounds = array<i64: 1, 32, 128>}]} {
    %c0 = arith.constant 0 : index
    %c0_0 = arith.constant 0 : index
    %c0_1 = arith.constant 0 : index
    %c0_2 = arith.constant 0 : index
    %0 = vector.load %arg2[%c0, %c0_0, %c0_1, %c0_2] : memref<1x1x48x128xf32, #tpu.memory_space<vmem>>, vector<1x1x48x128xf32>
    %1 = vector.shape_cast %0 : vector<1x1x48x128xf32> to vector<48x128xf32>
    %cst = arith.constant dense<0.000000e+00> : vector<48xf32>
    %2 = vector.multi_reduction <add>, %1, %cst [1] : vector<48x128xf32> to vector<48xf32>
    %3 = vector.shape_cast %2 : vector<48xf32> to vector<48x1xf32>
    %cst_3 = arith.constant 1.280000e+02 : f32
    %4 = vector.broadcast %cst_3 : f32 to vector<48x1xf32>
    %5 = arith.divf %3, %4 : vector<48x1xf32>
    %6 = vector.broadcast %5 : vector<48x1xf32> to vector<48x128xf32>
    %7 = arith.subf %1, %6 : vector<48x128xf32>
    %8 = arith.mulf %7, %7 : vector<48x128xf32>
    %cst_4 = arith.constant dense<0.000000e+00> : vector<48xf32>
    %9 = vector.multi_reduction <add>, %8, %cst_4 [1] : vector<48x128xf32> to vector<48xf32>
    %10 = vector.shape_cast %9 : vector<48xf32> to vector<48x1xf32>
    %cst_5 = arith.constant 1.280000e+02 : f32
    %11 = vector.broadcast %cst_5 : f32 to vector<48x1xf32>
    %12 = arith.divf %10, %11 : vector<48x1xf32>
    %13 = vector.broadcast %5 : vector<48x1xf32> to vector<48x128xf32>
    %14 = arith.subf %1, %13 : vector<48x128xf32>
    %cst_6 = arith.constant 9.99999974E-6 : f32
    %15 = vector.broadcast %cst_6 : f32 to vector<48x1xf32>
    %16 = arith.addf %12, %15 : vector<48x1xf32>
    %17 = math.rsqrt %16 : vector<48x1xf32>
    %18 = vector.broadcast %17 : vector<48x1xf32> to vector<48x128xf32>
    %19 = arith.mulf %14, %18 : vector<48x128xf32>
    %c0_7 = arith.constant 0 : index
    %c0_8 = arith.constant 0 : index
    %20 = vector.load %arg3[%c0_7, %c0_8] : memref<1x128xf32, #tpu.memory_space<vmem>>, vector<1x128xf32>
    %21 = vector.shape_cast %20 : vector<1x128xf32> to vector<128xf32>
    %22 = vector.shape_cast %21 : vector<128xf32> to vector<1x128xf32>
    %23 = vector.broadcast %22 : vector<1x128xf32> to vector<48x128xf32>
    %24 = arith.mulf %19, %23 : vector<48x128xf32>
    %c0_9 = arith.constant 0 : index
    %c0_10 = arith.constant 0 : index
    %25 = vector.load %arg4[%c0_9, %c0_10] : memref<1x128xf32, #tpu.memory_space<vmem>>, vector<1x128xf32>
    %26 = vector.shape_cast %25 : vector<1x128xf32> to vector<128xf32>
    %27 = vector.shape_cast %26 : vector<128xf32> to vector<1x128xf32>
    %28 = vector.broadcast %27 : vector<1x128xf32> to vector<48x128xf32>
    %29 = arith.addf %24, %28 : vector<48x128xf32>
    %30 = arith.truncf %29 : vector<48x128xf32> to vector<48x128xbf16>
    %c0_11 = arith.constant 0 : index
    %c0_12 = arith.constant 0 : index
    %31 = vector.load %arg5[%c0_11, %c0_12] : memref<128x512xbf16, #tpu.memory_space<vmem>>, vector<128x512xbf16>
    %cst_13 = arith.constant dense<0.000000e+00> : vector<48x512xf32>
    %32 = tpu.matmul %30, %31, %cst_13 {dimension_numbers = #tpu.dot_dimension_numbers<[1], [0], [0], [1], [0, 0, 1, 1], [], []>} : vector<48x128xbf16>, vector<128x512xbf16>, vector<48x512xf32> -> vector<48x512xf32>
    %c0_14 = arith.constant 0 : index
    %c0_15 = arith.constant 0 : index
    %33 = vector.load %arg6[%c0_14, %c0_15] : memref<1x512xf32, #tpu.memory_space<vmem>>, vector<1x512xf32>
    %34 = vector.shape_cast %33 : vector<1x512xf32> to vector<512xf32>
    %35 = vector.shape_cast %34 : vector<512xf32> to vector<1x512xf32>
    %36 = vector.broadcast %35 : vector<1x512xf32> to vector<48x512xf32>
    %37 = arith.addf %32, %36 : vector<48x512xf32>
    %38 = vector.extract_strided_slice %37 {offsets = [0, 0], sizes = [48, 256], strides = [1, 1]} : vector<48x512xf32> to vector<48x256xf32>
    %39 = vector.extract_strided_slice %37 {offsets = [0, 256], sizes = [48, 256], strides = [1, 1]} : vector<48x512xf32> to vector<48x256xf32>
    %40 = arith.negf %39 : vector<48x256xf32>
    %41 = math.exp %40 : vector<48x256xf32>
    %cst_16 = arith.constant 1.000000e+00 : f32
    %42 = vector.broadcast %cst_16 : f32 to vector<48x256xf32>
    %43 = arith.addf %42, %41 : vector<48x256xf32>
    %44 = arith.divf %42, %43 : vector<48x256xf32>
    %45 = arith.mulf %38, %44 : vector<48x256xf32>
    %c0_i32 = arith.constant 0 : i32
    %46 = arith.cmpi eq, %arg1, %c0_i32 : i32
    %c1_i32 = arith.constant 1 : i32
    %47 = arith.addi %arg1, %c1_i32 : i32
    %c32_i32 = arith.constant 32 : i32
    %48 = arith.muli %47, %c32_i32 : i32
    %c8_i32 = arith.constant 8 : i32
    %49 = arith.addi %48, %c8_i32 : i32
    %c90_i32 = arith.constant 90 : i32
    %50 = arith.cmpi sgt, %49, %c90_i32 : i32
    %51 = arith.ori %46, %50 : i1
    %52 = arith.extui %51 : i1 to i32
    %c0_i32_17 = arith.constant 0 : i32
    %53 = arith.cmpi ne, %52, %c0_i32_17 : i32
    scf.if %53 {
      %c32_i32_75 = arith.constant 32 : i32
      %183 = arith.muli %arg1, %c32_i32_75 : i32
      %c8_i32_76 = arith.constant 8 : i32
      %184 = arith.subi %183, %c8_i32_76 : i32
      %185 = tpu.iota {dimensions = array<i32: 0>} : vector<48x1xi32>
      %186 = vector.broadcast %184 : i32 to vector<48x1xi32>
      %187 = arith.addi %186, %185 : vector<48x1xi32>
      %c0_i32_77 = arith.constant 0 : i32
      %188 = vector.broadcast %c0_i32_77 : i32 to vector<48x1xi32>
      %189 = arith.cmpi sge, %187, %188 : vector<48x1xi32>
      %c90_i32_78 = arith.constant 90 : i32
      %190 = vector.broadcast %c90_i32_78 : i32 to vector<48x1xi32>
      %191 = arith.cmpi slt, %187, %190 : vector<48x1xi32>
      %192 = arith.andi %189, %191 : vector<48x1xi1>
      %cst_79 = arith.constant 0.000000e+00 : f32
      %193 = vector.shape_cast %192 : vector<48x1xi1> to vector<48x1xi1>
      %194 = vector.broadcast %193 : vector<48x1xi1> to vector<48x256xi1>
      %195 = vector.broadcast %cst_79 : f32 to vector<48x256xf32>
      %196 = arith.select %194, %45, %195 : vector<48x256xi1>, vector<48x256xf32>
      %c0_80 = arith.constant 0 : index
      %c0_81 = arith.constant 0 : index
      %197 = vector.load %arg12[%c0_80, %c0_81] : memref<48x256xf32, #tpu.memory_space<vmem>>, vector<48x256xf32>
      tpu.vector_store %arg12[%c0_80, %c0_81], %196 {strides = array<i32>} : memref<48x256xf32, #tpu.memory_space<vmem>>, vector<48x256xf32>,
    } else {
    }
    %true = arith.constant true
    %54 = arith.xori %51, %true : i1
    %55 = arith.extui %54 : i1 to i32
    %c0_i32_18 = arith.constant 0 : i32
    %56 = arith.cmpi ne, %55, %c0_i32_18 : i32
    scf.if %56 {
      %c0_75 = arith.constant 0 : index
      %c0_76 = arith.constant 0 : index
      %183 = vector.load %arg12[%c0_75, %c0_76] : memref<48x256xf32, #tpu.memory_space<vmem>>, vector<48x256xf32>
      tpu.vector_store %arg12[%c0_75, %c0_76], %45 {strides = array<i32>} : memref<48x256xf32, #tpu.memory_space<vmem>>, vector<48x256xf32>,
    } else {
    }
    %c1 = arith.constant 1 : index
    %c0_19 = arith.constant 0 : index
    %57 = vector.load %arg12[%c1, %c0_19] : memref<48x256xf32, #tpu.memory_space<vmem>>, vector<32x256xf32>
    %c0_20 = arith.constant 0 : index
    %c0_21 = arith.constant 0 : index
    %58 = vector.load %arg7[%c0_20, %c0_21] : memref<15x256xf32, #tpu.memory_space<vmem>>, vector<1x256xf32>
    %59 = vector.shape_cast %58 : vector<1x256xf32> to vector<256xf32>
    %60 = vector.shape_cast %59 : vector<256xf32> to vector<1x256xf32>
    %61 = vector.broadcast %60 : vector<1x256xf32> to vector<32x256xf32>
    %62 = arith.mulf %57, %61 : vector<32x256xf32>
    %c2 = arith.constant 2 : index
    %c0_22 = arith.constant 0 : index
    %63 = vector.load %arg12[%c2, %c0_22] : memref<48x256xf32, #tpu.memory_space<vmem>>, vector<32x256xf32>
    %c1_23 = arith.constant 1 : index
    %c0_24 = arith.constant 0 : index
    %64 = vector.load %arg7[%c1_23, %c0_24] : memref<15x256xf32, #tpu.memory_space<vmem>>, vector<1x256xf32>
    %65 = vector.shape_cast %64 : vector<1x256xf32> to vector<256xf32>
    %66 = vector.shape_cast %65 : vector<256xf32> to vector<1x256xf32>
    %67 = vector.broadcast %66 : vector<1x256xf32> to vector<32x256xf32>
    %68 = arith.mulf %63, %67 : vector<32x256xf32>
    %69 = arith.addf %62, %68 : vector<32x256xf32>
    %c3 = arith.constant 3 : index
    %c0_25 = arith.constant 0 : index
    %70 = vector.load %arg12[%c3, %c0_25] : memref<48x256xf32, #tpu.memory_space<vmem>>, vector<32x256xf32>
    %c2_26 = arith.constant 2 : index
    %c0_27 = arith.constant 0 : index
    %71 = vector.load %arg7[%c2_26, %c0_27] : memref<15x256xf32, #tpu.memory_space<vmem>>, vector<1x256xf32>
    %72 = vector.shape_cast %71 : vector<1x256xf32> to vector<256xf32>
    %73 = vector.shape_cast %72 : vector<256xf32> to vector<1x256xf32>
    %74 = vector.broadcast %73 : vector<1x256xf32> to vector<32x256xf32>
    %75 = arith.mulf %70, %74 : vector<32x256xf32>
    %76 = arith.addf %69, %75 : vector<32x256xf32>
    %c4 = arith.constant 4 : index
    %c0_28 = arith.constant 0 : index
    %77 = vector.load %arg12[%c4, %c0_28] : memref<48x256xf32, #tpu.memory_space<vmem>>, vector<32x256xf32>
    %c3_29 = arith.constant 3 : index
    %c0_30 = arith.constant 0 : index
    %78 = vector.load %arg7[%c3_29, %c0_30] : memref<15x256xf32, #tpu.memory_space<vmem>>, vector<1x256xf32>
    %79 = vector.shape_cast %78 : vector<1x256xf32> to vector<256xf32>
    %80 = vector.shape_cast %79 : vector<256xf32> to vector<1x256xf32>
    %81 = vector.broadcast %80 : vector<1x256xf32> to vector<32x256xf32>
    %82 = arith.mulf %77, %81 : vector<32x256xf32>
    %83 = arith.addf %76, %82 : vector<32x256xf32>
    %c5 = arith.constant 5 : index
    %c0_31 = arith.constant 0 : index
    %84 = vector.load %arg12[%c5, %c0_31] : memref<48x256xf32, #tpu.memory_space<vmem>>, vector<32x256xf32>
    %c4_32 = arith.constant 4 : index
    %c0_33 = arith.constant 0 : index
    %85 = vector.load %arg7[%c4_32, %c0_33] : memref<15x256xf32, #tpu.memory_space<vmem>>, vector<1x256xf32>
    %86 = vector.shape_cast %85 : vector<1x256xf32> to vector<256xf32>
    %87 = vector.shape_cast %86 : vector<256xf32> to vector<1x256xf32>
    %88 = vector.broadcast %87 : vector<1x256xf32> to vector<32x256xf32>
    %89 = arith.mulf %84, %88 : vector<32x256xf32>
    %90 = arith.addf %83, %89 : vector<32x256xf32>
    %c6 = arith.constant 6 : index
    %c0_34 = arith.constant 0 : index
    %91 = vector.load %arg12[%c6, %c0_34] : memref<48x256xf32, #tpu.memory_space<vmem>>, vector<32x256xf32>
    %c5_35 = arith.constant 5 : index
    %c0_36 = arith.constant 0 : index
    %92 = vector.load %arg7[%c5_35, %c0_36] : memref<15x256xf32, #tpu.memory_space<vmem>>, vector<1x256xf32>
    %93 = vector.shape_cast %92 : vector<1x256xf32> to vector<256xf32>
    %94 = vector.shape_cast %93 : vector<256xf32> to vector<1x256xf32>
    %95 = vector.broadcast %94 : vector<1x256xf32> to vector<32x256xf32>
    %96 = arith.mulf %91, %95 : vector<32x256xf32>
    %97 = arith.addf %90, %96 : vector<32x256xf32>
    %c7 = arith.constant 7 : index
    %c0_37 = arith.constant 0 : index
    %98 = vector.load %arg12[%c7, %c0_37] : memref<48x256xf32, #tpu.memory_space<vmem>>, vector<32x256xf32>
    %c6_38 = arith.constant 6 : index
    %c0_39 = arith.constant 0 : index
    %99 = vector.load %arg7[%c6_38, %c0_39] : memref<15x256xf32, #tpu.memory_space<vmem>>, vector<1x256xf32>
    %100 = vector.shape_cast %99 : vector<1x256xf32> to vector<256xf32>
    %101 = vector.shape_cast %100 : vector<256xf32> to vector<1x256xf32>
    %102 = vector.broadcast %101 : vector<1x256xf32> to vector<32x256xf32>
    %103 = arith.mulf %98, %102 : vector<32x256xf32>
    %104 = arith.addf %97, %103 : vector<32x256xf32>
    %c8 = arith.constant 8 : index
    %c0_40 = arith.constant 0 : index
    %105 = vector.load %arg12[%c8, %c0_40] : memref<48x256xf32, #tpu.memory_space<vmem>>, vector<32x256xf32>
    %c7_41 = arith.constant 7 : index
    %c0_42 = arith.constant 0 : index
    %106 = vector.load %arg7[%c7_41, %c0_42] : memref<15x256xf32, #tpu.memory_space<vmem>>, vector<1x256xf32>
    %107 = vector.shape_cast %106 : vector<1x256xf32> to vector<256xf32>
    %108 = vector.shape_cast %107 : vector<256xf32> to vector<1x256xf32>
    %109 = vector.broadcast %108 : vector<1x256xf32> to vector<32x256xf32>
    %110 = arith.mulf %105, %109 : vector<32x256xf32>
    %111 = arith.addf %104, %110 : vector<32x256xf32>
    %c9 = arith.constant 9 : index
    %c0_43 = arith.constant 0 : index
    %112 = vector.load %arg12[%c9, %c0_43] : memref<48x256xf32, #tpu.memory_space<vmem>>, vector<32x256xf32>
    %c8_44 = arith.constant 8 : index
    %c0_45 = arith.constant 0 : index
    %113 = vector.load %arg7[%c8_44, %c0_45] : memref<15x256xf32, #tpu.memory_space<vmem>>, vector<1x256xf32>
    %114 = vector.shape_cast %113 : vector<1x256xf32> to vector<256xf32>
    %115 = vector.shape_cast %114 : vector<256xf32> to vector<1x256xf32>
    %116 = vector.broadcast %115 : vector<1x256xf32> to vector<32x256xf32>
    %117 = arith.mulf %112, %116 : vector<32x256xf32>
    %118 = arith.addf %111, %117 : vector<32x256xf32>
    %c10 = arith.constant 10 : index
    %c0_46 = arith.constant 0 : index
    %119 = vector.load %arg12[%c10, %c0_46] : memref<48x256xf32, #tpu.memory_space<vmem>>, vector<32x256xf32>
    %c9_47 = arith.constant 9 : index
    %c0_48 = arith.constant 0 : index
    %120 = vector.load %arg7[%c9_47, %c0_48] : memref<15x256xf32, #tpu.memory_space<vmem>>, vector<1x256xf32>
    %121 = vector.shape_cast %120 : vector<1x256xf32> to vector<256xf32>
    %122 = vector.shape_cast %121 : vector<256xf32> to vector<1x256xf32>
    %123 = vector.broadcast %122 : vector<1x256xf32> to vector<32x256xf32>
    %124 = arith.mulf %119, %123 : vector<32x256xf32>
    %125 = arith.addf %118, %124 : vector<32x256xf32>
    %c11 = arith.constant 11 : index
    %c0_49 = arith.constant 0 : index
    %126 = vector.load %arg12[%c11, %c0_49] : memref<48x256xf32, #tpu.memory_space<vmem>>, vector<32x256xf32>
    %c10_50 = arith.constant 10 : index
    %c0_51 = arith.constant 0 : index
    %127 = vector.load %arg7[%c10_50, %c0_51] : memref<15x256xf32, #tpu.memory_space<vmem>>, vector<1x256xf32>
    %128 = vector.shape_cast %127 : vector<1x256xf32> to vector<256xf32>
    %129 = vector.shape_cast %128 : vector<256xf32> to vector<1x256xf32>
    %130 = vector.broadcast %129 : vector<1x256xf32> to vector<32x256xf32>
    %131 = arith.mulf %126, %130 : vector<32x256xf32>
    %132 = arith.addf %125, %131 : vector<32x256xf32>
    %c12 = arith.constant 12 : index
    %c0_52 = arith.constant 0 : index
    %133 = vector.load %arg12[%c12, %c0_52] : memref<48x256xf32, #tpu.memory_space<vmem>>, vector<32x256xf32>
    %c11_53 = arith.constant 11 : index
    %c0_54 = arith.constant 0 : index
    %134 = vector.load %arg7[%c11_53, %c0_54] : memref<15x256xf32, #tpu.memory_space<vmem>>, vector<1x256xf32>
    %135 = vector.shape_cast %134 : vector<1x256xf32> to vector<256xf32>
    %136 = vector.shape_cast %135 : vector<256xf32> to vector<1x256xf32>
    %137 = vector.broadcast %136 : vector<1x256xf32> to vector<32x256xf32>
    %138 = arith.mulf %133, %137 : vector<32x256xf32>
    %139 = arith.addf %132, %138 : vector<32x256xf32>
    %c13 = arith.constant 13 : index
    %c0_55 = arith.constant 0 : index
    %140 = vector.load %arg12[%c13, %c0_55] : memref<48x256xf32, #tpu.memory_space<vmem>>, vector<32x256xf32>
    %c12_56 = arith.constant 12 : index
    %c0_57 = arith.constant 0 : index
    %141 = vector.load %arg7[%c12_56, %c0_57] : memref<15x256xf32, #tpu.memory_space<vmem>>, vector<1x256xf32>
    %142 = vector.shape_cast %141 : vector<1x256xf32> to vector<256xf32>
    %143 = vector.shape_cast %142 : vector<256xf32> to vector<1x256xf32>
    %144 = vector.broadcast %143 : vector<1x256xf32> to vector<32x256xf32>
    %145 = arith.mulf %140, %144 : vector<32x256xf32>
    %146 = arith.addf %139, %145 : vector<32x256xf32>
    %c14 = arith.constant 14 : index
    %c0_58 = arith.constant 0 : index
    %147 = vector.load %arg12[%c14, %c0_58] : memref<48x256xf32, #tpu.memory_space<vmem>>, vector<32x256xf32>
    %c13_59 = arith.constant 13 : index
    %c0_60 = arith.constant 0 : index
    %148 = vector.load %arg7[%c13_59, %c0_60] : memref<15x256xf32, #tpu.memory_space<vmem>>, vector<1x256xf32>
    %149 = vector.shape_cast %148 : vector<1x256xf32> to vector<256xf32>
    %150 = vector.shape_cast %149 : vector<256xf32> to vector<1x256xf32>
    %151 = vector.broadcast %150 : vector<1x256xf32> to vector<32x256xf32>
    %152 = arith.mulf %147, %151 : vector<32x256xf32>
    %153 = arith.addf %146, %152 : vector<32x256xf32>
    %c15 = arith.constant 15 : index
    %c0_61 = arith.constant 0 : index
    %154 = vector.load %arg12[%c15, %c0_61] : memref<48x256xf32, #tpu.memory_space<vmem>>, vector<32x256xf32>
    %c14_62 = arith.constant 14 : index
    %c0_63 = arith.constant 0 : index
    %155 = vector.load %arg7[%c14_62, %c0_63] : memref<15x256xf32, #tpu.memory_space<vmem>>, vector<1x256xf32>
    %156 = vector.shape_cast %155 : vector<1x256xf32> to vector<256xf32>
    %157 = vector.shape_cast %156 : vector<256xf32> to vector<1x256xf32>
    %158 = vector.broadcast %157 : vector<1x256xf32> to vector<32x256xf32>
    %159 = arith.mulf %154, %158 : vector<32x256xf32>
    %160 = arith.addf %153, %159 : vector<32x256xf32>
    %c0_64 = arith.constant 0 : index
    %c0_65 = arith.constant 0 : index
    %161 = vector.load %arg8[%c0_64, %c0_65] : memref<1x256xf32, #tpu.memory_space<vmem>>, vector<1x256xf32>
    %162 = vector.shape_cast %161 : vector<1x256xf32> to vector<256xf32>
    %163 = vector.shape_cast %162 : vector<256xf32> to vector<1x256xf32>
    %164 = vector.broadcast %163 : vector<1x256xf32> to vector<32x256xf32>
    %165 = arith.addf %160, %164 : vector<32x256xf32>
    %166 = arith.negf %165 : vector<32x256xf32>
    %167 = math.exp %166 : vector<32x256xf32>
    %cst_66 = arith.constant 1.000000e+00 : f32
    %168 = vector.broadcast %cst_66 : f32 to vector<32x256xf32>
    %169 = arith.addf %168, %167 : vector<32x256xf32>
    %170 = arith.divf %168, %169 : vector<32x256xf32>
    %171 = arith.mulf %165, %170 : vector<32x256xf32>
    %172 = arith.truncf %171 : vector<32x256xf32> to vector<32x256xbf16>
    %c0_67 = arith.constant 0 : index
    %c0_68 = arith.constant 0 : index
    %173 = vector.load %arg9[%c0_67, %c0_68] : memref<256x128xbf16, #tpu.memory_space<vmem>>, vector<256x128xbf16>
    %cst_69 = arith.constant dense<0.000000e+00> : vector<32x128xf32>
    %174 = tpu.matmul %172, %173, %cst_69 {dimension_numbers = #tpu.dot_dimension_numbers<[1], [0], [0], [1], [0, 0, 1, 1], [], []>} : vector<32x256xbf16>, vector<256x128xbf16>, vector<32x128xf32> -> vector<32x128xf32>
    %c0_70 = arith.constant 0 : index
    %c0_71 = arith.constant 0 : index
    %175 = vector.load %arg10[%c0_70, %c0_71] : memref<1x128xf32, #tpu.memory_space<vmem>>, vector<1x128xf32>
    %176 = vector.shape_cast %175 : vector<1x128xf32> to vector<128xf32>
    %177 = vector.shape_cast %176 : vector<128xf32> to vector<1x128xf32>
    %178 = vector.broadcast %177 : vector<1x128xf32> to vector<32x128xf32>
    %179 = arith.addf %174, %178 : vector<32x128xf32>
    %c0_72 = arith.constant 0 : index
    %c0_73 = arith.constant 0 : index
    %c0_74 = arith.constant 0 : index
    %180 = vector.load %arg11[%c0_72, %c0_73, %c0_74] : memref<1x32x128xf32, #tpu.memory_space<vmem>>, vector<1x32x128xf32>
    %181 = vector.shape_cast %180 : vector<1x32x128xf32> to vector<32x128xf32>
    %182 = vector.shape_cast %179 : vector<32x128xf32> to vector<1x32x128xf32>
    tpu.vector_store %arg11[%c0_72, %c0_73, %c0_74], %182 {strides = array<i32>} : memref<1x32x128xf32, #tpu.memory_space<vmem>>, vector<1x32x128xf32>,
    return
  }
  func.func @transform_0(%arg0: i32, %arg1: i32) -> (i32, i32, i32, i32) {
    %c0_i32 = arith.constant 0 : i32
    %c0_i32_0 = arith.constant 0 : i32
    %c0_i32_1 = arith.constant 0 : i32
    return %arg0, %arg1, %c0_i32, %c0_i32_0 : i32, i32, i32, i32
  }
  func.func @transform_1(%arg0: i32, %arg1: i32) -> (i32, i32) {
    %c0_i32 = arith.constant 0 : i32
    %c0_i32_0 = arith.constant 0 : i32
    %c0_i32_1 = arith.constant 0 : i32
    return %c0_i32, %c0_i32_0 : i32, i32
  }
  func.func @transform_2(%arg0: i32, %arg1: i32) -> (i32, i32) {
    %c0_i32 = arith.constant 0 : i32
    %c0_i32_0 = arith.constant 0 : i32
    %c0_i32_1 = arith.constant 0 : i32
    return %c0_i32, %c0_i32_0 : i32, i32
  }
  func.func @transform_3(%arg0: i32, %arg1: i32) -> (i32, i32) {
    %c0_i32 = arith.constant 0 : i32
    %c0_i32_0 = arith.constant 0 : i32
    %c0_i32_1 = arith.constant 0 : i32
    return %c0_i32, %c0_i32_0 : i32, i32
  }
  func.func @transform_4(%arg0: i32, %arg1: i32) -> (i32, i32) {
    %c0_i32 = arith.constant 0 : i32
    %c0_i32_0 = arith.constant 0 : i32
    %c0_i32_1 = arith.constant 0 : i32
    return %c0_i32, %c0_i32_0 : i32, i32
  }
  func.func @transform_5(%arg0: i32, %arg1: i32) -> (i32, i32) {
    %c0_i32 = arith.constant 0 : i32
    %c0_i32_0 = arith.constant 0 : i32
    %c0_i32_1 = arith.constant 0 : i32
    return %c0_i32, %c0_i32_0 : i32, i32
  }
  func.func @transform_6(%arg0: i32, %arg1: i32) -> (i32, i32) {
    %c0_i32 = arith.constant 0 : i32
    %c0_i32_0 = arith.constant 0 : i32
    %c0_i32_1 = arith.constant 0 : i32
    return %c0_i32, %c0_i32_0 : i32, i32
  }
  func.func @transform_7(%arg0: i32, %arg1: i32) -> (i32, i32) {
    %c0_i32 = arith.constant 0 : i32
    %c0_i32_0 = arith.constant 0 : i32
    %c0_i32_1 = arith.constant 0 : i32
    return %c0_i32, %c0_i32_0 : i32, i32
  }
  func.func @transform_8(%arg0: i32, %arg1: i32) -> (i32, i32) {
    %c0_i32 = arith.constant 0 : i32
    %c0_i32_0 = arith.constant 0 : i32
    %c0_i32_1 = arith.constant 0 : i32
    return %c0_i32, %c0_i32_0 : i32, i32
  }
  func.func @transform_9(%arg0: i32, %arg1: i32) -> (i32, i32, i32) {
    %c0_i32 = arith.constant 0 : i32
    %c0_i32_0 = arith.constant 0 : i32
    return %arg0, %arg1, %c0_i32 : i32, i32, i32
  }
}

</mosaic_0001>

<bundles_post_ra>
// kernel: tpu_custom_call.1
= control target key start
LH: loop header
LB: loop body
LE: loop exit
PB: predicated region body
PF: predicated region fallthrough
CT: control target
= control target key end

     0   :  { %s4415_s0 = inlined_call_operand.hbm [shape: f32[2,3,48,128], index: 0, kind: input, shape index: {}]   ;;  %s4416_s1 = inlined_call_operand.vmem [shape: f32[1,128], index: 1, kind: input, shape index: {}]   ;;  %s4417_s2 = inlined_call_operand.hbm [shape: f32[1,128], index: 2, kind: input, shape index: {}]   ;;  %s4418_s3 = inlined_call_operand.hbm [shape: bf16[128,512], index: 3, kind: input, shape index: {}]   ;;  %s4419_s4 = inlined_call_operand.vmem [shape: f32[1,512], index: 4, kind: input, shape index: {}]   ;;  %s4420_s5 = inlined_call_operand.hbm [shape: f32[15,256], index: 5, kind: input, shape index: {}]   ;;  %s4421_s6 = inlined_call_operand.vmem [shape: f32[1,256], index: 6, kind: input, shape index: {}]   ;;  %s4422_s7 = inlined_call_operand.hbm [shape: bf16[256,128], index: 7, kind: input, shape index: {}]   ;;  %s4423_s8 = inlined_call_operand.vmem [shape: f32[1,128], index: 8, kind: input, shape index: {}]   ;;  %s4424_s9 = inlined_call_operand.hbm [shape: f32[2,96,128], index: 9, kind: output, shape index: {}]  }
   0x1   :  { %4443 = sst [smem:[#allocation21_spill]] %s4417_s2 }
   0x2   :  { %4444 = sst [smem:[#allocation22_spill]] %s4418_s3 }
   0x3   :  { %4445 = sst [smem:[#allocation23_spill]] %s4420_s5 }
   0x4   :  { %4446 = sst [smem:[#allocation24_spill]] %s4421_s6 }
   0x5   :  { %4447 = sst [smem:[#allocation25_spill]] %s4422_s7 }
   0x6   :  { %4448 = sst [smem:[#allocation26_spill]] %s4423_s8 }
   0x7   :  { %4449 = sst [smem:[#allocation27_spill]] %s4424_s9 }
   0x8   :  { %14 = vsyncpa [#allocation4], 0 }
   0x9   :  { %16 = vsyncpa [#allocation4 + $0x1], 0 }
   0xa   :  { %17 = vsyncpa [#allocation7], 0 }
   0xb   :  { %18 = vsyncpa [#allocation10], 0 }
   0xc   :  { %19 = vsyncpa [#allocation5], 0 }
   0xd   :  { %21 = vsyncpa [#allocation5 + $0x1], 0  ;;  %s3323_s30 = smov 0   ;;  %s3325_s10 = smov 0  }
   0xe   :  { %s3327_s11 = smov 0   ;;  %s3329_s12 = smov 0  }
   0xf   :  { %s3331_s13 = smov 0   ;;  %s3333_s14 = smov 0  }
  0x10   :  { %s3335_s15 = smov 0   ;;  %s3337_s16 = smov 0  }
  0x11 LB: > { %4450 = sst [smem:[#allocation17_spill]] %s3228_s30  ;;  %s2569_s17 = sadd.s32 4294967295, %s3256_s16   ;;  %s3256_s16 = sphi %s3337_s16, %s27_s16   ;;  %s3252_s15 = sphi %s3335_s15, %s4497_s15   ;;  %s3248_s14 = sphi %s3333_s14, %s4496_s14   ;;  %s3244_s13 = sphi %s3331_s13, %s4495_s13   ;;  %s3240_s12 = sphi %s3329_s12, %s4494_s12   ;;  %s3236_s11 = sphi %s3327_s11, %s4493_s11   ;;  %s3232_s10 = sphi %s3325_s10, %s4492_s10   ;;  %s3228_s30 = sphi %s3323_s30, %s4491_s30  }
  0x12   : > { %4451 = sst [smem:[#allocation18_spill]] %s3244_s13  ;;  %s2570_s18 = sadd.s32 4294967294, %s3256_s16  }
  0x13   : > { %p61_p0 = scmp.ne.s32.totalorder %s3232_s10, %s3228_s30  ;;  %p3367_p1 = scmp.eq.s32.totalorder %s2569_s17, 0 }
  0x14   : > { %p3371_p2 = scmp.eq.s32.totalorder %s2569_s17, 5  ;;  %p261_p3 = scmp.eq.s32.totalorder %s2570_s18, 5 }
  0x15   : > { %s4452_s19 = scalar_select %p3367_p1, 1, 0 }
  0x16   : > { %s4453_s20 = scalar_select %p3371_p2, 1, 0 }
  0x17   : > { %p3377_p4 = por %p3367_p1, %p61_p0  ;;  %p2571_p5 = scmp.ge.s32.totalorder %s3256_s16, 1 }
  0x18   : > { %p3382_p6 = por %p261_p3, %p61_p0  ;;  %p268_p7 = scmp.lt.s32.totalorder %s3256_s16, 7 }
  0x19   : > { %s4454_s21 = scalar_select %p3377_p4, 1, 0 }
  0x1a   : > { %s4455_s22 = scalar_select %p3382_p6, 1, 0 }
  0x1b   : > { %p3387_p8 = pnand %p2571_p5, %p268_p7  ;;  %s3258_s24 = smov [#allocation6]  }
  0x1c   : > { %4456 = sst [smem:[#allocation19_spill]] %s4455_s22  ;;  %s284_s25 = sshll.u32 %s3258_s24, 4  ;;  %s285_s25 = int_to_ptr.vmem [resolvable:$true] %s284_s25 }
  0x1d   : > { %s4457_s23 = scalar_select %p3387_p8, 1, 0 }
  0x1e   : > { %p2736_p9 = pneg %p3387_p8  ;;  %s3259_s27 = smov [#allocation9]  }
  0x1f   : > { %s310_s28 = sshll.u32 %s3259_s27, 4  ;;  %s3260_s29 = smov [#allocation8]   ;;  %s3399_s28 = int_to_ptr.vmem [resolvable:$true] %s310_s28 }
  0x20   : > { %p3395_p10 = pnand %p2736_p9, %p3367_p1  ;;  %s3401_s17 = sshll.u32 %s3260_s29, 4  ;;  %s295_s17 = int_to_ptr.vmem [resolvable:$true] %s3401_s17 }
  0x21   : > { %s4459_s2 = sld [smem:[#allocation21_spill]] }
  0x22   : > { %p3411_p12 = pneg %p3395_p10 }
  0x27   : > { %s3008_s24 = scalar_lea.hbm %s4459_s2, 16 }
  0x28   : > { %p3009_p11 = scmp.ne.s32.totalorder %s4459_s2, %s3008_s24  ;;  %p3015_p3 = scmp.lt.u32.totalorder %s3008_s24, %s4459_s2 }
  0x2a   : > { %p3011_p13 = pnand %p3411_p12, %p3009_p11 }
  0x2c   : > { %p3012_p0 = pneg %p3011_p13 }
  0x2e   : > { %p3017_p5 = pnand %p3015_p3, %p3012_p0 }
  0x30   : > { %3020 = shalt.err (!%p3017_p5)
}
  0x31   : > { %s3021_s22 = scalar_lea.vmem %s285_s25, 16  ;;  %s3028_s9 = scalar_lea.vmem %s285_s25, 32 }
  0x32   : > { %p3022_p7 = scmp.ne.s32.totalorder %s285_s25, %s3021_s22  ;;  %p3029_p1 = scmp.lt.s32.totalorder %s285_s25, %s285_s25 }
  0x33   : > { %p3030_p4 = scmp.lt.s32.totalorder %s3028_s9, %s3021_s22 }
  0x34   : > { %p3024_p9 = pnand %p3022_p7, %p3411_p12 }
  0x35   : > { %p3031_p8 = por %p3030_p4, %p3029_p1 }
  0x36   : > { %p3025_p6 = pneg %p3024_p9 }
  0x38   : > { %p3032_p2 = pnand %p3031_p8, %p3025_p6 }
  0x3a   : > { %3035 = shalt.err (!%p3032_p2)
}
  0x3b   : > { %2739 = dma.hbm_to_vmem [thread:$0]  (!%p3395_p10), %s4459_s2, 16, %s285_s25, [#allocation7]  }
  0x3c   : > { %s4461_s5 = sld [smem:[#allocation23_spill]] }
  0x42   : > { %s3036_s29 = scalar_lea.hbm %s4461_s5, 512 }
  0x43   : > { %p3037_p11 = scmp.ne.s32.totalorder %s4461_s5, %s3036_s29  ;;  %p3043_p2 = scmp.lt.u32.totalorder %s3036_s29, %s4461_s5 }
  0x45   : > { %p3039_p13 = pnand %p3037_p11, %p3411_p12 }
  0x47   : > { %p3040_p1 = pneg %p3039_p13 }
  0x49   : > { %p3045_p4 = pnand %p3043_p2, %p3040_p1 }
  0x4b   : > { %3048 = shalt.err (!%p3045_p4)
}
  0x4c   : > { %s3049_s25 = scalar_lea.vmem %s3399_s28, 512  ;;  %p3057_p3 = scmp.lt.s32.totalorder %s3399_s28, %s3399_s28 }
  0x4d   : > { %p3050_p6 = scmp.ne.s32.totalorder %s3399_s28, %s3049_s25  ;;  %p3058_p5 = scmp.lt.s32.totalorder %s3049_s25, %s3049_s25 }
  0x4f   : > { %p3052_p8 = pnand %p3050_p6, %p3411_p12  ;;  %p3059_p7 = por %p3058_p5, %p3057_p3 }
  0x51   : > { %p3053_p0 = pneg %p3052_p8 }
  0x53   : > { %p3060_p9 = pnand %p3059_p7, %p3053_p0 }
  0x55   : > { %3063 = shalt.err (!%p3060_p9)
}
  0x56   : > { %s3261_s6 = smov 256   ;;  %s3262_s13 = smov 16  }
  0x57   : > { %2745 = dma.hbm_to_vmem [thread:$0]  (!%p3395_p10), %s4461_s5, 512, %s3399_s28, [#allocation10], %s3261_s6, %s3261_s6, %s3262_s13  }
  0x58   : > { %s4462_s3 = sld [smem:[#allocation22_spill]] }
  0x5e   : > { %s3064_s29 = scalar_lea.hbm %s4462_s3, 4096 }
  0x5f   : > { %p3065_p11 = scmp.ne.s32.totalorder %s4462_s3, %s3064_s29  ;;  %p3071_p2 = scmp.lt.u32.totalorder %s3064_s29, %s4462_s3 }
  0x61   : > { %p3067_p13 = pnand %p3065_p11, %p3411_p12 }
  0x63   : > { %p3068_p1 = pneg %p3067_p13 }
  0x65   : > { %p3073_p4 = pnand %p3071_p2, %p3068_p1 }
  0x67   : > { %3076 = shalt.err (!%p3073_p4)
}
  0x68   : > { %s3077_s30 = scalar_lea.vmem %s295_s17, 4096  ;;  %p3085_p3 = scmp.lt.s32.totalorder %s295_s17, %s295_s17 }
  0x69   : > { %p3078_p6 = scmp.ne.s32.totalorder %s295_s17, %s3077_s30  ;;  %p3086_p5 = scmp.lt.s32.totalorder %s3077_s30, %s3077_s30 }
  0x6b   : > { %p3080_p8 = pnand %p3078_p6, %p3411_p12  ;;  %p3087_p7 = por %p3086_p5, %p3085_p3 }
  0x6d   : > { %p3081_p0 = pneg %p3080_p8 }
  0x6f   : > { %p3088_p9 = pnand %p3087_p7, %p3081_p0 }
  0x71   : > { %3091 = shalt.err (!%p3088_p9)
}
  0x72   : > { %2742 = dma.hbm_to_vmem [thread:$0]  (!%p3395_p10), %s4462_s3, 4096, %s295_s17, [#allocation7], %s3261_s6, %s3261_s6, %s3262_s13  }
  0x73   : > { %s3263_s2 = smov [#allocation11]   ;;  %s4463_s7 = sld [smem:[#allocation25_spill]] }
  0x74   : > { %s326_s24 = sshll.u32 %s3263_s2, 4  ;;  %s327_s24 = int_to_ptr.vmem [resolvable:$true] %s326_s24 }
  0x79   : > { %s3092_s22 = scalar_lea.hbm %s4463_s7, 2048 }
  0x7a   : > { %p3093_p11 = scmp.ne.s32.totalorder %s4463_s7, %s3092_s22  ;;  %p3099_p2 = scmp.lt.u32.totalorder %s3092_s22, %s4463_s7 }
  0x7c   : > { %p3095_p13 = pnand %p3093_p11, %p3411_p12 }
  0x7e   : > { %p3096_p1 = pneg %p3095_p13 }
  0x80   : > { %p3101_p4 = pnand %p3099_p2, %p3096_p1 }
  0x82   : > { %3104 = shalt.err (!%p3101_p4)
}
  0x83   : > { %s3105_s17 = scalar_lea.vmem %s327_s24, 2048  ;;  %p3113_p3 = scmp.lt.s32.totalorder %s327_s24, %s327_s24 }
  0x84   : > { %p3106_p6 = scmp.ne.s32.totalorder %s327_s24, %s3105_s17  ;;  %p3114_p5 = scmp.lt.s32.totalorder %s3105_s17, %s3105_s17 }
  0x86   : > { %p3108_p8 = pnand %p3106_p6, %p3411_p12  ;;  %p3115_p7 = por %p3114_p5, %p3113_p3 }
  0x88   : > { %p3109_p0 = pneg %p3108_p8 }
  0x8a   : > { %p3116_p9 = pnand %p3115_p7, %p3109_p0 }
  0x8c   : > { %3119 = shalt.err (!%p3116_p9)
}
  0x8d   : > { %s3264_s6 = smov 64   ;;  %s3265_s5 = smov 4  }
  0x8e   : > { %2748 = dma.hbm_to_vmem [thread:$0]  (!%p3395_p10), %s4463_s7, 2048, %s327_s24, [#allocation10], %s3264_s6, %s3264_s6, %s3265_s5  }
  0x8f   : > { %s36_s28 = sadd.s32 1, %s3248_s14  ;;  %s39_s18 = sadd.s32 1, %s3252_s15 }
  0x90   : > { %p37_p12 = scmp.ge.s32.totalorder %s36_s28, 3  ;;  %s48_s2 = sadd.s32 1, %s3236_s11 }
  0x91   : > { %p55_p11 = scmp.ne.s32.totalorder %s3236_s11, %s3232_s10  ;;  %p56_p13 = scmp.eq.s32.totalorder %s3256_s16, 0 }
  0x92   : > { %s4499_s28 = smov (%p37_p12, %s36_s28), 0  ;;  %s4501_s18 = smov (!%p37_p12, %s39_s18), %s3252_s15 }
  0x93   : > { %s44_s27 = ssub.s32 %s3248_s14, %s4499_s28  ;;  %p3498_p1 = por %p56_p13, %p55_p11 }
  0x94   : > { %p41_p10 = scmp.ge.s32.totalorder %s4501_s18, 2  ;;  %p4465_p2 = scmp.ne.s32.totalorder %s4453_s20, 0 }
  0x95   : > { %p2761_p6 = scmp.lt.s32.totalorder %s3256_s16, 6  ;;  %s343_s29 = sand.u32 1, %s3236_s11  }
  0x96   : > { %p3504_p4 = por %p4465_p2, %p55_p11  ;;  %s4503_s18 = smov (%p41_p10, %s4501_s18), 0 }
  0x97   : > { %4467 = sst [smem:[#allocation20_spill]] %s4503_s18  ;;  %s2711_s22 = smul.u32 48, %s343_s29 }
  0x98   : > { %s43_s9 = ssub.s32 %s3252_s15, %s4503_s18  ;;  %s2712_s25 = smul.u32 6, %s3248_s14 }
  0x99   : > { %s45_s30 = sor.u32 %s44_s27, %s43_s9  ;;  %s2713_s17 = smul.u32 18, %s3252_s15 }
  0x9a   : > { %p46_p8 = scmp.eq.s32.totalorder %s45_s30, 0  ;;  %s347_s6 = scalar_lea.vmem [#allocation3], %s2711_s22 }
  0x9b   : > { %s356_s5 = sshll.u32 %s347_s6, 4  ;;  %p3518_p0 = pnand %p2761_p6, %p3498_p1  ;;  %s3525_s5 = int_to_ptr.vmem [resolvable:$true] %s356_s5 }
  0x9c   : > { %s3523_s8 = scalar_select %p46_p8, %s3236_s11, %s48_s2  }
  0x9d   : > { %s353_s13 = sadd.s32 %s2713_s17, %s2712_s25  ;;  %s3532_s26 = scalar_lea.sflag [#allocation4], %s343_s29 }
  0x9e   : > { %s2577_s3 = sshll.u32 %s353_s13, 7  ;;  %p3122_p5 = pneg %p3518_p0 }
  0x9f   : > { %s3530_s27 = scalar_lea.hbm %s4415_s0, %s2577_s3  ;;  %s3125_s7 = scalar_lea.hbm %s4415_s0, 4608 }
  0xa0   : > { %s3120_s22 = scalar_lea.hbm %s3530_s27, 768  ;;  %p3126_p12 = scmp.lt.u32.totalorder %s3530_s27, %s4415_s0 }
  0xa1   : > { %p3121_p3 = scmp.ne.s32.totalorder %s3530_s27, %s3120_s22  ;;  %p3127_p11 = scmp.lt.u32.totalorder %s3125_s7, %s3120_s22 }
  0xa2   : > { %p3129_p1 = scmp.lt.u32.totalorder %s3120_s22, %s3530_s27 }
  0xa3   : > { %p3123_p7 = pnand %p3122_p5, %p3121_p3  ;;  %p3128_p13 = por %p3127_p11, %p3126_p12 }
  0xa5   : > { %p3124_p9 = pneg %p3123_p7  ;;  %p3130_p10 = por %p3129_p1, %p3128_p13 }
  0xa7   : > { %p3131_p2 = pnand %p3130_p10, %p3124_p9 }
  0xa9   : > { %3134 = shalt.err (!%p3131_p2)
}
  0xaa   : > { %s3135_s29 = scalar_lea.vmem %s3525_s5, 768  ;;  %s3266_s25 = smov [#allocation3]  }
  0xab   : > { %p3136_p6 = scmp.ne.s32.totalorder %s3525_s5, %s3135_s29  ;;  %s3140_s30 = sshll.u32 %s3266_s25, 4  ;;  %s3141_s30 = int_to_ptr.vmem [resolvable:$false] %s3140_s30 }
  0xac   : > { %s3142_s17 = scalar_lea.vmem %s3141_s30, 1536  ;;  %p3143_p7 = scmp.lt.s32.totalorder %s3525_s5, %s3141_s30 }
  0xad   : > { %p3138_p8 = pnand %p3136_p6, %p3122_p5  ;;  %p3144_p12 = scmp.lt.s32.totalorder %s3142_s17, %s3135_s29 }
  0xaf   : > { %p3139_p3 = pneg %p3138_p8  ;;  %p3145_p11 = por %p3144_p12, %p3143_p7 }
  0xb1   : > { %p3146_p13 = pnand %p3145_p11, %p3139_p3 }
  0xb3   : > { %3149 = shalt.err (!%p3146_p13)
}
  0xb4   : > { %s3267_s6 = smov 128   ;;  %s3268_s13 = smov 8  }
  0xb5   : > { %2752 = dma.hbm_to_vmem [thread:$0]  (!%p3518_p0), %s3530_s27, 768, %s3525_s5, %s3532_s26, %s3267_s6, %s3267_s6, %s3268_s13  }
  0xb6   : > { %p4469_p5 = scmp.ne.s32.totalorder %s4457_s23, 0 }
  0xb7   : > { %s3563_s22 = sand.u32 (!%p4469_p5), 1, %s3232_s10   ;;  %p4470_p9 = scmp.ne.s32.totalorder (!%p4469_p5), %s4454_s21, 0 }
  0xb8   : > { %368 = sbr.rel (%p4469_p5) target bundleno = 1242 (0x4da), region = 56  ;;  %s371_s9 = scalar_lea.sflag (!%p4469_p5), [#allocation4], %s3563_s22 }
  0xb9   : > { %s2714_s2 = smul.u32 (!%p4469_p5), 48, %s3563_s22 }
  0xbb   : > { %s374_s7 = scalar_lea.vmem (!%p4469_p5), [#allocation3], %s2714_s2 }
  0xbf   : > { %3211 = dma.done.wait (%p4470_p9), %s371_s9, 768  }
  0xc0   : > { %3213 = vsyncadd (%p4470_p9), %s371_s9, 4294966528  ;;  %p4471_p1 = scmp.ne.s32.totalorder %s4452_s19, 0 }
  0xc2   : > { %3215 = dma.done.wait (%p4471_p1), [#allocation7], 4112  }
  0xc3   : > { %3217 = vsyncadd (%p4471_p1), [#allocation7], 4294963184 }
  0xc4   : > { %3219 = dma.done.wait (%p4471_p1), [#allocation10], 2560  }
  0xc5   : > { %3221 = vsyncadd (%p4471_p1), [#allocation10], 4294964736  ;;  %v427_v0 = vld [vmem:[%s374_s7] sm:$0xff]  ;;  %v429_v1 = vld [vmem:[%s374_s7 + $0x10] sm:$0xff]  ;;  %s2583_s21 = sshll.u32 %s3563_s22, 5  ;;  %v3269_v60 = vmov 0  }
  0xc6   : > { %433 = vadd.xlane.f32.xlu0 %v427_v0  ;;  %437 = vadd.xlane.f32.xlu1 %v429_v1  ;;  %v428_v2 = vld [vmem:[%s374_s7 + $0x8] sm:$0xff]  ;;  %v430_v3 = vld [vmem:[%s374_s7 + $0x18] sm:$0xff]  ;;  %v431_v4 = vld [vmem:[%s374_s7 + $0x20] sm:$0xff]  ;;  %s2665_s5 = sshll.u32 %s3240_s12, 5  ;;  %p953_p0 = scmp.eq.s32.totalorder %s3240_s12, 0 }
  0xc7   : > { %v432_v5 = vld [vmem:[%s374_s7 + $0x28] sm:$0xff]  ;;  %v2848_v8 = vld [vmem:[#allocation8] ss:$16 sps:$4 sm:$0xff]   ;;  %775 = vmatprep.mubr.bf16.mxu0 %v3269_v60  ;;  %838 = vmatprep.mubr.bf16.mxu1 %v3269_v60  ;;  %s2666_s20 = sadd.s32 32, %s2665_s5  ;;  %s3726_s29 = scalar_lea.vmem [#allocation12], %s2583_s21 }
  0xc8   : > { %v2844_v6 = vld [vmem:[#allocation8 + $0x4] ss:$16 sps:$4 sm:$0xff]   ;;  %v2846_v7 = vld [vmem:[#allocation8 + $0xc] ss:$16 sps:$4 sm:$0xff]   ;;  %v2849_v9 = vld [vmem:[#allocation8 + $0x8] ss:$16 sps:$4 sm:$0xff]  }
  0xc9   : > { %743 = vmatprep.subr.bf16.mxu0 %v2844_v6  ;;  %806 = vmatprep.subr.bf16.mxu1 %v2846_v7  ;;  %v2850_v10 = vld [vmem:[#allocation8 + $0x24] ss:$16 sps:$4 sm:$0xff]   ;;  %v2852_v11 = vld [vmem:[#allocation8 + $0x2c] ss:$16 sps:$4 sm:$0xff]   ;;  %v2854_v36 = vld [vmem:[#allocation8 + $0x20] ss:$16 sps:$4 sm:$0xff]  }
  0xca   : > { %435 = vadd.xlane.f32.xlu0 %v428_v2  ;;  %439 = vadd.xlane.f32.xlu1 %v430_v3  ;;  %v2855_v37 = vld [vmem:[#allocation8 + $0x28] ss:$16 sps:$4 sm:$0xff]   ;;  %v2856_v38 = vld [vmem:[#allocation8 + $0x44] ss:$16 sps:$4 sm:$0xff]   ;;  %v2858_v39 = vld [vmem:[#allocation8 + $0x4c] ss:$16 sps:$4 sm:$0xff]  }
  0xcb   : > { %744 = vmatpush1.bf16.msra.mxu0 %v2848_v8  ;;  %807 = vmatpush1.bf16.msra.mxu1 %v2849_v9  ;;  %v2860_v40 = vld [vmem:[#allocation8 + $0x40] ss:$16 sps:$4 sm:$0xff]   ;;  %v2861_v41 = vld [vmem:[#allocation8 + $0x48] ss:$16 sps:$4 sm:$0xff]   ;;  %v2862_v42 = vld [vmem:[#allocation8 + $0x64] ss:$16 sps:$4 sm:$0xff]  }
  0xcc   : > { %745 = vmatprep.subr.bf16.mxu0 %v2850_v10  ;;  %808 = vmatprep.subr.bf16.mxu1 %v2852_v11  ;;  %v2864_v43 = vld [vmem:[#allocation8 + $0x6c] ss:$16 sps:$4 sm:$0xff]   ;;  %v2866_v44 = vld [vmem:[#allocation8 + $0x60] ss:$16 sps:$4 sm:$0xff]   ;;  %v2867_v45 = vld [vmem:[#allocation8 + $0x68] ss:$16 sps:$4 sm:$0xff]  }
  0xcd   : > { %v2868_v46 = vld [vmem:[#allocation8 + $0x84] ss:$16 sps:$4 sm:$0xff]   ;;  %v2870_v47 = vld [vmem:[#allocation8 + $0x8c] ss:$16 sps:$4 sm:$0xff]   ;;  %v2872_v48 = vld [vmem:[#allocation8 + $0x80] ss:$16 sps:$4 sm:$0xff]  }
  0xce   : > { %441 = vadd.xlane.f32.xlu0 %v431_v4  ;;  %443 = vadd.xlane.f32.xlu1 %v432_v5  ;;  %v2873_v49 = vld [vmem:[#allocation8 + $0x88] ss:$16 sps:$4 sm:$0xff]   ;;  %v2874_v50 = vld [vmem:[#allocation8 + $0xa4] ss:$16 sps:$4 sm:$0xff]   ;;  %v2876_v51 = vld [vmem:[#allocation8 + $0xac] ss:$16 sps:$4 sm:$0xff]  }
  0xcf   : > { %746 = vmatpush1.bf16.msra.mxu0 %v2854_v36  ;;  %809 = vmatpush1.bf16.msra.mxu1 %v2855_v37  ;;  %v2878_v52 = vld [vmem:[#allocation8 + $0xa0] ss:$16 sps:$4 sm:$0xff]   ;;  %v2879_v53 = vld [vmem:[#allocation8 + $0xa8] ss:$16 sps:$4 sm:$0xff]   ;;  %v2880_v54 = vld [vmem:[#allocation8 + $0xc4] ss:$16 sps:$4 sm:$0xff]  }
  0xd0   : > { %747 = vmatprep.subr.bf16.mxu0 %v2856_v38  ;;  %810 = vmatprep.subr.bf16.mxu1 %v2858_v39  ;;  %v2882_v55 = vld [vmem:[#allocation8 + $0xcc] ss:$16 sps:$4 sm:$0xff]   ;;  %v2884_v56 = vld [vmem:[#allocation8 + $0xc0] ss:$16 sps:$4 sm:$0xff]   ;;  %v2885_v57 = vld [vmem:[#allocation8 + $0xc8] ss:$16 sps:$4 sm:$0xff]  }
  0xd1   : > { %v2886_v58 = vld [vmem:[#allocation8 + $0xe4] ss:$16 sps:$4 sm:$0xff]   ;;  %v2888_v59 = vld [vmem:[#allocation8 + $0xec] ss:$16 sps:$4 sm:$0xff]   ;;  %v2890_v61 = vld [vmem:[#allocation8 + $0xe0] ss:$16 sps:$4 sm:$0xff]  }
  0xd2   : > { %v2891_v62 = vld [vmem:[#allocation8 + $0xe8] ss:$16 sps:$4 sm:$0xff]   ;;  %s956_s27 = sadd.s32 8, %s2666_s20 }
  0xd3   : > { %748 = vmatpush1.bf16.msra.mxu0 %v2860_v40  ;;  %811 = vmatpush1.bf16.msra.mxu1 %v2861_v41  ;;  %p957_p10 = scmp.gt.s32.totalorder %s956_s27, 90 }
  0xd4   : > { %749 = vmatprep.subr.bf16.mxu0 %v2862_v42  ;;  %812 = vmatprep.subr.bf16.mxu1 %v2864_v43 }
  0xd5   : > { %p3623_p2 = por %p957_p10, %p953_p0 }
  0xd6   : > { %s2632_s25 = sadd.s32 (%p3623_p2), 4294967288, %s2665_s5 }
  0xd7   : > { %750 = vmatpush1.bf16.msra.mxu0 %v2866_v44  ;;  %813 = vmatpush1.bf16.msra.mxu1 %v2867_v45 }
  0xd8   : > { %751 = vmatprep.subr.bf16.mxu0 %v2868_v46  ;;  %814 = vmatprep.subr.bf16.mxu1 %v2870_v47 }
  0xdb   : > { %752 = vmatpush1.bf16.msra.mxu0 %v2872_v48  ;;  %815 = vmatpush1.bf16.msra.mxu1 %v2873_v49  ;;  %v3633_v49 = vld [vmem:[%s4419_s4] sm:$0xf] }
  0xdc   : > { %753 = vmatprep.subr.bf16.mxu0 %v2874_v50  ;;  %816 = vmatprep.subr.bf16.mxu1 %v2876_v51 }
  0xdf   : > { %754 = vmatpush1.bf16.msra.mxu0 %v2878_v52  ;;  %817 = vmatpush1.bf16.msra.mxu1 %v2879_v53 }
  0xe0   : > { %755 = vmatprep.subr.bf16.mxu0 %v2880_v54  ;;  %818 = vmatprep.subr.bf16.mxu1 %v2882_v55 }
  0xe3   : > { %756 = vmatpush1.bf16.msra.mxu0 %v2884_v56  ;;  %819 = vmatpush1.bf16.msra.mxu1 %v2885_v57 }
  0xe4   : > { %757 = vmatprep.subr.bf16.mxu0 %v2886_v58  ;;  %820 = vmatprep.subr.bf16.mxu1 %v2888_v59 }
  0xe7   : > { %758 = vmatpush1.bf16.msra.mxu0 %v2890_v61  ;;  %821 = vmatpush1.bf16.msra.mxu1 %v2891_v62 }
 0x153   : > { %v434_v12 = vpop.xlane.xlu0 %433  ;;  %v438_v13 = vpop.xlane.xlu1 %437 }
 0x154   : > { %v446_v14 = vmul.f32 0.0078125, %v434_v12  ;;  %v448_v15 = vmul.f32 0.0078125, %v438_v13 }
 0x156   : > { %v3580_v16 = vsub.f32 %v427_v0, %v446_v14  ;;  %v3582_v17 = vsub.f32 %v429_v1, %v448_v15 }
 0x157   : > { %v436_v18 = vpop.xlane.xlu0 %435  ;;  %v440_v19 = vpop.xlane.xlu1 %439 }
 0x158   : > { %v447_v20 = vmul.f32 0.0078125, %v436_v18  ;;  %v458_v21 = vmul.f32 %v3580_v16, %v3580_v16  ;;  %v449_v22 = vmul.f32 0.0078125, %v440_v19  ;;  %v460_v25 = vmul.f32 %v3582_v17, %v3582_v17 }
 0x15a   : > { %v3586_v23 = vsub.f32 %v428_v2, %v447_v20  ;;  %464 = vadd.xlane.f32.xlu0 %v458_v21  ;;  %v3588_v24 = vsub.f32 %v430_v3, %v449_v22  ;;  %v2584_v21 = vld [vmem:[%s4416_s1] ss:$0 sm:$0xff] }
 0x15b   : > { %v442_v26 = vpop.xlane.xlu0 %441  ;;  %v444_v27 = vpop.xlane.xlu1 %443 }
 0x15c   : > { %v450_v28 = vmul.f32 0.0078125, %v442_v26  ;;  %v459_v29 = vmul.f32 %v3586_v23, %v3586_v23  ;;  %v451_v30 = vmul.f32 0.0078125, %v444_v27  ;;  %v461_v33 = vmul.f32 %v3588_v24, %v3588_v24 }
 0x15e   : > { %v3594_v31 = vsub.f32 %v431_v4, %v450_v28  ;;  %468 = vadd.xlane.f32.xlu0 %v460_v25  ;;  %466 = vadd.xlane.f32.xlu1 %v459_v29  ;;  %v3596_v32 = vsub.f32 %v432_v5, %v451_v30  ;;  %v2585_v28 = vld [vmem:[#allocation6] ss:$0 sm:$0xff] }
 0x160   : > { %v462_v34 = vmul.f32 %v3594_v31, %v3594_v31  ;;  %v463_v35 = vmul.f32 %v3596_v32, %v3596_v32 }
 0x162   : > { %470 = vadd.xlane.f32.xlu1 %v461_v33  ;;  %472 = vadd.xlane.f32.xlu0 %v462_v34 }
 0x166   : > { %474 = vadd.xlane.f32.xlu1 %v463_v35 }
 0x1e7   : > { %v465_v63 = vpop.xlane.xlu0 %464 }
 0x1e8   : > { %v476_v0 = vmul.f32 0.0078125, %v465_v63 }
 0x1ea   : > { %v482_v1 = vadd.f32 1e-05, %v476_v0 }
 0x1eb   : > { %v467_v2 = vpop.xlane.xlu1 %466  ;;  %v469_v3 = vpop.xlane.xlu0 %468 }
 0x1ec   : > { %2892 = vrsqrt.f32 %v482_v1  ;;  %v477_v4 = vmul.f32 0.0078125, %v467_v2  ;;  %v478_v5 = vmul.f32 0.0078125, %v469_v3 }
 0x1ee   : > { %v483_v6 = vadd.f32 1e-05, %v477_v4  ;;  %v484_v7 = vadd.f32 1e-05, %v478_v5 }
 0x1ef   : > { %v471_v8 = vpop.xlane.xlu1 %470  ;;  %v473_v9 = vpop.xlane.xlu0 %472 }
 0x1f0   : > { %2894 = vrsqrt.f32 %v483_v6  ;;  %v479_v10 = vmul.f32 0.0078125, %v471_v8  ;;  %v480_v12 = vmul.f32 0.0078125, %v473_v9 }
 0x1f1   : > { %2896 = vrsqrt.f32 %v484_v7 }
 0x1f2   : > { %v485_v11 = vadd.f32 1e-05, %v479_v10  ;;  %v486_v18 = vadd.f32 1e-05, %v480_v12 }
 0x1f3   : > { %v475_v13 = vpop.xlane.xlu1 %474 }
 0x1f4   : > { %2898 = vrsqrt.f32 %v485_v11  ;;  %v481_v14 = vmul.f32 0.0078125, %v475_v13 }
 0x1f6   : > { %v2893_v15 = vpop.eup %2892  ;;  %v487_v19 = vadd.f32 1e-05, %v481_v14 }
 0x1f7   : > { %v494_v20 = vmul.f32 %v2893_v15, %v3580_v16 }
 0x1f8   : > { %2900 = vrsqrt.f32 %v487_v19 }
 0x1f9   : > { %2902 = vrsqrt.f32 %v486_v18  ;;  %v507_v26 = vmul.f32 %v2584_v21, %v494_v20 }
 0x1fa   : > { %v2895_v22 = vpop.eup %2894 }
 0x1fb   : > { %v495_v25 = vmul.f32 %v2895_v22, %v3586_v23  ;;  %v2897_v27 = vpop.eup %2896  ;;  %v520_v33 = vadd.f32 %v2585_v28, %v507_v26 }
 0x1fc   : > { %v496_v35 = vmul.f32 %v2897_v27, %v3582_v17 }
 0x1fd   : > { %v508_v29 = vmul.f32 %v2584_v21, %v495_v25 }
 0x1fe   : > { %v2899_v30 = vpop.eup %2898  ;;  %v509_v39 = vmul.f32 %v2584_v21, %v496_v35 }
 0x1ff   : > { %v521_v34 = vadd.f32 %v2585_v28, %v508_v29  ;;  %v497_v16 = vmul.f32 %v2899_v30, %v3588_v24 }
 0x200   : > { %v522_v42 = vadd.f32 %v2585_v28, %v509_v39 }
 0x201   : > { %v526_v36 = vpack.c.bf16 %v521_v34, %v520_v33  ;;  %v510_v37 = vmul.f32 %v2584_v21, %v497_v16 }
 0x202   : > { %v2901_v38 = vpop.eup %2900 }
 0x203   : > { %776 = vmatmul.mubr.bf16.vlgmr.msra.gmra.mrb[0].mxu0 %v526_v36  ;;  %839 = vmatmul.mubr.bf16.vlgmr.msra.gmra.mrb[0].mxu1 %v526_v36  ;;  %v2903_v40 = vpop.eup %2902  ;;  %v523_v23 = vadd.f32 %v2585_v28, %v510_v37  ;;  %v499_v41 = vmul.f32 %v2901_v38, %v3596_v32 }
 0x204   : > { %785 = vmatprep.mubr.bf16.mxu0 %v3269_v60  ;;  %848 = vmatprep.mubr.bf16.mxu1 %v3269_v60  ;;  %v498_v17 = vmul.f32 %v2903_v40, %v3594_v31  ;;  %v563_v31 = vlaneseq }
 0x205   : > { %v527_v24 = vpack.c.bf16 %v523_v23, %v522_v42  ;;  %v512_v43 = vmul.f32 %v2584_v21, %v499_v41 }
 0x206   : > { %v511_v44 = vmul.f32 %v2584_v21, %v498_v17  ;;  %v3627_v32 = vshrl.u32 %v563_v31, 7 }
 0x207   : > { %v525_v45 = vadd.f32 %v2585_v28, %v512_v43 }
 0x208   : > { %v524_v46 = vadd.f32 %v2585_v28, %v511_v44  ;;  %v573_v48 = vsub.s32 2, %v3627_v32  ;;  %v577_v50 = vsub.s32 3, %v3627_v32  ;;  %v3675_v23 = vsub.s32 0, %v3627_v32 }
 0x209   : > { %v3680_v43 = vsub.s32 1, %v3627_v32 }
 0x20a   : > { %v528_v47 = vpack.c.bf16 %v525_v45, %v524_v46  ;;  %v3637_v51 = vrot.slane %v3633_v49, %v573_v48  ;;  %v3640_v52 = vrot.slane %v3633_v49, %v577_v50  ;;  %v566_v48 = vrot.slane %v3633_v49, %v3675_v23 }
 0x20b   : > { %786 = vmatmul.mubr.bf16.gmra.mrb[4].mxu0 %v527_v24  ;;  %849 = vmatmul.mubr.bf16.gmra.mrb[4].mxu1 %v527_v24 }
 0x20c   : > { %795 = vmatprep.mubr.bf16.mxu0 %v3269_v60  ;;  %858 = vmatprep.mubr.bf16.mxu1 %v3269_v60 }
 0x213   : > { %796 = vmatmul.mubr.bf16.gmra.mrb[8].mxu0 %v528_v47  ;;  %859 = vmatmul.mubr.bf16.gmra.mrb[8].mxu1 %v528_v47 }
 0x2d6   : > { %v3642_v53 = vpop.f32.mrb[0].mxu0  ;;  %v840_v54 = vpop.f32.mrb[0].mxu1 }
 0x2d7   : > { %v841_v55 = vadd.f32 %v840_v54, %v3637_v51  ;;  %v3645_v56 = vpop.f32.mrb[1].mxu0  ;;  %v842_v57 = vpop.f32.mrb[1].mxu1 }
 0x2d8   : > { %v843_v58 = vadd.f32 %v842_v57, %v3640_v52  ;;  %v3648_v59 = vpop.f32.mrb[2].mxu0  ;;  %v844_v60 = vpop.f32.mrb[2].mxu1 }
 0x2d9   : > { %v2618_v61 = vmul.f32 -1.442695, %v841_v55  ;;  %v845_v62 = vadd.f32 %v844_v60, %v3637_v51  ;;  %v3651_v63 = vpop.f32.mrb[3].mxu0  ;;  %v846_v0 = vpop.f32.mrb[3].mxu1  ;;  %v570_v55 = vrot.slane %v3633_v49, %v3680_v43  ;;  %v782_v49 = vadd.f32 %v3648_v59, %v566_v48 }
 0x2da   : > { %v2619_v1 = vmul.f32 -1.442695, %v843_v58  ;;  %v847_v2 = vadd.f32 %v846_v0, %v3640_v52 }
 0x2db   : > { %2904 = vpow2.f32 %v2618_v61  ;;  %v2620_v3 = vmul.f32 -1.442695, %v845_v62  ;;  %v778_v61 = vadd.f32 %v3642_v53, %v566_v48 }
 0x2dc   : > { %2906 = vpow2.f32 %v2619_v1  ;;  %v2621_v4 = vmul.f32 -1.442695, %v847_v2  ;;  %v780_v1 = vadd.f32 %v3645_v56, %v570_v55 }
 0x2dd   : > { %2908 = vpow2.f32 %v2620_v3 }
 0x2de   : > { %2910 = vpow2.f32 %v2621_v4  ;;  %v3654_v5 = vpop.f32.mrb[4].mxu0  ;;  %v850_v6 = vpop.f32.mrb[4].mxu1 }
 0x2df   : > { %v851_v7 = vadd.f32 %v850_v6, %v3637_v51  ;;  %v3657_v8 = vpop.f32.mrb[5].mxu0  ;;  %v852_v9 = vpop.f32.mrb[5].mxu1 }
 0x2e0   : > { %v853_v10 = vadd.f32 %v852_v9, %v3640_v52  ;;  %v3660_v11 = vpop.f32.mrb[6].mxu0  ;;  %v854_v12 = vpop.f32.mrb[6].mxu1 }
 0x2e1   : > { %v2622_v13 = vmul.f32 -1.442695, %v851_v7  ;;  %v855_v14 = vadd.f32 %v854_v12, %v3637_v51  ;;  %v3663_v15 = vpop.f32.mrb[7].mxu0  ;;  %v856_v18 = vpop.f32.mrb[7].mxu1  ;;  %v784_v7 = vadd.f32 %v3651_v63, %v570_v55 }
 0x2e2   : > { %v2623_v19 = vmul.f32 -1.442695, %v853_v10  ;;  %v857_v20 = vadd.f32 %v856_v18, %v3640_v52 }
 0x2e3   : > { %2912 = vpow2.f32 %v2622_v13  ;;  %v2624_v21 = vmul.f32 -1.442695, %v855_v14 }
 0x2e4   : > { %2914 = vpow2.f32 %v2623_v19  ;;  %v2625_v22 = vmul.f32 -1.442695, %v857_v20  ;;  %v788_v20 = vadd.f32 %v3654_v5, %v566_v48 }
 0x2e5   : > { %v2905_v25 = vpop.eup %2904  ;;  %2916 = vpow2.f32 %v2624_v21 }
 0x2e6   : > { %v2907_v26 = vpop.eup %2906  ;;  %v905_v27 = vadd.f32 1.0, %v2905_v25  ;;  %2918 = vpow2.f32 %v2625_v22  ;;  %v3666_v28 = vpop.f32.mrb[8].mxu0  ;;  %v790_v22 = vadd.f32 %v3657_v8, %v570_v55 }
 0x2e7   : > { %v860_v29 = vpop.f32.mrb[8].mxu1  ;;  %v2909_v30 = vpop.eup %2908  ;;  %v906_v33 = vadd.f32 1.0, %v2907_v26  ;;  %v798_v8 = vadd.f32 %v3666_v28, %v566_v48  ;;  %v966_v28 = vadd.s32 (%p3623_p2), 8, %v3627_v32 }
 0x2e8   : > { %v861_v34 = vadd.f32 %v860_v29, %v3637_v51  ;;  %v3669_v35 = vpop.f32.mrb[9].mxu0  ;;  %v862_v16 = vpop.f32.mrb[9].mxu1  ;;  %2920 = vrcp.f32 %v905_v27  ;;  %v907_v37 = vadd.f32 1.0, %v2909_v30  ;;  %v792_v27 = vadd.f32 %v3660_v11, %v566_v48 }
 0x2e9   : > { %v2911_v36 = vpop.eup %2910  ;;  %v863_v38 = vadd.f32 %v862_v16, %v3640_v52  ;;  %v3672_v39 = vpop.f32.mrb[10].mxu0  ;;  %2922 = vrcp.f32 %v906_v33  ;;  %v794_v33 = vadd.f32 %v3663_v15, %v570_v55 }
 0x2ea   : > { %v864_v40 = vpop.f32.mrb[10].mxu1  ;;  %v908_v41 = vadd.f32 1.0, %v2911_v36  ;;  %v2626_v42 = vmul.f32 -1.442695, %v861_v34  ;;  %v3677_v17 = vpop.f32.mrb[11].mxu0  ;;  %2924 = vrcp.f32 %v907_v37  ;;  %v800_v37 = vadd.f32 %v3669_v35, %v570_v55 }
 0x2eb   : > { %v866_v24 = vpop.f32.mrb[11].mxu1  ;;  %v2627_v44 = vmul.f32 -1.442695, %v863_v38  ;;  %v865_v45 = vadd.f32 %v864_v40, %v3637_v51  ;;  %v802_v40 = vadd.f32 %v3672_v39, %v566_v48  ;;  %v804_v15 = vadd.f32 %v3677_v17, %v570_v55 }
 0x2ec   : > { %2926 = vrcp.f32 %v908_v41  ;;  %v867_v46 = vadd.f32 %v866_v24, %v3640_v52  ;;  %v967_v35 = vadd.s32 (%p3623_p2), 16, %v3627_v32  ;;  %v968_v39 = vadd.s32 (%p3623_p2), 24, %v3627_v32 }
 0x2ed   : > { %2928 = vpow2.f32 %v2626_v42  ;;  %v2628_v47 = vmul.f32 -1.442695, %v865_v45  ;;  %v2913_v31 = vpop.eup %2912  ;;  %v969_v17 = vadd.s32 (%p3623_p2), 32, %v3627_v32 }
 0x2ee   : > { %2930 = vpow2.f32 %v2627_v44  ;;  %v2629_v50 = vmul.f32 -1.442695, %v867_v46  ;;  %v2915_v54 = vpop.eup %2914  ;;  %v909_v57 = vadd.f32 1.0, %v2913_v31  ;;  %v971_v46 = vstv (%p3623_p2), %s2632_s25 }
 0x2ef   : > { %2932 = vpow2.f32 %v2628_v47  ;;  %v2917_v58 = vpop.eup %2916  ;;  %v910_v60 = vadd.f32 1.0, %v2915_v54  ;;  %v970_v47 = vadd.s32 (%p3623_p2), 40, %v3627_v32  ;;  %v972_v31 = vadd.s32 (%p3623_p2), %v971_v46, %v3627_v32 }
 0x2f0   : > { %2934 = vpow2.f32 %v2629_v50  ;;  %v2919_v51 = vpop.eup %2918  ;;  %v911_v52 = vadd.f32 1.0, %v2917_v58  ;;  %v973_v48 = vadd.s32 (%p3623_p2), %v971_v46, %v966_v28  ;;  %v974_v50 = vadd.s32 (%p3623_p2), %v971_v46, %v967_v35 }
 0x2f1   : > { %2936 = vrcp.f32 %v909_v57  ;;  %v912_v62 = vadd.f32 1.0, %v2919_v51  ;;  %v975_v54 = vadd.s32 (%p3623_p2), %v971_v46, %v968_v39  ;;  %v976_v55 = vadd.s32 (%p3623_p2), %v971_v46, %v969_v17 }
 0x2f2   : > { %2938 = vrcp.f32 %v910_v60  ;;  %v2921_v0 = vpop.eup %2920  ;;  %v977_v57 = vadd.s32 (%p3623_p2), %v971_v46, %v970_v47  ;;  %vm978_vm0 = vcmp.ge.s32.totalorder (%p3623_p2), %v972_v31, 0  ;;  %vm984_vm1 = vcmp.lt.s32.totalorder (%p3623_p2), %v972_v31, 90 }
 0x2f3   : > { %2940 = vrcp.f32 %v911_v52  ;;  %v2923_v2 = vpop.eup %2922  ;;  %v3690_v3 = vmul.f32 %v2921_v0, %v778_v61  ;;  %vm979_vm2 = vcmp.ge.s32.totalorder (%p3623_p2), %v973_v48, 0  ;;  %vm985_vm3 = vcmp.lt.s32.totalorder (%p3623_p2), %v973_v48, 90  ;;  %vm990_vm4 = vmand (%p3623_p2), %vm978_vm0, %vm984_vm1 }
 0x2f4   : > { %2942 = vrcp.f32 %v912_v62  ;;  %v2925_v4 = vpop.eup %2924  ;;  %v3693_v6 = vmul.f32 %v2923_v2, %v780_v1  ;;  %vm980_vm5 = vcmp.ge.s32.totalorder (%p3623_p2), %v974_v50, 0  ;;  %vm986_vm6 = vcmp.lt.s32.totalorder (%p3623_p2), %v974_v50, 90  ;;  %vm991_vm9 = vmand (%p3623_p2), %vm979_vm2, %vm985_vm3 }
 0x2f5   : > { %v3696_v10 = vmul.f32 %v2925_v4, %v782_v49  ;;  %vm981_vm7 = vcmp.ge.s32.totalorder (%p3623_p2), %v975_v54, 0  ;;  %vm987_vm8 = vcmp.lt.s32.totalorder (%p3623_p2), %v975_v54, 90  ;;  %v1008_v58 = vsel (%p3623_p2), %vm990_vm4, %v3690_v3, 0.0  ;;  %vm992_vm12 = vmand (%p3623_p2), %vm980_vm5, %vm986_vm6 }
 0x2f6   : > { %v2927_v9 = vpop.eup %2926  ;;  %v1009_v60 = vsel (%p3623_p2), %vm990_vm4, %v3693_v6, 0.0  ;;  %vm982_vm10 = vcmp.ge.s32.totalorder (%p3623_p2), %v976_v55, 0  ;;  %vm988_vm11 = vcmp.lt.s32.totalorder (%p3623_p2), %v976_v55, 90  ;;  %1020 = vst [vmem:[#allocation2] sm:$0xff] (%p3623_p2), %v1008_v58  ;;  %vm983_vm13 = vcmp.ge.s32.totalorder (%p3623_p2), %v977_v57, 0  ;;  %vm993_vm15 = vmand (%p3623_p2), %vm981_vm7, %vm987_vm8 }
 0x2f7   : > { %v2929_v53 = vpop.eup %2928  ;;  %v3698_v12 = vmul.f32 %v2927_v9, %v784_v7  ;;  %1021 = vst [vmem:[#allocation2 + $0x8] sm:$0xff] (%p3623_p2), %v1009_v60  ;;  %v1010_v32 = vsel (%p3623_p2), %vm991_vm9, %v3696_v10, 0.0  ;;  %vm989_vm14 = vcmp.lt.s32.totalorder (%p3623_p2), %v977_v57, 90  ;;  %vm994_vm0 = vmand (%p3623_p2), %vm982_vm10, %vm988_vm11 }
 0x2f8   : > { %v2931_v13 = vpop.eup %2930  ;;  %v913_v56 = vadd.f32 1.0, %v2929_v53  ;;  %1022 = vst [vmem:[#allocation2 + $0x10] sm:$0xff] (%p3623_p2), %v1010_v32  ;;  %vm995_vm1 = vmand (%p3623_p2), %vm983_vm13, %vm989_vm14 }
 0x2f9   : > { %v2933_v14 = vpop.eup %2932  ;;  %v914_v18 = vadd.f32 1.0, %v2931_v13  ;;  %v1011_v51 = vsel (%p3623_p2), %vm991_vm9, %v3698_v12, 0.0 }
 0x2fa   : > { %v2935_v19 = vpop.eup %2934  ;;  %2944 = vrcp.f32 %v913_v56  ;;  %v915_v59 = vadd.f32 1.0, %v2933_v14  ;;  %1023 = vst [vmem:[#allocation2 + $0x18] sm:$0xff] (%p3623_p2), %v1011_v51 }
 0x2fb   : > { %v2937_v21 = vpop.eup %2936  ;;  %2946 = vrcp.f32 %v914_v18  ;;  %v916_v63 = vadd.f32 1.0, %v2935_v19 }
 0x2fc   : > { %v2939_v25 = vpop.eup %2938  ;;  %v3702_v26 = vmul.f32 %v2937_v21, %v788_v20  ;;  %2948 = vrcp.f32 %v915_v59 }
 0x2fd   : > { %v2941_v29 = vpop.eup %2940  ;;  %v3705_v30 = vmul.f32 %v2939_v25, %v790_v22  ;;  %2950 = vrcp.f32 %v916_v63 }
 0x2fe   : > { %v2943_v5 = vpop.eup %2942  ;;  %v3708_v34 = vmul.f32 %v2941_v29, %v792_v27  ;;  %v1012_v52 = vsel (%p3623_p2), %vm992_vm12, %v3702_v26, 0.0 }
 0x2ff   : > { %v3710_v16 = vmul.f32 %v2943_v5, %v794_v33  ;;  %v1013_v61 = vsel (%p3623_p2), %vm992_vm12, %v3705_v30, 0.0  ;;  %1024 = vst [vmem:[#allocation2 + $0x20] sm:$0xff] (%p3623_p2), %v1012_v52 }
 0x300   : > { %1025 = vst [vmem:[#allocation2 + $0x28] sm:$0xff] (%p3623_p2), %v1013_v61  ;;  %v1014_v62 = vsel (%p3623_p2), %vm993_vm15, %v3708_v34, 0.0 }
 0x301   : > { %v1015_v0 = vsel (%p3623_p2), %vm993_vm15, %v3710_v16, 0.0  ;;  %1026 = vst [vmem:[#allocation2 + $0x30] sm:$0xff] (%p3623_p2), %v1014_v62 }
 0x302   : > { %961 = sbr.rel (!%p3623_p2) target bundleno = 780 (0x30c), region = 80  ;;  %1027 = vst [vmem:[#allocation2 + $0x38] sm:$0xff] (%p3623_p2), %v1015_v0 }
 0x304   : > { %v2945_v36 = vpop.eup %2944 }
 0x305   : > { %v2947_v38 = vpop.eup %2946  ;;  %v3714_v11 = vmul.f32 %v2945_v36, %v798_v8 }
 0x306   : > { %v2949_v41 = vpop.eup %2948  ;;  %v3717_v42 = vmul.f32 %v2947_v38, %v800_v37 }
 0x307   : > { %v2951_v24 = vpop.eup %2950  ;;  %v3720_v44 = vmul.f32 %v2949_v41, %v802_v40  ;;  %v1016_v1 = vsel (%p3623_p2), %vm994_vm0, %v3714_v11, 0.0 }
 0x308   : > { %v3722_v45 = vmul.f32 %v2951_v24, %v804_v15  ;;  %v1017_v2 = vsel (%p3623_p2), %vm994_vm0, %v3717_v42, 0.0  ;;  %1028 = vst [vmem:[#allocation2 + $0x40] sm:$0xff] (%p3623_p2), %v1016_v1 }
 0x309   : > { %1029 = vst [vmem:[#allocation2 + $0x48] sm:$0xff] %v1017_v2  ;;  %v1018_v49 = vsel %vm995_vm1, %v3720_v44, 0.0 }
 0x30a   : > { %v1019_v4 = vsel %vm995_vm1, %v3722_v45, 0.0  ;;  %1030 = vst [vmem:[#allocation2 + $0x50] sm:$0xff] %v1018_v49 }
 0x30b   : > { %1031 = vst [vmem:[#allocation2 + $0x58] sm:$0xff] %v1019_v4 }
 0x30c PF: > { %1034 = sbr.rel (%p3623_p2) target bundleno = 787 (0x313), region = 84  ;;  %1035 = vst [vmem:[#allocation2] sm:$0xff] (!%p3623_p2), %v3690_v3  ;;  %1036 = vst [vmem:[#allocation2 + $0x8] sm:$0xff] (!%p3623_p2), %v3693_v6 }
 0x30d   : > { %1037 = vst [vmem:[#allocation2 + $0x10] sm:$0xff] (!%p3623_p2), %v3696_v10  ;;  %1038 = vst [vmem:[#allocation2 + $0x18] sm:$0xff] (!%p3623_p2), %v3698_v12 }
 0x30e   : > { %1039 = vst [vmem:[#allocation2 + $0x20] sm:$0xff] (!%p3623_p2), %v3702_v26  ;;  %1040 = vst [vmem:[#allocation2 + $0x28] sm:$0xff] (!%p3623_p2), %v3705_v30 }
 0x30f   : > { %1041 = vst [vmem:[#allocation2 + $0x30] sm:$0xff] (!%p3623_p2), %v3708_v34  ;;  %1042 = vst [vmem:[#allocation2 + $0x38] sm:$0xff] (!%p3623_p2), %v3710_v16 }
 0x310   : > { %1043 = vst [vmem:[#allocation2 + $0x40] sm:$0xff] (!%p3623_p2), %v3714_v11  ;;  %1044 = vst [vmem:[#allocation2 + $0x48] sm:$0xff] (!%p3623_p2), %v3717_v42 }
 0x311   : > { %1045 = vst [vmem:[#allocation2 + $0x50] sm:$0xff] (!%p3623_p2), %v3720_v44  ;;  %1046 = vst [vmem:[#allocation2 + $0x58] sm:$0xff] (!%p3623_p2), %v3722_v45 }
 0x313 PF: > { %v2952_v3 = vld [vmem:[#allocation11 + $0x40] sm:$0xff]   ;;  %v2954_v7 = vld [vmem:[#allocation11 + $0x48] sm:$0xff]   ;;  %v2956_v10 = vld [vmem:[#allocation11 + $0x50] sm:$0xff]   ;;  %vm1116_vm2 = vcmask 1046528   ;;  %vm1192_vm3 = vcmask 1045504   ;;  %vm1268_vm4 = vcmask 1044480  }
 0x314   : > { %v2953_v6 = vld [vmem:[#allocation11] sm:$0xff]   ;;  %2667 = vmatprep.subr.bf16.mxu0 %v2952_v3  ;;  %2695 = vmatprep.subr.bf16.mxu1 %v2952_v3  ;;  %v2955_v9 = vld [vmem:[#allocation11 + $0x8] sm:$0xff]   ;;  %v2957_v53 = vld [vmem:[#allocation11 + $0x10] sm:$0xff]   ;;  %vm1344_vm5 = vcmask 1043456   ;;  %vm1420_vm6 = vcmask 1042432   ;;  %vm1496_vm7 = vcmask 1041408  }
 0x315   : > { %2668 = vmatpush3.bf16.msra.mxu0 %v2953_v6  ;;  %2703 = vmatpush3.bf16.msra.mxu1 %v2953_v6  ;;  %v2958_v12 = vld [vmem:[#allocation11 + $0x58] sm:$0xff]   ;;  %v2960_v56 = vld [vmem:[#allocation11 + $0x60] sm:$0xff]   ;;  %v2962_v18 = vld [vmem:[#allocation11 + $0x68] sm:$0xff]   ;;  %vm1566_vm8 = vcmask 1040384   ;;  %s4473_s6 = sld [smem:[#allocation24_spill]]  ;;  %s4484_s13 = sld [smem:[#allocation18_spill]] }
 0x316   : > { %2669 = vmatprep.subr.bf16.mxu0 %v2954_v7  ;;  %2696 = vmatprep.subr.bf16.mxu1 %v2954_v7  ;;  %v2959_v13 = vld [vmem:[#allocation11 + $0x18] sm:$0xff]   ;;  %v2961_v14 = vld [vmem:[#allocation11 + $0x20] sm:$0xff]   ;;  %v1080_v63 = vld [vmem:[#allocation2 + $0x8] sm:$0xfc]  ;;  %vm2231_vm9 = vsmask.f32 7424 }
 0x317   : > { %v1048_v19 = vld [vmem:[#allocation2 + $0x8] sm:$0xfe]  ;;  %v3770_v20 = vld [vmem:[#allocation2 + $0x18] sm:$0xff]  ;;  %s4485_s7 = sld [smem:[#allocation26_spill]]  ;;  %s2661_s19 = sshll.u32 %s3240_s12, 2 }
 0x318   : > { %v1057_v59 = vld [vmem:[#allocation9] ss:$8 sm:$0x3]  ;;  %v1084_v25 = vld [vmem:[#allocation9 + $0x1] ss:$8 sm:$0x3] }
 0x319   : > { %2670 = vmatpush3.bf16.msra.mxu0 %v2955_v9  ;;  %2704 = vmatpush3.bf16.msra.mxu1 %v2955_v9  ;;  %v3772_v21 = vld [vmem:[#allocation2 + $0x28] sm:$0xff]  ;;  %v3775_v22 = vrot.slane %v1057_v59, %v3680_v43  ;;  %v3777_v27 = vld [vmem:[#allocation2 + $0x38] sm:$0xff]  ;;  %v1093_v30 = vrot.slane %v1084_v25, %v3680_v43  ;;  %v3781_v33 = vrot.slane %v1057_v59, %v3675_v23  ;;  %s2441_s20 = sshll.u32 %s3726_s29, 4  ;;  %s4486_s3 = sld [smem:[#allocation27_spill]]  ;;  %s4359_s20 = int_to_ptr.vmem [resolvable:$true] %s2441_s20 }
 0x31a   : > { %2671 = vmatprep.subr.bf16.mxu0 %v2956_v10  ;;  %2697 = vmatprep.subr.bf16.mxu1 %v2956_v10  ;;  %v2963_v26 = vld [vmem:[#allocation11 + $0x28] sm:$0xff]   ;;  %v1082_v29 = vld [vmem:[#allocation2 + $0x48] sm:$0x3]  ;;  %v3784_v5 = vrot.slane %v1084_v25, %v3675_v23  ;;  %v2964_v34 = vld [vmem:[#allocation11 + $0x70] sm:$0xff]   ;;  %s2426_s12 = scalar_lea.sflag [#allocation5], %s3563_s22  ;;  %s3150_s25 = scalar_lea.vmem %s4359_s20, 512 }
 0x31b   : > { %v1070_v16 = vmul.f32 %v3775_v22, %v1048_v19  ;;  %v1072_v8 = vmul.f32 %v3775_v22, %v3770_v20  ;;  %v1074_v36 = vmul.f32 %v3775_v22, %v3772_v21  ;;  %v3791_v37 = vld [vmem:[#allocation9 + $0x2] ss:$8 sm:$0x3]  ;;  %v1076_v38 = vmul.f32 %v3775_v22, %v3777_v27  ;;  %v3797_v15 = vld [vmem:[#allocation9 + $0x3] ss:$8 sm:$0x3]  ;;  %p3151_p6 = scmp.ne.s32.totalorder %s4359_s20, %s3150_s25 }
 0x31c   : > { %v1097_v11 = vmul.f32 %v1093_v30, %v1080_v63  ;;  %v1099_v40 = vmul.f32 %v1093_v30, %v3770_v20  ;;  %v1101_v41 = vmul.f32 %v1093_v30, %v3772_v21  ;;  %v1156_v42 = vld [vmem:[#allocation2 + $0x8] sm:$0xf8]  ;;  %v1103_v24 = vmul.f32 %v1093_v30, %v3777_v27  ;;  %v2965_v39 = vld [vmem:[#allocation11 + $0x30] sm:$0xff]   ;;  %v2966_v48 = vld [vmem:[#allocation11 + $0x78] sm:$0xff]   ;;  %s2715_s21 = smul.u32 12, %s4484_s13  ;;  %s3270_s30 = smov [#allocation12]  }
 0x31d   : > { %2672 = vmatpush3.bf16.msra.mxu0 %v2957_v53  ;;  %2705 = vmatpush3.bf16.msra.mxu1 %v2957_v53  ;;  %v3800_v44 = vmul.f32 %v1093_v30, %v1082_v29  ;;  %v1169_v45 = vrot.slane %v3791_v37, %v3680_v43  ;;  %v1245_v28 = vrot.slane %v3797_v15, %v3680_v43  ;;  %v3806_v35 = vld [vmem:[#allocation9 + $0x4] ss:$8 sm:$0x3]  ;;  %v1158_v55 = vld [vmem:[#allocation2 + $0x48] sm:$0x7]  ;;  %v2967_v49 = vld [vmem:[#allocation11 + $0x38] sm:$0xff]   ;;  %p3152_p8 = pnand %p3151_p6, %p3504_p4 }
 0x31e   : > { %2673 = vmatprep.subr.bf16.mxu0 %v2958_v12  ;;  %2698 = vmatprep.subr.bf16.mxu1 %v2958_v12  ;;  %v1120_v17 = vrot.slane %v1097_v11, 1  ;;  %v1121_v46 = vrot.slane %v1099_v40, 1  ;;  %v1125_v47 = vrot.slane %v1101_v41, 1  ;;  %v3810_v31 = vrot.slane %v3806_v35, %v3680_v43  ;;  %v1232_v61 = vld [vmem:[#allocation2 + $0x8] sm:$0xf0]  ;;  %s2438_s23 = sadd.s32 %s2715_s21, %s2661_s19  ;;  %s3154_s17 = sshll.u32 %s3270_s30, 4  ;;  %s3155_s17 = int_to_ptr.vmem [resolvable:$false] %s3154_s17 }
 0x31f   : > { %v1129_v50 = vrot.slane %v1103_v24, 1  ;;  %v1133_v54 = vrot.slane %v3800_v44, 1  ;;  %v1173_v57 = vmul.f32 %v1169_v45, %v1156_v42  ;;  %v1175_v58 = vmul.f32 %v1169_v45, %v3770_v20  ;;  %v1234_v9 = vld [vmem:[#allocation2 + $0x48] sm:$0xf]  ;;  %v1308_v29 = vld [vmem:[#allocation2 + $0x8] sm:$0xe0]  ;;  %p3153_p3 = pneg %p3152_p8  ;;  %p3157_p7 = scmp.lt.s32.totalorder %s4359_s20, %s3155_s17 }
 0x320   : > { %v1122_v60 = vsel %vm1116_vm2, %v1120_v17, %v1121_v46  ;;  %v1126_v32 = vsel %vm1116_vm2, %v1121_v46, %v1125_v47  ;;  %v1177_v51 = vmul.f32 %v1169_v45, %v3772_v21  ;;  %v1179_v52 = vmul.f32 %v1169_v45, %v3777_v27  ;;  %v1310_v24 = vld [vmem:[#allocation2 + $0x48] sm:$0x1f]  ;;  %v4051_v44 = vld [vmem:[#allocation2 + $0x30] sm:$0xff]  ;;  %s2662_s5 = sshll.u32 %s2438_s23, 7 }
 0x321   : > { %2674 = vmatpush3.bf16.msra.mxu0 %v2959_v13  ;;  %2706 = vmatpush3.bf16.msra.mxu1 %v2959_v13  ;;  %v1130_v62 = vsel %vm1116_vm2, %v1125_v47, %v1129_v50  ;;  %v1134_v0 = vsel %vm1116_vm2, %v1129_v50, %v1133_v54  ;;  %v1146_v1 = vadd.f32 %v1122_v60, %v1070_v16  ;;  %v1196_v7 = vrot.slane %v1173_v57, 2  ;;  %v3848_v50 = vld [vmem:[#allocation9 + $0x6] ss:$8 sm:$0x3]  ;;  %s4357_s18 = scalar_lea.hbm %s4486_s3, %s2662_s5 }
 0x322   : > { %2675 = vmatprep.subr.bf16.mxu0 %v2960_v56  ;;  %2699 = vmatprep.subr.bf16.mxu1 %v2960_v56  ;;  %v1148_v2 = vadd.f32 %v1126_v32, %v1072_v8  ;;  %v1150_v4 = vadd.f32 %v1130_v62, %v1074_v36  ;;  %v1152_v3 = vadd.f32 %v1134_v0, %v1076_v38  ;;  %v1197_v10 = vrot.slane %v1175_v58, 2  ;;  %v3854_v32 = vld [vmem:[#allocation9 + $0x7] ss:$8 sm:$0x3] }
 0x323   : > { %v3822_v6 = vmul.f32 %v1169_v45, %v1158_v55  ;;  %v1201_v53 = vrot.slane %v1177_v51, 2  ;;  %v1205_v12 = vrot.slane %v1179_v52, 2  ;;  %v1249_v13 = vmul.f32 %v1245_v28, %v1232_v61  ;;  %v3856_v51 = vld [vmem:[#allocation9 + $0x10] ss:$8 sm:$0x3] }
 0x324   : > { %v1255_v19 = vmul.f32 %v1245_v28, %v3777_v27  ;;  %v1198_v59 = vsel %vm1192_vm3, %v1196_v7, %v1197_v10  ;;  %v1325_v45 = vmul.f32 %v3810_v31, %v1308_v29  ;;  %v1329_v46 = vmul.f32 %v3810_v31, %v3772_v21 }
 0x325   : > { %2676 = vmatpush3.bf16.msra.mxu0 %v2961_v14  ;;  %2707 = vmatpush3.bf16.msra.mxu1 %v2961_v14  ;;  %v4441_v56 = vrot.slane %v3822_v6, 2  ;;  %v1251_v14 = vmul.f32 %v1245_v28, %v3770_v20  ;;  %v1202_v63 = vsel %vm1192_vm3, %v1197_v10, %v1201_v53  ;;  %v1206_v25 = vsel %vm1192_vm3, %v1201_v53, %v1205_v12 }
 0x326   : > { %2677 = vmatprep.subr.bf16.mxu0 %v2962_v18  ;;  %2700 = vmatprep.subr.bf16.mxu1 %v2962_v18  ;;  %v1253_v18 = vmul.f32 %v1245_v28, %v3772_v21  ;;  %v1224_v16 = vadd.f32 %v1202_v63, %v1148_v2  ;;  %v1272_v8 = vrot.slane %v1249_v13, 3  ;;  %v1226_v36 = vadd.f32 %v1206_v25, %v1150_v4 }
 0x327   : > { %v1210_v30 = vsel %vm1192_vm3, %v1205_v12, %v4441_v56  ;;  %v1273_v11 = vrot.slane %v1251_v14, 3  ;;  %v1281_v41 = vrot.slane %v1255_v19, 3  ;;  %v1331_v47 = vmul.f32 %v3810_v31, %v3777_v27  ;;  %v1386_v14 = vld [vmem:[#allocation2 + $0x48] sm:$0x3f]  ;;  %v1460_v19 = vld [vmem:[#allocation2 + $0x8] sm:$0x80] }
 0x328   : > { %v1228_v38 = vadd.f32 %v1210_v30, %v1152_v3  ;;  %v1277_v40 = vrot.slane %v1253_v18, 3  ;;  %v3859_v62 = vmul.f32 %v3810_v31, %v1310_v24  ;;  %v1348_v0 = vrot.slane %v1325_v45, 4 }
 0x329   : > { %2678 = vmatpush3.bf16.msra.mxu0 %v2963_v26  ;;  %2708 = vmatpush3.bf16.msra.mxu1 %v2963_v26  ;;  %v3831_v26 = vmul.f32 %v1245_v28, %v1234_v9  ;;  %v1327_v28 = vmul.f32 %v3810_v31, %v3770_v20  ;;  %v1357_v4 = vrot.slane %v1331_v47, 4  ;;  %v1473_v9 = vrot.slane %v3848_v50, %v3680_v43 }
 0x32a   : > { %2679 = vmatprep.subr.bf16.mxu0 %v2964_v34  ;;  %2701 = vmatprep.subr.bf16.mxu1 %v2964_v34  ;;  %v1222_v34 = vadd.f32 %v1198_v59, %v1146_v1  ;;  %v1278_v17 = vsel %vm1268_vm4, %v1273_v11, %v1277_v40  ;;  %v1282_v55 = vsel %vm1268_vm4, %v1277_v40, %v1281_v41  ;;  %v1384_v1 = vld [vmem:[#allocation2 + $0x8] sm:$0xc0]  ;;  %v4436_v7 = vrot.slane %v3859_v62, 4 }
 0x32b   : > { %v4437_v42 = vrot.slane %v3831_v26, 3  ;;  %v1300_v60 = vadd.f32 %v1278_v17, %v1224_v16  ;;  %v1302_v52 = vadd.f32 %v1282_v55, %v1226_v36  ;;  %v1349_v2 = vrot.slane %v1327_v28, 4  ;;  %v1462_v36 = vld [vmem:[#allocation2 + $0x48] sm:$0x7f] }
 0x32c   : > { %v1547_v10 = vrot.slane %v3854_v32, %v3680_v43  ;;  %v3870_v31 = vrot.slane %v3856_v51, %v3680_v43  ;;  %v1362_v59 = vsel %vm1344_vm5, %v1357_v4, %v4436_v7  ;;  %v1477_v40 = vmul.f32 %v1473_v9, %v1460_v19 }
 0x32d   : > { %2680 = vmatpush3.bf16.msra.mxu0 %v2965_v39  ;;  %2709 = vmatpush3.bf16.msra.mxu1 %v2965_v39  ;;  %v1274_v39 = vsel %vm1268_vm4, %v1272_v8, %v1273_v11  ;;  %v1286_v57 = vsel %vm1268_vm4, %v1281_v41, %v4437_v42  ;;  %v1350_v53 = vsel %vm1344_vm5, %v1348_v0, %v1349_v2 }
 0x32e   : > { %2681 = vmatprep.subr.bf16.mxu0 %v2966_v48  ;;  %2702 = vmatprep.subr.bf16.mxu1 %v2966_v48  ;;  %v3846_v48 = vld [vmem:[#allocation9 + $0x5] ss:$8 sm:$0x3]  ;;  %v1298_v58 = vadd.f32 %v1274_v39, %v1222_v34  ;;  %v1304_v61 = vadd.f32 %v1286_v57, %v1228_v38  ;;  %v1479_v41 = vmul.f32 %v1473_v9, %v3770_v20  ;;  %v1500_v55 = vrot.slane %v1477_v40, 6 }
 0x32f   : > { %v1397_v3 = vrot.slane %v3846_v48, %v3680_v43  ;;  %v1481_v39 = vmul.f32 %v1473_v9, %v3772_v21  ;;  %v3887_v47 = vmul.f32 %v1473_v9, %v1462_v36 }
 0x330   : > { %v1374_v63 = vadd.f32 %v1350_v53, %v1298_v58  ;;  %v1380_v30 = vadd.f32 %v1362_v59, %v1304_v61 }
 0x331   : > { %2682 = vmatpush3.bf16.msra.mxu0 %v2967_v49  ;;  %2710 = vmatpush3.bf16.msra.mxu1 %v2967_v49  ;;  %v1353_v49 = vrot.slane %v1329_v46, 4  ;;  %v1401_v18 = vmul.f32 %v1397_v3, %v1384_v1  ;;  %v1403_v34 = vmul.f32 %v1397_v3, %v3770_v20  ;;  %v1405_v16 = vmul.f32 %v1397_v3, %v3772_v21 }
 0x332   : > { %v1407_v8 = vmul.f32 %v1397_v3, %v3777_v27  ;;  %v3881_v38 = vmul.f32 %v1397_v3, %v1386_v14  ;;  %v1483_v46 = vmul.f32 %v1473_v9, %v3777_v27  ;;  %v1505_v9 = vrot.slane %v1481_v39, 6 }
 0x333   : > { %v1354_v12 = vsel %vm1344_vm5, %v1349_v2, %v1353_v49  ;;  %v1358_v13 = vsel %vm1344_vm5, %v1353_v49, %v1357_v4  ;;  %v1424_v11 = vrot.slane %v1401_v18, 5  ;;  %v1425_v24 = vrot.slane %v1403_v34, 5  ;;  %v3895_v49 = vld [vmem:[#allocation2 + $0x48] sm:$0xff] }
 0x334   : > { %v1376_v25 = vadd.f32 %v1354_v12, %v1300_v60  ;;  %v1378_v29 = vadd.f32 %v1358_v13, %v1302_v52  ;;  %v1429_v45 = vrot.slane %v1405_v16, 5  ;;  %v1433_v28 = vrot.slane %v1407_v8, 5 }
 0x335   : > { %v4435_v17 = vrot.slane %v3881_v38, 5  ;;  %v1426_v57 = vsel %vm1420_vm6, %v1424_v11, %v1425_v24  ;;  %v1501_v52 = vrot.slane %v1479_v41, 6  ;;  %v1509_v53 = vrot.slane %v1483_v46, 6  ;;  %v3920_v46 = vld [vmem:[#allocation9 + $0x13] ss:$8 sm:$0x3] }
 0x336   : > { %v1430_v58 = vsel %vm1420_vm6, %v1425_v24, %v1429_v45  ;;  %v1434_v60 = vsel %vm1420_vm6, %v1429_v45, %v1433_v28  ;;  %v1450_v0 = vadd.f32 %v1426_v57, %v1374_v63  ;;  %v4434_v12 = vrot.slane %v3887_v47, 6  ;;  %v3913_v24 = vld [vmem:[#allocation9 + $0x12] ss:$8 sm:$0x3] }
 0x337   : > { %v1438_v61 = vsel %vm1420_vm6, %v1433_v28, %v4435_v17  ;;  %v1452_v1 = vadd.f32 %v1430_v58, %v1376_v25  ;;  %v1454_v2 = vadd.f32 %v1434_v60, %v1378_v29  ;;  %v1502_v3 = vsel %vm1496_vm7, %v1500_v55, %v1501_v52  ;;  %v1602_v29 = vld [vmem:[#allocation2 + $0x18] sm:$0xfe] }
 0x338   : > { %v1456_v4 = vadd.f32 %v1438_v61, %v1380_v30  ;;  %v1526_v13 = vadd.f32 %v1502_v3, %v1450_v0  ;;  %v1551_v14 = vmul.f32 %v1547_v10, %v3770_v20  ;;  %v1553_v18 = vmul.f32 %v1547_v10, %v3772_v21  ;;  %v3910_v20 = vld [vmem:[#allocation9 + $0x11] ss:$8 sm:$0x3]  ;;  %v3922_v55 = vld [vmem:[#allocation9 + $0x14] ss:$8 sm:$0x3] }
 0x339   : > { %v1506_v19 = vsel %vm1496_vm7, %v1501_v52, %v1505_v9  ;;  %v1510_v59 = vsel %vm1496_vm7, %v1505_v9, %v1509_v53  ;;  %v1555_v63 = vmul.f32 %v1547_v10, %v3777_v27  ;;  %v3905_v25 = vmul.f32 %v1547_v10, %v3895_v49  ;;  %v3931_v61 = vld [vmem:[#allocation9 + $0x15] ss:$8 sm:$0x3]  ;;  %v1647_v9 = vld [vmem:[#allocation2 + $0x58] sm:$0x3] }
 0x33a   : > { %v1514_v30 = vsel %vm1496_vm7, %v1509_v53, %v4434_v12  ;;  %v1528_v34 = vadd.f32 %v1506_v19, %v1452_v1  ;;  %v1530_v16 = vadd.f32 %v1510_v59, %v1454_v2  ;;  %v1568_v8 = vrot.slane %v1551_v14, 7  ;;  %v1645_v3 = vld [vmem:[#allocation2 + $0x18] sm:$0xfc] }
 0x33b   : > { %v1532_v36 = vadd.f32 %v1514_v30, %v1456_v4  ;;  %v1571_v11 = vrot.slane %v1553_v18, 7  ;;  %v1575_v40 = vrot.slane %v1555_v63, 7  ;;  %v4433_v41 = vrot.slane %v3905_v25, 7  ;;  %v1797_v17 = vld [vmem:[#allocation2 + $0x58] sm:$0xf] }
 0x33c   : > { %v1592_v45 = vadd.f32 %v1568_v8, %v1526_v13  ;;  %v1625_v10 = vmul.f32 %v3870_v31, %v1602_v29  ;;  %v1627_v28 = vmul.f32 %v3870_v31, %v3772_v21  ;;  %v1629_v39 = vmul.f32 %v3870_v31, %v3777_v27  ;;  %v1720_v13 = vld [vmem:[#allocation2 + $0x18] sm:$0xf8] }
 0x33d   : > { %v1572_v57 = vsel %vm1566_vm8, %v1568_v8, %v1571_v11  ;;  %v1576_v58 = vsel %vm1566_vm8, %v1571_v11, %v1575_v40  ;;  %v1580_v60 = vsel %vm1566_vm8, %v1575_v40, %v4433_v41  ;;  %v1631_v52 = vmul.f32 %v3870_v31, %v3895_v49  ;;  %v1722_v11 = vld [vmem:[#allocation2 + $0x58] sm:$0x7]  ;;  %v1795_v41 = vld [vmem:[#allocation2 + $0x18] sm:$0xf0] }
 0x33e   : > { %v1594_v0 = vadd.f32 %v1572_v57, %v1528_v34  ;;  %v1596_v1 = vadd.f32 %v1576_v58, %v1530_v16  ;;  %v1598_v2 = vadd.f32 %v1580_v60, %v1532_v36  ;;  %v1635_v4 = vadd.f32 %v1625_v10, %v1592_v45 }
 0x33f   : > { %v1658_v53 = vrot.slane %v3910_v20, %v3680_v43  ;;  %v1733_v14 = vrot.slane %v3913_v24, %v3680_v43  ;;  %v1808_v18 = vrot.slane %v3920_v46, %v3680_v43  ;;  %v3941_v19 = vrot.slane %v3922_v55, %v3680_v43 }
 0x340   : > { %v1637_v59 = vadd.f32 %v1627_v28, %v1594_v0  ;;  %v1639_v63 = vadd.f32 %v1629_v39, %v1596_v1  ;;  %v1641_v29 = vadd.f32 %v1631_v52, %v1598_v2  ;;  %v3945_v30 = vrot.slane %v3931_v61, %v3680_v43 }
 0x341   : > { %v1662_v34 = vmul.f32 %v1658_v53, %v1645_v3  ;;  %v1664_v16 = vmul.f32 %v1658_v53, %v3772_v21  ;;  %v1666_v8 = vmul.f32 %v1658_v53, %v3777_v27  ;;  %v1668_v36 = vmul.f32 %v1658_v53, %v3895_v49 }
 0x342   : > { %v3950_v40 = vmul.f32 %v1658_v53, %v1647_v9  ;;  %v1737_v45 = vmul.f32 %v1733_v14, %v1720_v13  ;;  %v1739_v10 = vmul.f32 %v1733_v14, %v3772_v21  ;;  %v1741_v28 = vmul.f32 %v1733_v14, %v3777_v27 }
 0x343   : > { %v1684_v39 = vrot.slane %v1662_v34, 1  ;;  %v1685_v57 = vrot.slane %v1664_v16, 1  ;;  %v1689_v58 = vrot.slane %v1666_v8, 1  ;;  %v1693_v60 = vrot.slane %v1668_v36, 1 }
 0x344   : > { %v4439_v52 = vrot.slane %v3950_v40, 1  ;;  %v1743_v0 = vmul.f32 %v1733_v14, %v3895_v49  ;;  %v3956_v1 = vmul.f32 %v1733_v14, %v1722_v11  ;;  %v1759_v2 = vrot.slane %v1737_v45, 2 }
 0x345   : > { %v1686_v3 = vsel %vm1116_vm2, %v1684_v39, %v1685_v57  ;;  %v1690_v9 = vsel %vm1116_vm2, %v1685_v57, %v1689_v58  ;;  %v1694_v53 = vsel %vm1116_vm2, %v1689_v58, %v1693_v60  ;;  %v1760_v13 = vrot.slane %v1739_v10, 2 }
 0x346   : > { %v1698_v34 = vsel %vm1116_vm2, %v1693_v60, %v4439_v52  ;;  %v1710_v16 = vadd.f32 %v1686_v3, %v1635_v4  ;;  %v1712_v8 = vadd.f32 %v1690_v9, %v1637_v59  ;;  %v1714_v36 = vadd.f32 %v1694_v53, %v1639_v63  ;;  %v1870_v63 = vld [vmem:[#allocation2 + $0x18] sm:$0xe0] }
 0x347   : > { %v1716_v12 = vadd.f32 %v1698_v34, %v1641_v29  ;;  %v1761_v14 = vsel %vm1192_vm3, %v1759_v2, %v1760_v13  ;;  %v1764_v11 = vrot.slane %v1741_v28, 2  ;;  %v1768_v45 = vrot.slane %v1743_v0, 2  ;;  %v1872_v34 = vld [vmem:[#allocation2 + $0x58] sm:$0x1f] }
 0x348   : > { %v4438_v39 = vrot.slane %v3956_v1, 2  ;;  %v1785_v57 = vadd.f32 %v1761_v14, %v1710_v16  ;;  %v1812_v7 = vmul.f32 %v1808_v18, %v1795_v41  ;;  %v1814_v10 = vmul.f32 %v1808_v18, %v3772_v21 }
 0x349   : > { %v1765_v58 = vsel %vm1192_vm3, %v1760_v13, %v1764_v11  ;;  %v1769_v42 = vsel %vm1192_vm3, %v1764_v11, %v1768_v45  ;;  %v1816_v4 = vmul.f32 %v1808_v18, %v3777_v27  ;;  %v1818_v59 = vmul.f32 %v1808_v18, %v3895_v49 }
 0x34a   : > { %v1773_v29 = vsel %vm1192_vm3, %v1768_v45, %v4438_v39  ;;  %v1787_v28 = vadd.f32 %v1765_v58, %v1712_v8  ;;  %v1789_v60 = vadd.f32 %v1769_v42, %v1714_v36  ;;  %v3974_v0 = vmul.f32 %v1808_v18, %v1797_v17  ;;  %v1945_v17 = vld [vmem:[#allocation2 + $0x18] sm:$0xc0] }
 0x34b   : > { %v1791_v41 = vadd.f32 %v1773_v29, %v1716_v12  ;;  %v1834_v2 = vrot.slane %v1812_v7, 3  ;;  %v1835_v3 = vrot.slane %v1814_v10, 3  ;;  %v1839_v9 = vrot.slane %v1816_v4, 3 }
 0x34c   : > { %v1843_v53 = vrot.slane %v1818_v59, 3  ;;  %v4440_v13 = vrot.slane %v3974_v0, 3  ;;  %v1887_v16 = vmul.f32 %v3941_v19, %v1870_v63  ;;  %v1889_v14 = vmul.f32 %v3941_v19, %v3772_v21  ;;  %v1947_v63 = vld [vmem:[#allocation2 + $0x58] sm:$0x3f] }
 0x34d   : > { %v1836_v11 = vsel %vm1268_vm4, %v1834_v2, %v1835_v3  ;;  %v1840_v8 = vsel %vm1268_vm4, %v1835_v3, %v1839_v9  ;;  %v1891_v42 = vmul.f32 %v3941_v19, %v3777_v27  ;;  %v1893_v7 = vmul.f32 %v3941_v19, %v3895_v49 }
 0x34e   : > { %v1844_v12 = vsel %vm1268_vm4, %v1839_v9, %v1843_v53  ;;  %v1848_v18 = vsel %vm1268_vm4, %v1843_v53, %v4440_v13  ;;  %v1860_v36 = vadd.f32 %v1836_v11, %v1785_v57  ;;  %v1862_v45 = vadd.f32 %v1840_v8, %v1787_v28 }
 0x34f   : > { %v1864_v10 = vadd.f32 %v1844_v12, %v1789_v60  ;;  %v1866_v58 = vadd.f32 %v1848_v18, %v1791_v41  ;;  %v3991_v4 = vmul.f32 %v3941_v19, %v1872_v34  ;;  %v1909_v59 = vrot.slane %v1887_v16, 4  ;;  %v4007_v34 = vld [vmem:[#allocation9 + $0x16] ss:$8 sm:$0x3] }
 0x350   : > { %v1910_v29 = vrot.slane %v1889_v14, 4  ;;  %v1914_v2 = vrot.slane %v1891_v42, 4  ;;  %v1918_v3 = vrot.slane %v1893_v7, 4  ;;  %v1962_v39 = vmul.f32 %v3945_v30, %v1945_v17  ;;  %v4012_v16 = vld [vmem:[%s4473_s6] sm:$0x3]  ;;  %s3156_s6 = scalar_lea.vmem %s3155_s17, 1024 }
 0x351   : > { %v1922_v9 = vrot.slane %v3991_v4, 4  ;;  %v1964_v52 = vmul.f32 %v3945_v30, %v3772_v21  ;;  %v1966_v57 = vmul.f32 %v3945_v30, %v3777_v27  ;;  %v1968_v28 = vmul.f32 %v3945_v30, %v3895_v49  ;;  %v1056_v7 = vld [vmem:[#allocation2 + $0x48] sm:$0x1]  ;;  %v1610_v17 = vld [vmem:[#allocation2 + $0x58] sm:$0x1]  ;;  %p3158_p12 = scmp.lt.s32.totalorder %s3156_s6, %s3150_s25 }
 0x352   : > { %v1911_v19 = vsel %vm1344_vm5, %v1909_v59, %v1910_v29  ;;  %v1915_v60 = vsel %vm1344_vm5, %v1910_v29, %v1914_v2  ;;  %v1919_v41 = vsel %vm1344_vm5, %v1914_v2, %v1918_v3  ;;  %v4005_v53 = vmul.f32 %v3945_v30, %v1947_v63  ;;  %v2020_v2 = vld [vmem:[#allocation2 + $0x18] sm:$0x80] }
 0x353   : > { %v1923_v14 = vsel %vm1344_vm5, %v1918_v3, %v1922_v9  ;;  %v1935_v11 = vadd.f32 %v1911_v19, %v1860_v36  ;;  %v1937_v8 = vadd.f32 %v1915_v60, %v1862_v45  ;;  %v1939_v42 = vadd.f32 %v1919_v41, %v1864_v10  ;;  %v2022_v10 = vld [vmem:[#allocation2 + $0x58] sm:$0x7f]  ;;  %p3159_p11 = por %p3158_p12, %p3157_p7 }
 0x354   : > { %v1941_v12 = vadd.f32 %v1923_v14, %v1866_v58  ;;  %v1984_v18 = vrot.slane %v1962_v39, 5  ;;  %v1985_v30 = vrot.slane %v1964_v52, 5  ;;  %v1989_v59 = vrot.slane %v1966_v57, 5 }
 0x355   : > { %v1993_v63 = vrot.slane %v1968_v28, 5  ;;  %v1997_v29 = vrot.slane %v4005_v53, 5  ;;  %v2033_v13 = vrot.slane %v4007_v34, %v3680_v43  ;;  %v4022_v56 = vrot.slane %v4012_v16, %v3680_v43  ;;  %v1047_v43 = vld [vmem:[#allocation2] sm:$0xfe]  ;;  %p3160_p13 = pnand %p3159_p11, %p3153_p3 }
 0x356   : > { %v1986_v36 = vsel %vm1420_vm6, %v1984_v18, %v1985_v30  ;;  %v1990_v45 = vsel %vm1420_vm6, %v1985_v30, %v1989_v59  ;;  %v1078_v39 = vmul.f32 %v3775_v22, %v1056_v7  ;;  %v4028_v52 = vmul.f32 %v3870_v31, %v1610_v17  ;;  %v4041_v17 = vld [vmem:[#allocation2 + $0x10] sm:$0xff]  ;;  %v1079_v30 = vld [vmem:[#allocation2] sm:$0xfc] }
 0x357   : > { %v1994_v58 = vsel %vm1420_vm6, %v1989_v59, %v1993_v63  ;;  %v1998_v3 = vsel %vm1420_vm6, %v1993_v63, %v1997_v29  ;;  %v2010_v57 = vadd.f32 %v1986_v36, %v1935_v11  ;;  %v2012_v28 = vadd.f32 %v1990_v45, %v1937_v8  ;;  %v4049_v63 = vld [vmem:[#allocation2 + $0x20] sm:$0xff] }
 0x358   : > { %v2014_v19 = vadd.f32 %v1994_v58, %v1939_v42  ;;  %v2016_v60 = vadd.f32 %v1998_v3, %v1941_v12  ;;  %v2037_v41 = vmul.f32 %v2033_v13, %v2020_v2  ;;  %v2039_v14 = vmul.f32 %v2033_v13, %v3772_v21 }
 0x359   : > { %v2041_v18 = vmul.f32 %v2033_v13, %v3777_v27  ;;  %v2043_v22 = vmul.f32 %v2033_v13, %v3895_v49  ;;  %v4037_v31 = vmul.f32 %v2033_v13, %v2022_v10  ;;  %v1154_v7 = vadd.f32 %v1133_v54, %v1078_v39 }
 0x35a   : > { %v2059_v11 = vrot.slane %v2037_v41, 6  ;;  %v2060_v8 = vrot.slane %v2039_v14, 6  ;;  %v1069_v42 = vmul.f32 %v3781_v33, %v1047_v43  ;;  %v1071_v12 = vmul.f32 %v3781_v33, %v4041_v17 }
 0x35b   : > { %v2064_v21 = vrot.slane %v2041_v18, 6  ;;  %v2068_v59 = vrot.slane %v2043_v22, 6  ;;  %v2072_v27 = vrot.slane %v4037_v31, 6  ;;  %v4474_v49 = vrot.slane %v3822_v6, 2  ;;  %v1081_v22 = vld [vmem:[#allocation2 + $0x40] sm:$0x3] }
 0x35c   : > { %v2061_v54 = vsel %vm1496_vm7, %v2059_v11, %v2060_v8  ;;  %v1073_v2 = vmul.f32 %v3781_v33, %v4049_v63  ;;  %v1075_v36 = vmul.f32 %v3781_v33, %v4051_v44  ;;  %v1096_v45 = vmul.f32 %v3784_v5, %v1079_v30 }
 0x35d   : > { %v1230_v13 = vadd.f32 %v4474_v49, %v1154_v7  ;;  %v2065_v10 = vsel %vm1496_vm7, %v2060_v8, %v2064_v21  ;;  %v2069_v39 = vsel %vm1496_vm7, %v2064_v21, %v2068_v59  ;;  %v2073_v6 = vsel %vm1496_vm7, %v2068_v59, %v2072_v27 }
 0x35e   : > { %v2085_v58 = vadd.f32 %v2061_v54, %v2010_v57  ;;  %v2087_v3 = vadd.f32 %v2065_v10, %v2012_v28  ;;  %v2089_v43 = vadd.f32 %v2069_v39, %v2014_v19  ;;  %v2091_v41 = vadd.f32 %v2073_v6, %v2016_v60 }
 0x35f   : > { %v4475_v14 = vrot.slane %v3831_v26, 3  ;;  %v1098_v30 = vmul.f32 %v3784_v5, %v4041_v17  ;;  %v1100_v11 = vmul.f32 %v3784_v5, %v4049_v63  ;;  %v1102_v8 = vmul.f32 %v3784_v5, %v4051_v44 }
 0x360   : > { %v4067_v7 = vadd.f32 %v4022_v56, %v2085_v58  ;;  %v4076_v57 = vadd.f32 %v4022_v56, %v2087_v3  ;;  %v4079_v28 = vadd.f32 %v4022_v56, %v2089_v43  ;;  %v4082_v26 = vadd.f32 %v4022_v56, %v2091_v41 }
 0x361   : > { %v1306_v18 = vadd.f32 %v4475_v14, %v1230_v13  ;;  %v4476_v19 = vrot.slane %v3859_v62, 4  ;;  %v4088_v59 = vmul.f32 %v3784_v5, %v1081_v22  ;;  %v1117_v49 = vrot.slane %v1096_v45, 1 }
 0x362   : > { %v2634_v21 = vmul.f32 -1.442695, %v4067_v7  ;;  %v1118_v13 = vrot.slane %v1098_v30, 1  ;;  %v2636_v54 = vmul.f32 -1.442695, %v4076_v57  ;;  %v4477_v6 = vrot.slane %v3881_v38, 5 }
 0x363   : > { %v1382_v60 = vadd.f32 %v4476_v19, %v1306_v18  ;;  %v2638_v10 = vmul.f32 -1.442695, %v4079_v28  ;;  %v2640_v39 = vmul.f32 -1.442695, %v4082_v26  ;;  %v1123_v3 = vrot.slane %v1100_v11, 1 }
 0x364   : > { %2968 = vpow2.f32 %v2634_v21  ;;  %v1119_v62 = vsel %vm1116_vm2, %v1117_v49, %v1118_v13  ;;  %v1127_v43 = vrot.slane %v1102_v8, 1  ;;  %v4478_v5 = vrot.slane %v3887_v47, 6  ;;  %v1155_v18 = vld [vmem:[#allocation2] sm:$0xf8]  ;;  %v1157_v38 = vld [vmem:[#allocation2 + $0x40] sm:$0x7] }
 0x365   : > { %v1458_v58 = vadd.f32 %v4477_v6, %v1382_v60  ;;  %2970 = vpow2.f32 %v2636_v54  ;;  %v1131_v45 = vrot.slane %v4088_v59, 1  ;;  %v1145_v14 = vadd.f32 %v1119_v62, %v1069_v42 }
 0x366   : > { %2972 = vpow2.f32 %v2638_v10  ;;  %v1124_v22 = vsel %vm1116_vm2, %v1118_v13, %v1123_v3  ;;  %v1128_v30 = vsel %vm1116_vm2, %v1123_v3, %v1127_v43  ;;  %v1165_v19 = vrot.slane %v3791_v37, %v3675_v23 }
 0x367   : > { %v1534_v41 = vadd.f32 %v4478_v5, %v1458_v58  ;;  %2974 = vpow2.f32 %v2640_v39  ;;  %v4479_v11 = vrot.slane %v3905_v25, 7  ;;  %v1132_v47 = vsel %vm1116_vm2, %v1127_v43, %v1131_v45  ;;  %v1231_v25 = vld [vmem:[#allocation2] sm:$0xf0] }
 0x368   : > { %v1147_v60 = vadd.f32 %v1124_v22, %v1071_v12  ;;  %v1149_v42 = vadd.f32 %v1128_v30, %v1073_v2  ;;  %v1151_v21 = vadd.f32 %v1132_v47, %v1075_v36  ;;  %v1172_v49 = vmul.f32 %v1165_v19, %v1155_v18 }
 0x369   : > { %v1600_v8 = vadd.f32 %v4479_v11, %v1534_v41  ;;  %v1174_v13 = vmul.f32 %v1165_v19, %v4041_v17  ;;  %v1176_v10 = vmul.f32 %v1165_v19, %v4049_v63  ;;  %v1178_v37 = vmul.f32 %v1165_v19, %v4051_v44  ;;  %v1233_v41 = vld [vmem:[#allocation2 + $0x40] sm:$0xf] }
 0x36a   : > { %v4112_v39 = vmul.f32 %v1165_v19, %v1157_v38  ;;  %v1193_v6 = vrot.slane %v1172_v49, 2  ;;  %v1241_v62 = vrot.slane %v3797_v15, %v3675_v23  ;;  %v1317_v12 = vrot.slane %v3806_v35, %v3675_v23 }
 0x36b   : > { %v1643_v54 = vadd.f32 %v4028_v52, %v1600_v8  ;;  %v1194_v58 = vrot.slane %v1174_v13, 2  ;;  %v4480_v2 = vrot.slane %v3950_v40, 1  ;;  %v1199_v3 = vrot.slane %v1176_v10, 2 }
 0x36c   : > { %v1203_v52 = vrot.slane %v1178_v37, 2  ;;  %v4442_v43 = vrot.slane %v4112_v39, 2  ;;  %v1248_v18 = vmul.f32 %v1241_v62, %v1231_v25  ;;  %v1250_v22 = vmul.f32 %v1241_v62, %v4041_v17 }
 0x36d   : > { %v1718_v36 = vadd.f32 %v4480_v2, %v1643_v54  ;;  %v1195_v5 = vsel %vm1192_vm3, %v1193_v6, %v1194_v58  ;;  %v1252_v30 = vmul.f32 %v1241_v62, %v4049_v63  ;;  %v4481_v15 = vrot.slane %v3956_v1, 2 }
 0x36e   : > { %v1200_v35 = vsel %vm1192_vm3, %v1194_v58, %v1199_v3  ;;  %v1204_v40 = vsel %vm1192_vm3, %v1199_v3, %v1203_v52  ;;  %v1208_v19 = vsel %vm1192_vm3, %v1203_v52, %v4442_v43  ;;  %v2969_v11 = vpop.eup %2968  ;;  %v1221_v8 = vadd.f32 %v1195_v5, %v1145_v14 }
 0x36f   : > { %v1793_v38 = vadd.f32 %v4481_v15, %v1718_v36  ;;  %v1223_v47 = vadd.f32 %v1200_v35, %v1147_v60  ;;  %v1225_v49 = vadd.f32 %v1204_v40, %v1149_v42  ;;  %v1227_v13 = vadd.f32 %v1208_v19, %v1151_v21  ;;  %v2971_v54 = vpop.eup %2970 }
 0x370   : > { %v2147_v10 = vadd.f32 1.0, %v2969_v11  ;;  %v4482_v37 = vrot.slane %v3974_v0, 3  ;;  %v1254_v1 = vmul.f32 %v1241_v62, %v4051_v44  ;;  %v4134_v6 = vmul.f32 %v1241_v62, %v1233_v41  ;;  %v2973_v58 = vpop.eup %2972  ;;  %v1307_v62 = vld [vmem:[#allocation2] sm:$0xe0] }
 0x371   : > { %v2149_v2 = vadd.f32 1.0, %v2971_v54  ;;  %v1269_v36 = vrot.slane %v1248_v18, 3  ;;  %v1270_v3 = vrot.slane %v1250_v22, 3  ;;  %v1275_v15 = vrot.slane %v1252_v30, 3  ;;  %v2975_v52 = vpop.eup %2974  ;;  %v1309_v22 = vld [vmem:[#allocation2 + $0x40] sm:$0x1f] }
 0x372   : > { %v1868_v25 = vadd.f32 %v4482_v37, %v1793_v38  ;;  %v2151_v43 = vadd.f32 1.0, %v2973_v58  ;;  %2976 = vrcp.f32 %v2147_v10  ;;  %v1279_v60 = vrot.slane %v1254_v1, 3  ;;  %v1385_v1 = vld [vmem:[#allocation2 + $0x40] sm:$0x3f] }
 0x373   : > { %v2153_v42 = vadd.f32 1.0, %v2975_v52  ;;  %2978 = vrcp.f32 %v2149_v2  ;;  %v1271_v0 = vsel %vm1268_vm4, %v1269_v36, %v1270_v3  ;;  %v1276_v21 = vsel %vm1268_vm4, %v1270_v3, %v1275_v15 }
 0x374   : > { %v1943_v14 = vadd.f32 %v1922_v9, %v1868_v25  ;;  %2980 = vrcp.f32 %v2151_v43  ;;  %v1280_v41 = vsel %vm1268_vm4, %v1275_v15, %v1279_v60  ;;  %v1283_v18 = vrot.slane %v4134_v6, 3  ;;  %v1459_v15 = vld [vmem:[#allocation2] sm:$0x80] }
 0x375   : > { %2982 = vrcp.f32 %v2153_v42  ;;  %v1297_v4 = vadd.f32 %v1271_v0, %v1221_v8  ;;  %v1299_v9 = vadd.f32 %v1276_v21, %v1223_v47  ;;  %v1301_v30 = vadd.f32 %v1280_v41, %v1225_v49  ;;  %v1383_v8 = vld [vmem:[#allocation2] sm:$0xc0] }
 0x376   : > { %v2018_v5 = vadd.f32 %v1997_v29, %v1943_v14  ;;  %v1284_v35 = vsel %vm1268_vm4, %v1279_v60, %v1283_v18  ;;  %v1324_v43 = vmul.f32 %v1317_v12, %v1307_v62  ;;  %v1326_v53 = vmul.f32 %v1317_v12, %v4041_v17 }
 0x377   : > { %v1303_v29 = vadd.f32 %v1284_v35, %v1227_v13  ;;  %v1328_v40 = vmul.f32 %v1317_v12, %v4049_v63  ;;  %v1330_v19 = vmul.f32 %v1317_v12, %v4051_v44  ;;  %v4152_v11 = vmul.f32 %v1317_v12, %v1309_v22 }
 0x378   : > { %v2093_v38 = vadd.f32 %v2072_v27, %v2018_v5  ;;  %v1345_v31 = vrot.slane %v1324_v43, 4  ;;  %v1346_v27 = vrot.slane %v1326_v53, 4  ;;  %v1393_v49 = vrot.slane %v3846_v48, %v3675_v23 }
 0x379   : > { %v1351_v54 = vrot.slane %v1328_v40, 4  ;;  %v1355_v10 = vrot.slane %v1330_v19, 4  ;;  %v1359_v37 = vrot.slane %v4152_v11, 4  ;;  %v1469_v13 = vrot.slane %v3848_v50, %v3675_v23 }
 0x37a   : > { %v4155_v47 = vadd.f32 %v4022_v56, %v2093_v38  ;;  %v1347_v12 = vsel %vm1344_vm5, %v1345_v31, %v1346_v27  ;;  %v1400_v58 = vmul.f32 %v1393_v49, %v1383_v8  ;;  %v1402_v56 = vmul.f32 %v1393_v49, %v4041_v17 }
 0x37b   : > { %v1352_v2 = vsel %vm1344_vm5, %v1346_v27, %v1351_v54  ;;  %v1356_v36 = vsel %vm1344_vm5, %v1351_v54, %v1355_v10  ;;  %v1360_v48 = vsel %vm1344_vm5, %v1355_v10, %v1359_v37  ;;  %v1373_v3 = vadd.f32 %v1347_v12, %v1297_v4 }
 0x37c   : > { %v2642_v25 = vmul.f32 -1.442695, %v4155_v47  ;;  %v2977_v52 = vpop.eup %2976  ;;  %v1375_v50 = vadd.f32 %v1352_v2, %v1299_v9  ;;  %v1377_v14 = vadd.f32 %v1356_v36, %v1301_v30  ;;  %v1379_v60 = vadd.f32 %v1360_v48, %v1303_v29 }
 0x37d   : > { %v2979_v42 = vpop.eup %2978  ;;  %v2177_v0 = vmul.f32 %v2977_v52, %v4067_v7  ;;  %v1404_v21 = vmul.f32 %v1393_v49, %v4049_v63  ;;  %v1406_v62 = vmul.f32 %v1393_v49, %v4051_v44  ;;  %v4173_v5 = vmul.f32 %v1393_v49, %v1385_v1  ;;  %v1461_v49 = vld [vmem:[#allocation2 + $0x40] sm:$0x7f] }
 0x37e   : > { %2984 = vpow2.f32 %v2642_v25  ;;  %v2981_v41 = vpop.eup %2980  ;;  %v2179_v22 = vmul.f32 %v2979_v42, %v4076_v57  ;;  %v1421_v4 = vrot.slane %v1400_v58, 5  ;;  %v1422_v38 = vrot.slane %v1402_v56, 5 }
 0x37f   : > { %v1476_v35 = vmul.f32 %v1469_v13, %v1459_v15  ;;  %v2983_v43 = vpop.eup %2982  ;;  %v2181_v9 = vmul.f32 %v2981_v41, %v4079_v28  ;;  %v1427_v30 = vrot.slane %v1404_v21, 5  ;;  %v1431_v53 = vrot.slane %v1406_v62, 5 }
 0x380   : > { %v1435_v7 = vrot.slane %v4173_v5, 5  ;;  %v2183_v29 = vmul.f32 %v2983_v43, %v4082_v26  ;;  %v2187_v40 = vpack.c.bf16 %v2179_v22, %v2177_v0  ;;  %v1423_v19 = vsel %vm1420_vm6, %v1421_v4, %v1422_v38 }
 0x381   : > { %v1478_v8 = vmul.f32 %v1469_v13, %v4041_v17  ;;  %v1428_v31 = vsel %vm1420_vm6, %v1422_v38, %v1427_v30  ;;  %v1432_v57 = vsel %vm1420_vm6, %v1427_v30, %v1431_v53  ;;  %v1449_v28 = vadd.f32 %v1423_v19, %v1373_v3  ;;  %v4196_v38 = vld [vmem:[#allocation2 + $0x40] sm:$0xff] }
 0x382   : > { %v1436_v27 = vsel %vm1420_vm6, %v1431_v53, %v1435_v7  ;;  %v2189_v54 = vpack.c.bf16 %v2183_v29, %v2181_v9  ;;  %v2245_v10 = vshrl.u32 %v2187_v40, 16  ;;  %v2247_v25 = vshll.u32 %v2187_v40, 16 }
 0x383   : > { %v1451_v12 = vadd.f32 %v1428_v31, %v1375_v50  ;;  %v1453_v26 = vadd.f32 %v1432_v57, %v1377_v14  ;;  %v1455_v1 = vadd.f32 %v1436_v27, %v1379_v60  ;;  %v1480_v58 = vmul.f32 %v1469_v13, %v4049_v63  ;;  %v1601_v57 = vld [vmem:[#allocation2 + $0x10] sm:$0xfe] }
 0x384   : > { %v1482_v56 = vmul.f32 %v1469_v13, %v4051_v44  ;;  %v2249_v2 = vrot.slane %v2247_v25, 1  ;;  %v2252_v36 = vshll.u32 %v2189_v54, 16  ;;  %v2264_v48 = vshrl.u32 %v2189_v54, 16 }
 0x385   : > { %v4188_v15 = vmul.f32 %v1469_v13, %v1461_v49  ;;  %v1497_v52 = vrot.slane %v1476_v35, 6  ;;  %v1498_v42 = vrot.slane %v1478_v8, 6  ;;  %v1503_v0 = vrot.slane %v1480_v58, 6 }
 0x386   : > { %v1507_v3 = vrot.slane %v1482_v56, 6  ;;  %v2250_v62 = vor.u32 %v2249_v2, %v2245_v10  ;;  %v2254_v41 = vrot.slane %v2252_v36, 1  ;;  %v1543_v14 = vrot.slane %v3854_v32, %v3675_v23  ;;  %v1646_v36 = vld [vmem:[#allocation2 + $0x50] sm:$0x3] }
 0x387   : > { %v1511_v50 = vrot.slane %v4188_v15, 6  ;;  %v1499_v22 = vsel %vm1496_vm7, %v1497_v52, %v1498_v42  ;;  %v1504_v4 = vsel %vm1496_vm7, %v1498_v42, %v1503_v0  ;;  %v4212_v27 = vrot.slane %v3856_v51, %v3675_v23 }
 0x388   : > { %v2985_v21 = vpop.eup %2984  ;;  %v1508_v13 = vsel %vm1496_vm7, %v1503_v0, %v1507_v3  ;;  %v2255_v35 = vsel %vm2231_vm9, %v2250_v62, %v2254_v41  ;;  %v4199_v43 = vor.u32 %v2264_v48, %v2254_v41  ;;  %v1525_v30 = vadd.f32 %v1499_v22, %v1449_v28 }
 0x389   : > { %v2155_v60 = vadd.f32 1.0, %v2985_v21  ;;  %v1512_v9 = vsel %vm1496_vm7, %v1507_v3, %v1511_v50  ;;  %2404 = vmatprep.mubr.bf16.mxu0 %v2255_v35  ;;  %v1527_v32 = vadd.f32 %v1504_v4, %v1451_v12  ;;  %v1529_v53 = vadd.f32 %v1508_v13, %v1453_v26  ;;  %v1644_v26 = vld [vmem:[#allocation2 + $0x10] sm:$0xfc] }
 0x38a   : > { %v1531_v29 = vadd.f32 %v1512_v9, %v1455_v1  ;;  %v1550_v40 = vmul.f32 %v1543_v14, %v4041_v17  ;;  %v1552_v19 = vmul.f32 %v1543_v14, %v4049_v63  ;;  %v1554_v8 = vmul.f32 %v1543_v14, %v4051_v44 }
 0x38b   : > { %2986 = vrcp.f32 %v2155_v60  ;;  %v4208_v31 = vmul.f32 %v1543_v14, %v4196_v38  ;;  %v1654_v28 = vrot.slane %v3910_v20, %v3675_v23  ;;  %v1729_v49 = vrot.slane %v3913_v24, %v3675_v23  ;;  %v1719_v14 = vld [vmem:[#allocation2 + $0x10] sm:$0xf8] }
 0x38c   : > { %v4220_v17 = vrot.slane %v3920_v46, %v3675_v23  ;;  %v1567_v54 = vrot.slane %v1550_v40, 7  ;;  %v1569_v10 = vrot.slane %v1552_v19, 7  ;;  %v1573_v25 = vrot.slane %v1554_v8, 7  ;;  %v1721_v40 = vld [vmem:[#allocation2 + $0x50] sm:$0x7] }
 0x38d   : > { %v1577_v12 = vrot.slane %v4208_v31, 7  ;;  %v1624_v1 = vmul.f32 %v4212_v27, %v1601_v57  ;;  %v1626_v51 = vmul.f32 %v4212_v27, %v4049_v63  ;;  %v1628_v20 = vmul.f32 %v4212_v27, %v4051_v44 }
 0x38e   : > { %v1630_v24 = vmul.f32 %v4212_v27, %v4196_v38  ;;  %v1570_v46 = vsel %vm1566_vm8, %v1567_v54, %v1569_v10  ;;  %v1574_v58 = vsel %vm1566_vm8, %v1569_v10, %v1573_v25  ;;  %v1591_v2 = vadd.f32 %v1567_v54, %v1525_v30 }
 0x38f   : > { %v1578_v56 = vsel %vm1566_vm8, %v1573_v25, %v1577_v12  ;;  %v1593_v48 = vadd.f32 %v1570_v46, %v1527_v32  ;;  %v1595_v52 = vadd.f32 %v1574_v58, %v1529_v53  ;;  %v1661_v0 = vmul.f32 %v1654_v28, %v1644_v26  ;;  %v1794_v26 = vld [vmem:[#allocation2 + $0x10] sm:$0xf0] }
 0x390   : > { %v1597_v42 = vadd.f32 %v1578_v56, %v1531_v29  ;;  %v1634_v3 = vadd.f32 %v1624_v1, %v1591_v2  ;;  %v1663_v21 = vmul.f32 %v1654_v28, %v4049_v63  ;;  %v1665_v62 = vmul.f32 %v1654_v28, %v4051_v44 }
 0x391   : > { %v1667_v41 = vmul.f32 %v1654_v28, %v4196_v38  ;;  %v1636_v60 = vadd.f32 %v1626_v51, %v1593_v48  ;;  %v1638_v22 = vadd.f32 %v1628_v20, %v1595_v52  ;;  %v4238_v13 = vmul.f32 %v1654_v28, %v1646_v36 }
 0x392   : > { %v1640_v4 = vadd.f32 %v1630_v24, %v1597_v42  ;;  %v1681_v35 = vrot.slane %v1661_v0, 1  ;;  %v1682_v9 = vrot.slane %v1663_v21, 1  ;;  %v1687_v30 = vrot.slane %v1665_v62, 1  ;;  %v1796_v62 = vld [vmem:[#allocation2 + $0x50] sm:$0xf] }
 0x393   : > { %v1691_v32 = vrot.slane %v1667_v41, 1  ;;  %v1695_v29 = vrot.slane %v4238_v13, 1  ;;  %v1736_v19 = vmul.f32 %v1729_v49, %v1719_v14  ;;  %v1738_v8 = vmul.f32 %v1729_v49, %v4049_v63 }
 0x394   : > { %v1740_v57 = vmul.f32 %v1729_v49, %v4051_v44  ;;  %v1683_v10 = vsel %vm1116_vm2, %v1681_v35, %v1682_v9  ;;  %v1688_v28 = vsel %vm1116_vm2, %v1682_v9, %v1687_v30  ;;  %v1742_v56 = vmul.f32 %v1729_v49, %v4196_v38 }
 0x395   : > { %v2987_v53 = vpop.eup %2986  ;;  %v1692_v25 = vsel %vm1116_vm2, %v1687_v30, %v1691_v32  ;;  %v1696_v1 = vsel %vm1116_vm2, %v1691_v32, %v1695_v29  ;;  %v1709_v51 = vadd.f32 %v1683_v10, %v1634_v3  ;;  %v1711_v20 = vadd.f32 %v1688_v28, %v1636_v60 }
 0x396   : > { %v2185_v54 = vmul.f32 %v2987_v53, %v4155_v47  ;;  %v1713_v24 = vadd.f32 %v1692_v25, %v1638_v22  ;;  %v1715_v58 = vadd.f32 %v1696_v1, %v1640_v4  ;;  %v4251_v2 = vmul.f32 %v1729_v49, %v1721_v40  ;;  %v1869_v25 = vld [vmem:[#allocation2 + $0x10] sm:$0xe0] }
 0x397   : > { %v1756_v47 = vrot.slane %v1736_v19, 2  ;;  %v1757_v36 = vrot.slane %v1738_v8, 2  ;;  %v1762_v48 = vrot.slane %v1740_v57, 2  ;;  %v1811_v52 = vmul.f32 %v4220_v17, %v1794_v26 }
 0x398   : > { %v2191_v46 = vpack.c.bf16 %v2185_v54, %v2185_v54  ;;  %v1766_v0 = vrot.slane %v1742_v56, 2  ;;  %v1770_v21 = vrot.slane %v4251_v2, 2  ;;  %v1813_v3 = vmul.f32 %v4220_v17, %v4049_v63 }
 0x399   : > { %v1758_v41 = vsel %vm1192_vm3, %v1756_v47, %v1757_v36  ;;  %v1763_v14 = vsel %vm1192_vm3, %v1757_v36, %v1762_v48  ;;  %v1815_v49 = vmul.f32 %v4220_v17, %v4051_v44  ;;  %v1817_v60 = vmul.f32 %v4220_v17, %v4196_v38 }
 0x39a   : > { %v2268_v42 = vshll.u32 %v2191_v46, 16  ;;  %v1767_v4 = vsel %vm1192_vm3, %v1762_v48, %v1766_v0  ;;  %v1771_v35 = vsel %vm1192_vm3, %v1766_v0, %v1770_v21  ;;  %v1784_v9 = vadd.f32 %v1758_v41, %v1709_v51 }
 0x39b   : > { %v1786_v30 = vadd.f32 %v1763_v14, %v1711_v20  ;;  %v1788_v32 = vadd.f32 %v1767_v4, %v1713_v24  ;;  %v1790_v53 = vadd.f32 %v1771_v35, %v1715_v58  ;;  %v4268_v40 = vmul.f32 %v4220_v17, %v1796_v62  ;;  %v1871_v20 = vld [vmem:[#allocation2 + $0x50] sm:$0x1f] }
 0x39c   : > { %v2270_v22 = vrot.slane %v2268_v42, 1  ;;  %v1831_v8 = vrot.slane %v1811_v52, 3  ;;  %v1832_v57 = vrot.slane %v1813_v3, 3  ;;  %v1837_v54 = vrot.slane %v1815_v49, 3 }
 0x39d   : > { %v1841_v10 = vrot.slane %v1817_v60, 3  ;;  %v1845_v28 = vrot.slane %v4268_v40, 3  ;;  %v1879_v26 = vrot.slane %v3922_v55, %v3675_v23  ;;  %v1954_v1 = vrot.slane %v3931_v61, %v3675_v23 }
 0x39e   : > { %v2271_v19 = vsel %vm2231_vm9, %v4199_v43, %v2270_v22  ;;  %v1833_v17 = vsel %vm1268_vm4, %v1831_v8, %v1832_v57  ;;  %v1838_v51 = vsel %vm1268_vm4, %v1832_v57, %v1837_v54  ;;  %v1944_v43 = vld [vmem:[#allocation2 + $0x10] sm:$0xc0]  ;;  %v2029_v24 = vrot.slane %v4007_v34, %v3675_v23  ;;  %v1946_v34 = vld [vmem:[#allocation2 + $0x50] sm:$0x3f] }
 0x39f   : > { %2412 = vmatprep.mubr.bf16.mxu1 %v2271_v19  ;;  %v1842_v46 = vsel %vm1268_vm4, %v1837_v54, %v1841_v10  ;;  %v1846_v58 = vsel %vm1268_vm4, %v1841_v10, %v1845_v28  ;;  %v1859_v56 = vadd.f32 %v1833_v17, %v1784_v9  ;;  %v1861_v55 = vadd.f32 %v1838_v51, %v1786_v30  ;;  %v2019_v10 = vld [vmem:[#allocation2 + $0x10] sm:$0x80] }
 0x3a0   : > { %v1863_v47 = vadd.f32 %v1842_v46, %v1788_v32  ;;  %v1865_v36 = vadd.f32 %v1846_v58, %v1790_v53  ;;  %v1886_v61 = vmul.f32 %v1879_v26, %v1869_v25  ;;  %v1888_v48 = vmul.f32 %v1879_v26, %v4049_v63 }
 0x3a1   : > { %v1890_v52 = vmul.f32 %v1879_v26, %v4051_v44  ;;  %v1892_v42 = vmul.f32 %v1879_v26, %v4196_v38  ;;  %v4288_v0 = vmul.f32 %v1879_v26, %v1871_v20  ;;  %v1961_v62 = vmul.f32 %v1954_v1, %v1944_v43  ;;  %v2021_v20 = vld [vmem:[#allocation2 + $0x50] sm:$0x7f] }
 0x3a2   : > { %v1906_v3 = vrot.slane %v1886_v61, 4  ;;  %v1907_v41 = vrot.slane %v1888_v48, 4  ;;  %v1963_v14 = vmul.f32 %v1954_v1, %v4049_v63  ;;  %v1965_v49 = vmul.f32 %v1954_v1, %v4051_v44 }
 0x3a3   : > { %v1912_v60 = vrot.slane %v1890_v52, 4  ;;  %v1916_v22 = vrot.slane %v1892_v42, 4  ;;  %v1920_v4 = vrot.slane %v4288_v0, 4  ;;  %v1967_v35 = vmul.f32 %v1954_v1, %v4196_v38 }
 0x3a4   : > { %v1908_v9 = vsel %vm1344_vm5, %v1906_v3, %v1907_v41  ;;  %v4295_v30 = vmul.f32 %v1954_v1, %v1946_v34  ;;  %v1981_v32 = vrot.slane %v1961_v62, 5  ;;  %v1982_v53 = vrot.slane %v1963_v14, 5  ;;  %v1055_v34 = vld [vmem:[#allocation2 + $0x40] sm:$0x1] }
 0x3a5   : > { %v1913_v19 = vsel %vm1344_vm5, %v1907_v41, %v1912_v60  ;;  %v1917_v8 = vsel %vm1344_vm5, %v1912_v60, %v1916_v22  ;;  %v1921_v57 = vsel %vm1344_vm5, %v1916_v22, %v1920_v4  ;;  %v1934_v54 = vadd.f32 %v1908_v9, %v1859_v56 }
 0x3a6   : > { %v1936_v25 = vadd.f32 %v1913_v19, %v1861_v55  ;;  %v1938_v26 = vadd.f32 %v1917_v8, %v1863_v47  ;;  %v1940_v17 = vadd.f32 %v1921_v57, %v1865_v36  ;;  %v1983_v51 = vsel %vm1420_vm6, %v1981_v32, %v1982_v53 }
 0x3a7   : > { %v1987_v1 = vrot.slane %v1965_v49, 5  ;;  %v1991_v43 = vrot.slane %v1967_v35, 5  ;;  %v1995_v46 = vrot.slane %v4295_v30, 5  ;;  %v2009_v58 = vadd.f32 %v1983_v51, %v1934_v54 }
 0x3a8   : > { %v2036_v61 = vmul.f32 %v2029_v24, %v2019_v10  ;;  %v2038_v48 = vmul.f32 %v2029_v24, %v4049_v63  ;;  %v2040_v52 = vmul.f32 %v2029_v24, %v4051_v44  ;;  %v2042_v42 = vmul.f32 %v2029_v24, %v4196_v38 }
 0x3a9   : > { %v1988_v56 = vsel %vm1420_vm6, %v1982_v53, %v1987_v1  ;;  %v1992_v55 = vsel %vm1420_vm6, %v1987_v1, %v1991_v43  ;;  %v1996_v47 = vsel %vm1420_vm6, %v1991_v43, %v1995_v46  ;;  %v2044_v36 = vmul.f32 %v2029_v24, %v2021_v20 }
 0x3aa   : > { %v2011_v62 = vadd.f32 %v1988_v56, %v1936_v25  ;;  %v2013_v3 = vadd.f32 %v1992_v55, %v1938_v26  ;;  %v2015_v41 = vadd.f32 %v1996_v47, %v1940_v17  ;;  %v2056_v14 = vrot.slane %v2036_v61, 6 }
 0x3ab   : > { %v2057_v49 = vrot.slane %v2038_v48, 6  ;;  %v2062_v63 = vrot.slane %v2040_v52, 6  ;;  %v2066_v60 = vrot.slane %v2042_v42, 6  ;;  %v2070_v44 = vrot.slane %v2044_v36, 6 }
 0x3ac   : > { %v2099_v38 = vrot.slane %v4012_v16, %v3675_v23  ;;  %v1077_v22 = vmul.f32 %v3781_v33, %v1055_v34  ;;  %v4483_v33 = vrot.slane %v4112_v39, 2 }
 0x3ad   : > { %v2058_v35 = vsel %vm1496_vm7, %v2056_v14, %v2057_v49  ;;  %v2063_v9 = vsel %vm1496_vm7, %v2057_v49, %v2062_v63  ;;  %v2067_v24 = vsel %vm1496_vm7, %v2062_v63, %v2066_v60  ;;  %v2071_v32 = vsel %vm1496_vm7, %v2066_v60, %v2070_v44 }
 0x3ae   : > { %v2084_v53 = vadd.f32 %v2058_v35, %v2009_v58  ;;  %v2086_v19 = vadd.f32 %v2063_v9, %v2011_v62  ;;  %v2088_v8 = vadd.f32 %v2067_v24, %v2013_v3  ;;  %v2090_v57 = vadd.f32 %v2071_v32, %v2015_v41 }
 0x3af   : > { %v1153_v54 = vadd.f32 %v1131_v45, %v1077_v22  ;;  %v1609_v45 = vld [vmem:[#allocation2 + $0x50] sm:$0x1] }
 0x3b0   : > { %v2106_v10 = vadd.f32 %v2099_v38, %v2084_v53  ;;  %v2108_v25 = vadd.f32 %v2099_v38, %v2086_v19  ;;  %v2110_v23 = vadd.f32 %v2099_v38, %v2088_v8  ;;  %v2112_v16 = vadd.f32 %v2099_v38, %v2090_v57  ;;  %v2643_v57 = vld [vmem:[%s4485_s7] ss:$0 sm:$0xff] }
 0x3b1   : > { %v1229_v26 = vadd.f32 %v4483_v33, %v1153_v54  ;;  %v1632_v61 = vmul.f32 %v4212_v27, %v1609_v45 }
 0x3b2   : > { %v2633_v17 = vmul.f32 -1.442695, %v2106_v10  ;;  %v2635_v51 = vmul.f32 -1.442695, %v2108_v25  ;;  %v2637_v20 = vmul.f32 -1.442695, %v2110_v23 }
 0x3b3   : > { %v2639_v1 = vmul.f32 -1.442695, %v2112_v16  ;;  %v1305_v43 = vadd.f32 %v1283_v18, %v1229_v26 }
 0x3b4   : > { %2988 = vpow2.f32 %v2633_v17 }
 0x3b5   : > { %2990 = vpow2.f32 %v2635_v51  ;;  %v1381_v59 = vadd.f32 %v1359_v37, %v1305_v43 }
 0x3b6   : > { %2992 = vpow2.f32 %v2637_v20 }
 0x3b7   : > { %2994 = vpow2.f32 %v2639_v1  ;;  %v1457_v58 = vadd.f32 %v1435_v7, %v1381_v59 }
 0x3b9   : > { %v1533_v39 = vadd.f32 %v1511_v50, %v1457_v58 }
 0x3bb   : > { %v1599_v6 = vadd.f32 %v1577_v12, %v1533_v39 }
 0x3bd   : > { %v1642_v18 = vadd.f32 %v1632_v61, %v1599_v6 }
 0x3be   : > { %v2989_v48 = vpop.eup %2988 }
 0x3bf   : > { %v2991_v52 = vpop.eup %2990  ;;  %v2146_v42 = vadd.f32 1.0, %v2989_v48  ;;  %v1717_v11 = vadd.f32 %v1695_v29, %v1642_v18 }
 0x3c0   : > { %v2993_v37 = vpop.eup %2992  ;;  %v2148_v56 = vadd.f32 1.0, %v2991_v52 }
 0x3c1   : > { %v2995_v55 = vpop.eup %2994  ;;  %v2150_v5 = vadd.f32 1.0, %v2993_v37  ;;  %2996 = vrcp.f32 %v2146_v42  ;;  %v1792_v7 = vadd.f32 %v1770_v21, %v1717_v11 }
 0x3c2   : > { %v2152_v15 = vadd.f32 1.0, %v2995_v55  ;;  %2998 = vrcp.f32 %v2148_v56 }
 0x3c3   : > { %3000 = vrcp.f32 %v2150_v5  ;;  %v1867_v50 = vadd.f32 %v1845_v28, %v1792_v7 }
 0x3c4   : > { %3002 = vrcp.f32 %v2152_v15 }
 0x3c5   : > { %v1942_v31 = vadd.f32 %v1920_v4, %v1867_v50 }
 0x3c7   : > { %v2017_v27 = vadd.f32 %v1995_v46, %v1942_v31 }
 0x3c9   : > { %v2092_v12 = vadd.f32 %v2070_v44, %v2017_v27 }
 0x3cb   : > { %v2997_v13 = vpop.eup %2996  ;;  %v2114_v29 = vadd.f32 %v2099_v38, %v2092_v12 }
 0x3cc   : > { %v2999_v47 = vpop.eup %2998  ;;  %v2176_v36 = vmul.f32 %v2997_v13, %v2106_v10 }
 0x3cd   : > { %v3001_v2 = vpop.eup %3000  ;;  %v2178_v21 = vmul.f32 %v2999_v47, %v2108_v25  ;;  %v2641_v34 = vmul.f32 -1.442695, %v2114_v29 }
 0x3ce   : > { %v3003_v62 = vpop.eup %3002  ;;  %v2180_v3 = vmul.f32 %v3001_v2, %v2110_v23 }
 0x3cf   : > { %v2182_v41 = vmul.f32 %v3003_v62, %v2112_v16  ;;  %v2186_v40 = vpack.c.bf16 %v2178_v21, %v2176_v36  ;;  %3004 = vpow2.f32 %v2641_v34 }
 0x3d1   : > { %v2188_v28 = vpack.c.bf16 %v2182_v41, %v2180_v3  ;;  %v2233_v14 = vshrl.u32 %v2186_v40, 16  ;;  %v2235_v0 = vshll.u32 %v2186_v40, 16 }
 0x3d3   : > { %v2237_v4 = vrot.slane %v2235_v0, 1  ;;  %v2240_v49 = vshll.u32 %v2188_v28, 16  ;;  %v2256_v35 = vshrl.u32 %v2188_v28, 16 }
 0x3d5   : > { %v2238_v30 = vor.u32 %v2237_v4, %v2233_v14  ;;  %v2242_v46 = vrot.slane %v2240_v49, 1 }
 0x3d7   : > { %v2243_v63 = vsel %vm2231_vm9, %v2238_v30, %v2242_v46  ;;  %v2258_v24 = vor.u32 %v2256_v35, %v2242_v46 }
 0x3d8   : > { %2405 = vmatmul.mubr.bf16.vlgmr.msra.gmra.mrb[12].mxu0 %v2243_v63 }
 0x3d9   : > { %v3005_v60 = vpop.eup %3004 }
 0x3da   : > { %v2154_v44 = vadd.f32 1.0, %v3005_v60 }
 0x3dc   : > { %3006 = vrcp.f32 %v2154_v44 }
 0x3e6   : > { %v3007_v38 = vpop.eup %3006 }
 0x3e7   : > { %v2184_v22 = vmul.f32 %v3007_v38, %v2114_v29 }
 0x3e9   : > { %v2190_v9 = vpack.c.bf16 %v2184_v22, %v2184_v22 }
 0x3eb   : > { %v2260_v32 = vshll.u32 %v2190_v9, 16 }
 0x3ed   : > { %v2262_v53 = vrot.slane %v2260_v32, 1 }
 0x3ef   : > { %v2263_v19 = vsel %vm2231_vm9, %v2258_v24, %v2262_v53 }
 0x3f0   : > { %2413 = vmatmul.mubr.bf16.vlgmr.msra.gmra.mrb[12].mxu1 %v2263_v19 }
 0x4ab   : > { %v2683_v8 = vpop.f32.mrb[12].mxu0 }
 0x4ac   : > { %v2684_v54 = vpop.f32.mrb[13].mxu0 }
 0x4ad   : > { %v2685_v10 = vadd.f32 %v2684_v54, %v2683_v8  ;;  %v2686_v25 = vpop.f32.mrb[14].mxu0 }
 0x4ae   : > { %v2687_v23 = vpop.f32.mrb[15].mxu0 }
 0x4af   : > { %v2407_v16 = vadd.f32 %v2685_v10, %v2643_v57  ;;  %v2688_v33 = vadd.f32 %v2687_v23, %v2686_v25 }
 0x4b1   : > { %2421 = vst [vmem:[%s3726_s29] sm:$0xff] %v2407_v16  ;;  %v2410_v26 = vadd.f32 %v2688_v33, %v2643_v57 }
 0x4b3   : > { %2422 = vst [vmem:[%s3726_s29 + $0x8] sm:$0xff] %v2410_v26 }
 0x4c3   : > { %v2689_v17 = vpop.f32.mrb[12].mxu1 }
 0x4c4   : > { %v2690_v51 = vpop.f32.mrb[13].mxu1 }
 0x4c5   : > { %v2691_v20 = vadd.f32 %v2690_v51, %v2689_v17  ;;  %v2692_v1 = vpop.f32.mrb[14].mxu1 }
 0x4c6   : > { %v2693_v43 = vpop.f32.mrb[15].mxu1 }
 0x4c7   : > { %v2415_v59 = vadd.f32 %v2691_v20, %v2643_v57  ;;  %v2694_v45 = vadd.f32 %v2693_v43, %v2692_v1 }
 0x4c9   : > { %2423 = vst [vmem:[%s3726_s29 + $0x10] sm:$0xff] %v2415_v59  ;;  %v2418_v58 = vadd.f32 %v2694_v45, %v2643_v57 }
 0x4cb   : > { %2424 = vst [vmem:[%s3726_s29 + $0x18] sm:$0xff] %v2418_v58 }
 0x4cc   : > { %3163 = shalt.err (!%p3160_p13)
}
 0x4cd   : > { %s3164_s29 = scalar_lea.hbm %s4357_s18, 512  ;;  %s3168_s9 = scalar_lea.hbm %s4486_s3, 3072 }
 0x4ce   : > { %p3165_p5 = scmp.ne.s32.totalorder %s4357_s18, %s3164_s29  ;;  %p3169_p0 = scmp.lt.u32.totalorder %s4357_s18, %s4486_s3 }
 0x4cf   : > { %p3170_p10 = scmp.lt.u32.totalorder %s3168_s9, %s3164_s29  ;;  %p3172_p6 = scmp.lt.u32.totalorder %s3164_s29, %s4357_s18 }
 0x4d0   : > { %p3166_p9 = pnand %p3165_p5, %p3504_p4 }
 0x4d1   : > { %p3171_p2 = por %p3170_p10, %p3169_p0 }
 0x4d2   : > { %p3167_p1 = pneg %p3166_p9 }
 0x4d3   : > { %p3173_p8 = por %p3172_p6, %p3171_p2 }
 0x4d5   : > { %p3174_p3 = pnand %p3173_p8, %p3167_p1 }
 0x4d7   : > { %3177 = shalt.err (!%p3174_p3)
}
 0x4d8   : > { %s3271_s19 = smov 128   ;;  %s3272_s23 = smov 8  }
 0x4d9   : > { %2734 = dma.vmem_to_hbm [thread:$0]  (%p3504_p4), %s4359_s20, 512, %s4357_s18, %s2426_s12, %s3271_s19, %s3271_s19, %s3272_s23  }
 0x4da PF: > { %s4487_s5 = sld [smem:[#allocation17_spill]]  ;;  %s4488_s27 = sld [smem:[#allocation19_spill]] }
 0x4db   : > { %p2766_p7 = scmp.ge.s32.totalorder %s3256_s16, 2 }
 0x4e0   : > { %s2456_s26 = sand.u32 1, %s4487_s5   ;;  %p4489_p12 = scmp.ne.s32.totalorder %s4488_s27, 0 }
 0x4e1   : > { %s2457_s25 = scalar_lea.sflag [#allocation5], %s2456_s26 }
 0x4e2   : > { %p2754_p11 = pnand %p2766_p7, %p4489_p12 }
 0x4e4   : > { %3223 = dma.done.wait (!%p2754_p11), %s2457_s25, 512  }
 0x4e5   : > { %3225 = vsyncadd (!%p2754_p11), %s2457_s25, 4294966784  ;;  %s27_s16 = sadd.s32 1, %s3256_s16   ;;  %s4490_s24 = sld [smem:[#allocation20_spill]] }
 0x4e6   : > { %p24_p13 = scmp.ge.s32.totalorder %s27_s16, 8   ;;  %s4491_s30 = smov %s3232_s10 }
 0x4e7   : > { %s4492_s10 = smov %s3236_s11  ;;  %s4493_s11 = smov %s3523_s8 }
 0x4e8   : > { %s4494_s12 = smov %s3248_s14  ;;  %s4495_s13 = smov %s3252_s15 }
 0x4e9   : > { %s4496_s14 = smov %s4499_s28  ;;  %26 = sbr.rel (!%p24_p13) target bundleno = 17 (0x11), region = 139 }
 0x4eb   : > { %s4497_s15 = smov %s4490_s24 }
 0x4f0   :  { %2462 = vsyncpa [#allocation4], 1 }
 0x4f1   :  { %2464 = vsyncpa [#allocation4 + $0x1], 1 }
 0x4f2   :  { %2465 = vsyncpa [#allocation7], 1 }
 0x4f3   :  { %2466 = vsyncpa [#allocation10], 1 }
 0x4f4   :  { %2467 = vsyncpa [#allocation5], 1 }
 0x4f5   :  { %2469 = vsyncpa [#allocation5 + $0x1], 1 }

// kernel: tpu_custom_call.1
= control target key start
LH: loop header
LB: loop body
LE: loop exit
PB: predicated region body
PF: predicated region fallthrough
CT: control target
= control target key end

     0   :  { %s4415_s0 = inlined_call_operand.hbm [shape: f32[2,3,48,128], index: 0, kind: input, shape index: {}]   ;;  %s4416_s1 = inlined_call_operand.vmem [shape: f32[1,128], index: 1, kind: input, shape index: {}]   ;;  %s4417_s2 = inlined_call_operand.hbm [shape: f32[1,128], index: 2, kind: input, shape index: {}]   ;;  %s4418_s3 = inlined_call_operand.hbm [shape: bf16[128,512], index: 3, kind: input, shape index: {}]   ;;  %s4419_s4 = inlined_call_operand.vmem [shape: f32[1,512], index: 4, kind: input, shape index: {}]   ;;  %s4420_s5 = inlined_call_operand.hbm [shape: f32[15,256], index: 5, kind: input, shape index: {}]   ;;  %s4421_s6 = inlined_call_operand.vmem [shape: f32[1,256], index: 6, kind: input, shape index: {}]   ;;  %s4422_s7 = inlined_call_operand.hbm [shape: bf16[256,128], index: 7, kind: input, shape index: {}]   ;;  %s4423_s8 = inlined_call_operand.vmem [shape: f32[1,128], index: 8, kind: input, shape index: {}]   ;;  %s4424_s9 = inlined_call_operand.hbm [shape: f32[2,96,128], index: 9, kind: output, shape index: {}]  }
   0x1   :  { %4443 = sst [smem:[#allocation21_spill]] %s4417_s2 }
   0x2   :  { %4444 = sst [smem:[#allocation22_spill]] %s4418_s3 }
   0x3   :  { %4445 = sst [smem:[#allocation23_spill]] %s4420_s5 }
   0x4   :  { %4446 = sst [smem:[#allocation24_spill]] %s4421_s6 }
   0x5   :  { %4447 = sst [smem:[#allocation25_spill]] %s4422_s7 }
   0x6   :  { %4448 = sst [smem:[#allocation26_spill]] %s4423_s8 }
   0x7   :  { %4449 = sst [smem:[#allocation27_spill]] %s4424_s9 }
   0x8   :  { %14 = vsyncpa [#allocation4], 0 }
   0x9   :  { %16 = vsyncpa [#allocation4 + $0x1], 0 }
   0xa   :  { %17 = vsyncpa [#allocation7], 0 }
   0xb   :  { %18 = vsyncpa [#allocation10], 0 }
   0xc   :  { %19 = vsyncpa [#allocation5], 0 }
   0xd   :  { %21 = vsyncpa [#allocation5 + $0x1], 0  ;;  %s3323_s30 = smov 0   ;;  %s3325_s10 = smov 0  }
   0xe   :  { %s3327_s11 = smov 0   ;;  %s3329_s12 = smov 0  }
   0xf   :  { %s3331_s13 = smov 0   ;;  %s3333_s14 = smov 0  }
  0x10   :  { %s3335_s15 = smov 0   ;;  %s3337_s16 = smov 0  }
  0x11 LB: > { %4450 = sst [smem:[#allocation17_spill]] %s3228_s30  ;;  %s2569_s17 = sadd.s32 4294967295, %s3256_s16   ;;  %s3256_s16 = sphi %s3337_s16, %s27_s16   ;;  %s3252_s15 = sphi %s3335_s15, %s4497_s15   ;;  %s3248_s14 = sphi %s3333_s14, %s4496_s14   ;;  %s3244_s13 = sphi %s3331_s13, %s4495_s13   ;;  %s3240_s12 = sphi %s3329_s12, %s4494_s12   ;;  %s3236_s11 = sphi %s3327_s11, %s4493_s11   ;;  %s3232_s10 = sphi %s3325_s10, %s4492_s10   ;;  %s3228_s30 = sphi %s3323_s30, %s4491_s30  }
  0x12   : > { %4451 = sst [smem:[#allocation18_spill]] %s3244_s13  ;;  %s2570_s18 = sadd.s32 4294967294, %s3256_s16  }
  0x13   : > { %p61_p0 = scmp.ne.s32.totalorder %s3232_s10, %s3228_s30  ;;  %p3367_p1 = scmp.eq.s32.totalorder %s2569_s17, 0 }
  0x14   : > { %p3371_p2 = scmp.eq.s32.totalorder %s2569_s17, 5  ;;  %p261_p3 = scmp.eq.s32.totalorder %s2570_s18, 5 }
  0x15   : > { %s4452_s19 = scalar_select %p3367_p1, 1, 0 }
  0x16   : > { %s4453_s20 = scalar_select %p3371_p2, 1, 0 }
  0x17   : > { %p3377_p4 = por %p3367_p1, %p61_p0  ;;  %p2571_p5 = scmp.ge.s32.totalorder %s3256_s16, 1 }
  0x18   : > { %p3382_p6 = por %p261_p3, %p61_p0  ;;  %p268_p7 = scmp.lt.s32.totalorder %s3256_s16, 7 }
  0x19   : > { %s4454_s21 = scalar_select %p3377_p4, 1, 0 }
  0x1a   : > { %s4455_s22 = scalar_select %p3382_p6, 1, 0 }
  0x1b   : > { %p3387_p8 = pnand %p2571_p5, %p268_p7  ;;  %s3258_s24 = smov [#allocation6]  }
  0x1c   : > { %4456 = sst [smem:[#allocation19_spill]] %s4455_s22  ;;  %s284_s25 = sshll.u32 %s3258_s24, 4  ;;  %s285_s25 = int_to_ptr.vmem [resolvable:$true] %s284_s25 }
  0x1d   : > { %s4457_s23 = scalar_select %p3387_p8, 1, 0 }
  0x1e   : > { %p2736_p9 = pneg %p3387_p8  ;;  %s3259_s27 = smov [#allocation9]  }
  0x1f   : > { %s310_s28 = sshll.u32 %s3259_s27, 4  ;;  %s3260_s29 = smov [#allocation8]   ;;  %s3399_s28 = int_to_ptr.vmem [resolvable:$true] %s310_s28 }
  0x20   : > { %p3395_p10 = pnand %p2736_p9, %p3367_p1  ;;  %s3401_s17 = sshll.u32 %s3260_s29, 4  ;;  %s295_s17 = int_to_ptr.vmem [resolvable:$true] %s3401_s17 }
  0x21   : > { %s4459_s2 = sld [smem:[#allocation21_spill]] }
  0x22   : > { %p3411_p12 = pneg %p3395_p10 }
  0x27   : > { %s3008_s24 = scalar_lea.hbm %s4459_s2, 16 }
  0x28   : > { %p3009_p11 = scmp.ne.s32.totalorder %s4459_s2, %s3008_s24  ;;  %p3015_p3 = scmp.lt.u32.totalorder %s3008_s24, %s4459_s2 }
  0x2a   : > { %p3011_p13 = pnand %p3411_p12, %p3009_p11 }
  0x2c   : > { %p3012_p0 = pneg %p3011_p13 }
  0x2e   : > { %p3017_p5 = pnand %p3015_p3, %p3012_p0 }
  0x30   : > { %3020 = shalt.err (!%p3017_p5)
}
  0x31   : > { %s3021_s22 = scalar_lea.vmem %s285_s25, 16  ;;  %s3028_s9 = scalar_lea.vmem %s285_s25, 32 }
  0x32   : > { %p3022_p7 = scmp.ne.s32.totalorder %s285_s25, %s3021_s22  ;;  %p3029_p1 = scmp.lt.s32.totalorder %s285_s25, %s285_s25 }
  0x33   : > { %p3030_p4 = scmp.lt.s32.totalorder %s3028_s9, %s3021_s22 }
  0x34   : > { %p3024_p9 = pnand %p3022_p7, %p3411_p12 }
  0x35   : > { %p3031_p8 = por %p3030_p4, %p3029_p1 }
  0x36   : > { %p3025_p6 = pneg %p3024_p9 }
  0x38   : > { %p3032_p2 = pnand %p3031_p8, %p3025_p6 }
  0x3a   : > { %3035 = shalt.err (!%p3032_p2)
}
  0x3b   : > { %2739 = dma.hbm_to_vmem [thread:$0]  (!%p3395_p10), %s4459_s2, 16, %s285_s25, [#allocation7]  }
  0x3c   : > { %s4461_s5 = sld [smem:[#allocation23_spill]] }
  0x42   : > { %s3036_s29 = scalar_lea.hbm %s4461_s5, 512 }
  0x43   : > { %p3037_p11 = scmp.ne.s32.totalorder %s4461_s5, %s3036_s29  ;;  %p3043_p2 = scmp.lt.u32.totalorder %s3036_s29, %s4461_s5 }
  0x45   : > { %p3039_p13 = pnand %p3037_p11, %p3411_p12 }
  0x47   : > { %p3040_p1 = pneg %p3039_p13 }
  0x49   : > { %p3045_p4 = pnand %p3043_p2, %p3040_p1 }
  0x4b   : > { %3048 = shalt.err (!%p3045_p4)
}
  0x4c   : > { %s3049_s25 = scalar_lea.vmem %s3399_s28, 512  ;;  %p3057_p3 = scmp.lt.s32.totalorder %s3399_s28, %s3399_s28 }
  0x4d   : > { %p3050_p6 = scmp.ne.s32.totalorder %s3399_s28, %s3049_s25  ;;  %p3058_p5 = scmp.lt.s32.totalorder %s3049_s25, %s3049_s25 }
  0x4f   : > { %p3052_p8 = pnand %p3050_p6, %p3411_p12  ;;  %p3059_p7 = por %p3058_p5, %p3057_p3 }
  0x51   : > { %p3053_p0 = pneg %p3052_p8 }
  0x53   : > { %p3060_p9 = pnand %p3059_p7, %p3053_p0 }
  0x55   : > { %3063 = shalt.err (!%p3060_p9)
}
  0x56   : > { %s3261_s6 = smov 256   ;;  %s3262_s13 = smov 16  }
  0x57   : > { %2745 = dma.hbm_to_vmem [thread:$0]  (!%p3395_p10), %s4461_s5, 512, %s3399_s28, [#allocation10], %s3261_s6, %s3261_s6, %s3262_s13  }
  0x58   : > { %s4462_s3 = sld [smem:[#allocation22_spill]] }
  0x5e   : > { %s3064_s29 = scalar_lea.hbm %s4462_s3, 4096 }
  0x5f   : > { %p3065_p11 = scmp.ne.s32.totalorder %s4462_s3, %s3064_s29  ;;  %p3071_p2 = scmp.lt.u32.totalorder %s3064_s29, %s4462_s3 }
  0x61   : > { %p3067_p13 = pnand %p3065_p11, %p3411_p12 }
  0x63   : > { %p3068_p1 = pneg %p3067_p13 }
  0x65   : > { %p3073_p4 = pnand %p3071_p2, %p3068_p1 }
  0x67   : > { %3076 = shalt.err (!%p3073_p4)
}
  0x68   : > { %s3077_s30 = scalar_lea.vmem %s295_s17, 4096  ;;  %p3085_p3 = scmp.lt.s32.totalorder %s295_s17, %s295_s17 }
  0x69   : > { %p3078_p6 = scmp.ne.s32.totalorder %s295_s17, %s3077_s30  ;;  %p3086_p5 = scmp.lt.s32.totalorder %s3077_s30, %s3077_s30 }
  0x6b   : > { %p3080_p8 = pnand %p3078_p6, %p3411_p12  ;;  %p3087_p7 = por %p3086_p5, %p3085_p3 }
  0x6d   : > { %p3081_p0 = pneg %p3080_p8 }
  0x6f   : > { %p3088_p9 = pnand %p3087_p7, %p3081_p0 }
  0x71   : > { %3091 = shalt.err (!%p3088_p9)
}
  0x72   : > { %2742 = dma.hbm_to_vmem [thread:$0]  (!%p3395_p10), %s4462_s3, 4096, %s295_s17, [#allocation7], %s3261_s6, %s3261_s6, %s3262_s13  }
  0x73   : > { %s3263_s2 = smov [#allocation11]   ;;  %s4463_s7 = sld [smem:[#allocation25_spill]] }
  0x74   : > { %s326_s24 = sshll.u32 %s3263_s2, 4  ;;  %s327_s24 = int_to_ptr.vmem [resolvable:$true] %s326_s24 }
  0x79   : > { %s3092_s22 = scalar_lea.hbm %s4463_s7, 2048 }
  0x7a   : > { %p3093_p11 = scmp.ne.s32.totalorder %s4463_s7, %s3092_s22  ;;  %p3099_p2 = scmp.lt.u32.totalorder %s3092_s22, %s4463_s7 }
  0x7c   : > { %p3095_p13 = pnand %p3093_p11, %p3411_p12 }
  0x7e   : > { %p3096_p1 = pneg %p3095_p13 }
  0x80   : > { %p3101_p4 = pnand %p3099_p2, %p3096_p1 }
  0x82   : > { %3104 = shalt.err (!%p3101_p4)
}
  0x83   : > { %s3105_s17 = scalar_lea.vmem %s327_s24, 2048  ;;  %p3113_p3 = scmp.lt.s32.totalorder %s327_s24, %s327_s24 }
  0x84   : > { %p3106_p6 = scmp.ne.s32.totalorder %s327_s24, %s3105_s17  ;;  %p3114_p5 = scmp.lt.s32.totalorder %s3105_s17, %s3105_s17 }
  0x86   : > { %p3108_p8 = pnand %p3106_p6, %p3411_p12  ;;  %p3115_p7 = por %p3114_p5, %p3113_p3 }
  0x88   : > { %p3109_p0 = pneg %p3108_p8 }
  0x8a   : > { %p3116_p9 = pnand %p3115_p7, %p3109_p0 }
  0x8c   : > { %3119 = shalt.err (!%p3116_p9)
}
  0x8d   : > { %s3264_s6 = smov 64   ;;  %s3265_s5 = smov 4  }
  0x8e   : > { %2748 = dma.hbm_to_vmem [thread:$0]  (!%p3395_p10), %s4463_s7, 2048, %s327_s24, [#allocation10], %s3264_s6, %s3264_s6, %s3265_s5  }
  0x8f   : > { %s36_s28 = sadd.s32 1, %s3248_s14  ;;  %s39_s18 = sadd.s32 1, %s3252_s15 }
  0x90   : > { %p37_p12 = scmp.ge.s32.totalorder %s36_s28, 3  ;;  %s48_s2 = sadd.s32 1, %s3236_s11 }
  0x91   : > { %p55_p11 = scmp.ne.s32.totalorder %s3236_s11, %s3232_s10  ;;  %p56_p13 = scmp.eq.s32.totalorder %s3256_s16, 0 }
  0x92   : > { %s4499_s28 = smov (%p37_p12, %s36_s28), 0  ;;  %s4501_s18 = smov (!%p37_p12, %s39_s18), %s3252_s15 }
  0x93   : > { %s44_s27 = ssub.s32 %s3248_s14, %s4499_s28  ;;  %p3498_p1 = por %p56_p13, %p55_p11 }
  0x94   : > { %p41_p10 = scmp.ge.s32.totalorder %s4501_s18, 2  ;;  %p4465_p2 = scmp.ne.s32.totalorder %s4453_s20, 0 }
  0x95   : > { %p2761_p6 = scmp.lt.s32.totalorder %s3256_s16, 6  ;;  %s343_s29 = sand.u32 1, %s3236_s11  }
  0x96   : > { %p3504_p4 = por %p4465_p2, %p55_p11  ;;  %s4503_s18 = smov (%p41_p10, %s4501_s18), 0 }
  0x97   : > { %4467 = sst [smem:[#allocation20_spill]] %s4503_s18  ;;  %s2711_s22 = smul.u32 48, %s343_s29 }
  0x98   : > { %s43_s9 = ssub.s32 %s3252_s15, %s4503_s18  ;;  %s2712_s25 = smul.u32 6, %s3248_s14 }
  0x99   : > { %s45_s30 = sor.u32 %s44_s27, %s43_s9  ;;  %s2713_s17 = smul.u32 18, %s3252_s15 }
  0x9a   : > { %p46_p8 = scmp.eq.s32.totalorder %s45_s30, 0  ;;  %s347_s6 = scalar_lea.vmem [#allocation3], %s2711_s22 }
  0x9b   : > { %s356_s5 = sshll.u32 %s347_s6, 4  ;;  %p3518_p0 = pnand %p2761_p6, %p3498_p1  ;;  %s3525_s5 = int_to_ptr.vmem [resolvable:$true] %s356_s5 }
  0x9c   : > { %s3523_s8 = scalar_select %p46_p8, %s3236_s11, %s48_s2  }
  0x9d   : > { %s353_s13 = sadd.s32 %s2713_s17, %s2712_s25  ;;  %s3532_s26 = scalar_lea.sflag [#allocation4], %s343_s29 }
  0x9e   : > { %s2577_s3 = sshll.u32 %s353_s13, 7  ;;  %p3122_p5 = pneg %p3518_p0 }
  0x9f   : > { %s3530_s27 = scalar_lea.hbm %s4415_s0, %s2577_s3  ;;  %s3125_s7 = scalar_lea.hbm %s4415_s0, 4608 }
  0xa0   : > { %s3120_s22 = scalar_lea.hbm %s3530_s27, 768  ;;  %p3126_p12 = scmp.lt.u32.totalorder %s3530_s27, %s4415_s0 }
  0xa1   : > { %p3121_p3 = scmp.ne.s32.totalorder %s3530_s27, %s3120_s22  ;;  %p3127_p11 = scmp.lt.u32.totalorder %s3125_s7, %s3120_s22 }
  0xa2   : > { %p3129_p1 = scmp.lt.u32.totalorder %s3120_s22, %s3530_s27 }
  0xa3   : > { %p3123_p7 = pnand %p3122_p5, %p3121_p3  ;;  %p3128_p13 = por %p3127_p11, %p3126_p12 }
  0xa5   : > { %p3124_p9 = pneg %p3123_p7  ;;  %p3130_p10 = por %p3129_p1, %p3128_p13 }
  0xa7   : > { %p3131_p2 = pnand %p3130_p10, %p3124_p9 }
  0xa9   : > { %3134 = shalt.err (!%p3131_p2)
}
  0xaa   : > { %s3135_s29 = scalar_lea.vmem %s3525_s5, 768  ;;  %s3266_s25 = smov [#allocation3]  }
  0xab   : > { %p3136_p6 = scmp.ne.s32.totalorder %s3525_s5, %s3135_s29  ;;  %s3140_s30 = sshll.u32 %s3266_s25, 4  ;;  %s3141_s30 = int_to_ptr.vmem [resolvable:$false] %s3140_s30 }
  0xac   : > { %s3142_s17 = scalar_lea.vmem %s3141_s30, 1536  ;;  %p3143_p7 = scmp.lt.s32.totalorder %s3525_s5, %s3141_s30 }
  0xad   : > { %p3138_p8 = pnand %p3136_p6, %p3122_p5  ;;  %p3144_p12 = scmp.lt.s32.totalorder %s3142_s17, %s3135_s29 }
  0xaf   : > { %p3139_p3 = pneg %p3138_p8  ;;  %p3145_p11 = por %p3144_p12, %p3143_p7 }
  0xb1   : > { %p3146_p13 = pnand %p3145_p11, %p3139_p3 }
  0xb3   : > { %3149 = shalt.err (!%p3146_p13)
}
  0xb4   : > { %s3267_s6 = smov 128   ;;  %s3268_s13 = smov 8  }
  0xb5   : > { %2752 = dma.hbm_to_vmem [thread:$0]  (!%p3518_p0), %s3530_s27, 768, %s3525_s5, %s3532_s26, %s3267_s6, %s3267_s6, %s3268_s13  }
  0xb6   : > { %p4469_p5 = scmp.ne.s32.totalorder %s4457_s23, 0 }
  0xb7   : > { %s3563_s22 = sand.u32 (!%p4469_p5), 1, %s3232_s10   ;;  %p4470_p9 = scmp.ne.s32.totalorder (!%p4469_p5), %s4454_s21, 0 }
  0xb8   : > { %368 = sbr.rel (%p4469_p5) target bundleno = 1242 (0x4da), region = 56  ;;  %s371_s9 = scalar_lea.sflag (!%p4469_p5), [#allocation4], %s3563_s22 }
  0xb9   : > { %s2714_s2 = smul.u32 (!%p4469_p5), 48, %s3563_s22 }
  0xbb   : > { %s374_s7 = scalar_lea.vmem (!%p4469_p5), [#allocation3], %s2714_s2 }
  0xbf   : > { %3211 = dma.done.wait (%p4470_p9), %s371_s9, 768  }
  0xc0   : > { %3213 = vsyncadd (%p4470_p9), %s371_s9, 4294966528  ;;  %p4471_p1 = scmp.ne.s32.totalorder %s4452_s19, 0 }
  0xc2   : > { %3215 = dma.done.wait (%p4471_p1), [#allocation7], 4112  }
  0xc3   : > { %3217 = vsyncadd (%p4471_p1), [#allocation7], 4294963184 }
  0xc4   : > { %3219 = dma.done.wait (%p4471_p1), [#allocation10], 2560  }
  0xc5   : > { %3221 = vsyncadd (%p4471_p1), [#allocation10], 4294964736  ;;  %v427_v0 = vld [vmem:[%s374_s7] sm:$0xff]  ;;  %v429_v1 = vld [vmem:[%s374_s7 + $0x10] sm:$0xff]  ;;  %s2583_s21 = sshll.u32 %s3563_s22, 5  ;;  %v3269_v60 = vmov 0  }
  0xc6   : > { %433 = vadd.xlane.f32.xlu0 %v427_v0  ;;  %437 = vadd.xlane.f32.xlu1 %v429_v1  ;;  %v428_v2 = vld [vmem:[%s374_s7 + $0x8] sm:$0xff]  ;;  %v430_v3 = vld [vmem:[%s374_s7 + $0x18] sm:$0xff]  ;;  %v431_v4 = vld [vmem:[%s374_s7 + $0x20] sm:$0xff]  ;;  %s2665_s5 = sshll.u32 %s3240_s12, 5  ;;  %p953_p0 = scmp.eq.s32.totalorder %s3240_s12, 0 }
  0xc7   : > { %v432_v5 = vld [vmem:[%s374_s7 + $0x28] sm:$0xff]  ;;  %v2848_v8 = vld [vmem:[#allocation8] ss:$16 sps:$4 sm:$0xff]   ;;  %775 = vmatprep.mubr.bf16.mxu0 %v3269_v60  ;;  %838 = vmatprep.mubr.bf16.mxu1 %v3269_v60  ;;  %s2666_s20 = sadd.s32 32, %s2665_s5  ;;  %s3726_s29 = scalar_lea.vmem [#allocation12], %s2583_s21 }
  0xc8   : > { %v2844_v6 = vld [vmem:[#allocation8 + $0x4] ss:$16 sps:$4 sm:$0xff]   ;;  %v2846_v7 = vld [vmem:[#allocation8 + $0xc] ss:$16 sps:$4 sm:$0xff]   ;;  %v2849_v9 = vld [vmem:[#allocation8 + $0x8] ss:$16 sps:$4 sm:$0xff]  }
  0xc9   : > { %743 = vmatprep.subr.bf16.mxu0 %v2844_v6  ;;  %806 = vmatprep.subr.bf16.mxu1 %v2846_v7  ;;  %v2850_v10 = vld [vmem:[#allocation8 + $0x24] ss:$16 sps:$4 sm:$0xff]   ;;  %v2852_v11 = vld [vmem:[#allocation8 + $0x2c] ss:$16 sps:$4 sm:$0xff]   ;;  %v2854_v36 = vld [vmem:[#allocation8 + $0x20] ss:$16 sps:$4 sm:$0xff]  }
  0xca   : > { %435 = vadd.xlane.f32.xlu0 %v428_v2  ;;  %439 = vadd.xlane.f32.xlu1 %v430_v3  ;;  %v2855_v37 = vld [vmem:[#allocation8 + $0x28] ss:$16 sps:$4 sm:$0xff]   ;;  %v2856_v38 = vld [vmem:[#allocation8 + $0x44] ss:$16 sps:$4 sm:$0xff]   ;;  %v2858_v39 = vld [vmem:[#allocation8 + $0x4c] ss:$16 sps:$4 sm:$0xff]  }
  0xcb   : > { %744 = vmatpush1.bf16.msra.mxu0 %v2848_v8  ;;  %807 = vmatpush1.bf16.msra.mxu1 %v2849_v9  ;;  %v2860_v40 = vld [vmem:[#allocation8 + $0x40] ss:$16 sps:$4 sm:$0xff]   ;;  %v2861_v41 = vld [vmem:[#allocation8 + $0x48] ss:$16 sps:$4 sm:$0xff]   ;;  %v2862_v42 = vld [vmem:[#allocation8 + $0x64] ss:$16 sps:$4 sm:$0xff]  }
  0xcc   : > { %745 = vmatprep.subr.bf16.mxu0 %v2850_v10  ;;  %808 = vmatprep.subr.bf16.mxu1 %v2852_v11  ;;  %v2864_v43 = vld [vmem:[#allocation8 + $0x6c] ss:$16 sps:$4 sm:$0xff]   ;;  %v2866_v44 = vld [vmem:[#allocation8 + $0x60] ss:$16 sps:$4 sm:$0xff]   ;;  %v2867_v45 = vld [vmem:[#allocation8 + $0x68] ss:$16 sps:$4 sm:$0xff]  }
  0xcd   : > { %v2868_v46 = vld [vmem:[#allocation8 + $0x84] ss:$16 sps:$4 sm:$0xff]   ;;  %v2870_v47 = vld [vmem:[#allocation8 + $0x8c] ss:$16 sps:$4 sm:$0xff]   ;;  %v2872_v48 = vld [vmem:[#allocation8 + $0x80] ss:$16 sps:$4 sm:$0xff]  }
  0xce   : > { %441 = vadd.xlane.f32.xlu0 %v431_v4  ;;  %443 = vadd.xlane.f32.xlu1 %v432_v5  ;;  %v2873_v49 = vld [vmem:[#allocation8 + $0x88] ss:$16 sps:$4 sm:$0xff]   ;;  %v2874_v50 = vld [vmem:[#allocation8 + $0xa4] ss:$16 sps:$4 sm:$0xff]   ;;  %v2876_v51 = vld [vmem:[#allocation8 + $0xac] ss:$16 sps:$4 sm:$0xff]  }
  0xcf   : > { %746 = vmatpush1.bf16.msra.mxu0 %v2854_v36  ;;  %809 = vmatpush1.bf16.msra.mxu1 %v2855_v37  ;;  %v2878_v52 = vld [vmem:[#allocation8 + $0xa0] ss:$16 sps:$4 sm:$0xff]   ;;  %v2879_v53 = vld [vmem:[#allocation8 + $0xa8] ss:$16 sps:$4 sm:$0xff]   ;;  %v2880_v54 = vld [vmem:[#allocation8 + $0xc4] ss:$16 sps:$4 sm:$0xff]  }
  0xd0   : > { %747 = vmatprep.subr.bf16.mxu0 %v2856_v38  ;;  %810 = vmatprep.subr.bf16.mxu1 %v2858_v39  ;;  %v2882_v55 = vld [vmem:[#allocation8 + $0xcc] ss:$16 sps:$4 sm:$0xff]   ;;  %v2884_v56 = vld [vmem:[#allocation8 + $0xc0] ss:$16 sps:$4 sm:$0xff]   ;;  %v2885_v57 = vld [vmem:[#allocation8 + $0xc8] ss:$16 sps:$4 sm:$0xff]  }
  0xd1   : > { %v2886_v58 = vld [vmem:[#allocation8 + $0xe4] ss:$16 sps:$4 sm:$0xff]   ;;  %v2888_v59 = vld [vmem:[#allocation8 + $0xec] ss:$16 sps:$4 sm:$0xff]   ;;  %v2890_v61 = vld [vmem:[#allocation8 + $0xe0] ss:$16 sps:$4 sm:$0xff]  }
  0xd2   : > { %v2891_v62 = vld [vmem:[#allocation8 + $0xe8] ss:$16 sps:$4 sm:$0xff]   ;;  %s956_s27 = sadd.s32 8, %s2666_s20 }
  0xd3   : > { %748 = vmatpush1.bf16.msra.mxu0 %v2860_v40  ;;  %811 = vmatpush1.bf16.msra.mxu1 %v2861_v41  ;;  %p957_p10 = scmp.gt.s32.totalorder %s956_s27, 90 }
  0xd4   : > { %749 = vmatprep.subr.bf16.mxu0 %v2862_v42  ;;  %812 = vmatprep.subr.bf16.mxu1 %v2864_v43 }
  0xd5   : > { %p3623_p2 = por %p957_p10, %p953_p0 }
  0xd6   : > { %s2632_s25 = sadd.s32 (%p3623_p2), 4294967288, %s2665_s5 }
  0xd7   : > { %750 = vmatpush1.bf16.msra.mxu0 %v2866_v44  ;;  %813 = vmatpush1.bf16.msra.mxu1 %v2867_v45 }
  0xd8   : > { %751 = vmatprep.subr.bf16.mxu0 %v2868_v46  ;;  %814 = vmatprep.subr.bf16.mxu1 %v2870_v47 }
  0xdb   : > { %752 = vmatpush1.bf16.msra.mxu0 %v2872_v48  ;;  %815 = vmatpush1.bf16.msra.mxu1 %v2873_v49  ;;  %v3633_v49 = vld [vmem:[%s4419_s4] sm:$0xf] }
  0xdc   : > { %753 = vmatprep.subr.bf16.mxu0 %v2874_v50  ;;  %816 = vmatprep.subr.bf16.mxu1 %v2876_v51 }
  0xdf   : > { %754 = vmatpush1.bf16.msra.mxu0 %v2878_v52  ;;  %817 = vmatpush1.bf16.msra.mxu1 %v2879_v53 }
  0xe0   : > { %755 = vmatprep.subr.bf16.mxu0 %v2880_v54  ;;  %818 = vmatprep.subr.bf16.mxu1 %v2882_v55 }
  0xe3   : > { %756 = vmatpush1.bf16.msra.mxu0 %v2884_v56  ;;  %819 = vmatpush1.bf16.msra.mxu1 %v2885_v57 }
  0xe4   : > { %757 = vmatprep.subr.bf16.mxu0 %v2886_v58  ;;  %820 = vmatprep.subr.bf16.mxu1 %v2888_v59 }
  0xe7   : > { %758 = vmatpush1.bf16.msra.mxu0 %v2890_v61  ;;  %821 = vmatpush1.bf16.msra.mxu1 %v2891_v62 }
 0x153   : > { %v434_v12 = vpop.xlane.xlu0 %433  ;;  %v438_v13 = vpop.xlane.xlu1 %437 }
 0x154   : > { %v446_v14 = vmul.f32 0.0078125, %v434_v12  ;;  %v448_v15 = vmul.f32 0.0078125, %v438_v13 }
 0x156   : > { %v3580_v16 = vsub.f32 %v427_v0, %v446_v14  ;;  %v3582_v17 = vsub.f32 %v429_v1, %v448_v15 }
 0x157   : > { %v436_v18 = vpop.xlane.xlu0 %435  ;;  %v440_v19 = vpop.xlane.xlu1 %439 }
 0x158   : > { %v447_v20 = vmul.f32 0.0078125, %v436_v18  ;;  %v458_v21 = vmul.f32 %v3580_v16, %v3580_v16  ;;  %v449_v22 = vmul.f32 0.0078125, %v440_v19  ;;  %v460_v25 = vmul.f32 %v3582_v17, %v3582_v17 }
 0x15a   : > { %v3586_v23 = vsub.f32 %v428_v2, %v447_v20  ;;  %464 = vadd.xlane.f32.xlu0 %v458_v21  ;;  %v3588_v24 = vsub.f32 %v430_v3, %v449_v22  ;;  %v2584_v21 = vld [vmem:[%s4416_s1] ss:$0 sm:$0xff] }
 0x15b   : > { %v442_v26 = vpop.xlane.xlu0 %441  ;;  %v444_v27 = vpop.xlane.xlu1 %443 }
 0x15c   : > { %v450_v28 = vmul.f32 0.0078125, %v442_v26  ;;  %v459_v29 = vmul.f32 %v3586_v23, %v3586_v23  ;;  %v451_v30 = vmul.f32 0.0078125, %v444_v27  ;;  %v461_v33 = vmul.f32 %v3588_v24, %v3588_v24 }
 0x15e   : > { %v3594_v31 = vsub.f32 %v431_v4, %v450_v28  ;;  %468 = vadd.xlane.f32.xlu0 %v460_v25  ;;  %466 = vadd.xlane.f32.xlu1 %v459_v29  ;;  %v3596_v32 = vsub.f32 %v432_v5, %v451_v30  ;;  %v2585_v28 = vld [vmem:[#allocation6] ss:$0 sm:$0xff] }
 0x160   : > { %v462_v34 = vmul.f32 %v3594_v31, %v3594_v31  ;;  %v463_v35 = vmul.f32 %v3596_v32, %v3596_v32 }
 0x162   : > { %470 = vadd.xlane.f32.xlu1 %v461_v33  ;;  %472 = vadd.xlane.f32.xlu0 %v462_v34 }
 0x166   : > { %474 = vadd.xlane.f32.xlu1 %v463_v35 }
 0x1e7   : > { %v465_v63 = vpop.xlane.xlu0 %464 }
 0x1e8   : > { %v476_v0 = vmul.f32 0.0078125, %v465_v63 }
 0x1ea   : > { %v482_v1 = vadd.f32 1e-05, %v476_v0 }
 0x1eb   : > { %v467_v2 = vpop.xlane.xlu1 %466  ;;  %v469_v3 = vpop.xlane.xlu0 %468 }
 0x1ec   : > { %2892 = vrsqrt.f32 %v482_v1  ;;  %v477_v4 = vmul.f32 0.0078125, %v467_v2  ;;  %v478_v5 = vmul.f32 0.0078125, %v469_v3 }
 0x1ee   : > { %v483_v6 = vadd.f32 1e-05, %v477_v4  ;;  %v484_v7 = vadd.f32 1e-05, %v478_v5 }
 0x1ef   : > { %v471_v8 = vpop.xlane.xlu1 %470  ;;  %v473_v9 = vpop.xlane.xlu0 %472 }
 0x1f0   : > { %2894 = vrsqrt.f32 %v483_v6  ;;  %v479_v10 = vmul.f32 0.0078125, %v471_v8  ;;  %v480_v12 = vmul.f32 0.0078125, %v473_v9 }
 0x1f1   : > { %2896 = vrsqrt.f32 %v484_v7 }
 0x1f2   : > { %v485_v11 = vadd.f32 1e-05, %v479_v10  ;;  %v486_v18 = vadd.f32 1e-05, %v480_v12 }
 0x1f3   : > { %v475_v13 = vpop.xlane.xlu1 %474 }
 0x1f4   : > { %2898 = vrsqrt.f32 %v485_v11  ;;  %v481_v14 = vmul.f32 0.0078125, %v475_v13 }
 0x1f6   : > { %v2893_v15 = vpop.eup %2892  ;;  %v487_v19 = vadd.f32 1e-05, %v481_v14 }
 0x1f7   : > { %v494_v20 = vmul.f32 %v2893_v15, %v3580_v16 }
 0x1f8   : > { %2900 = vrsqrt.f32 %v487_v19 }
 0x1f9   : > { %2902 = vrsqrt.f32 %v486_v18  ;;  %v507_v26 = vmul.f32 %v2584_v21, %v494_v20 }
 0x1fa   : > { %v2895_v22 = vpop.eup %2894 }
 0x1fb   : > { %v495_v25 = vmul.f32 %v2895_v22, %v3586_v23  ;;  %v2897_v27 = vpop.eup %2896  ;;  %v520_v33 = vadd.f32 %v2585_v28, %v507_v26 }
 0x1fc   : > { %v496_v35 = vmul.f32 %v2897_v27, %v3582_v17 }
 0x1fd   : > { %v508_v29 = vmul.f32 %v2584_v21, %v495_v25 }
 0x1fe   : > { %v2899_v30 = vpop.eup %2898  ;;  %v509_v39 = vmul.f32 %v2584_v21, %v496_v35 }
 0x1ff   : > { %v521_v34 = vadd.f32 %v2585_v28, %v508_v29  ;;  %v497_v16 = vmul.f32 %v2899_v30, %v3588_v24 }
 0x200   : > { %v522_v42 = vadd.f32 %v2585_v28, %v509_v39 }
 0x201   : > { %v526_v36 = vpack.c.bf16 %v521_v34, %v520_v33  ;;  %v510_v37 = vmul.f32 %v2584_v21, %v497_v16 }
 0x202   : > { %v2901_v38 = vpop.eup %2900 }
 0x203   : > { %776 = vmatmul.mubr.bf16.vlgmr.msra.gmra.mrb[0].mxu0 %v526_v36  ;;  %839 = vmatmul.mubr.bf16.vlgmr.msra.gmra.mrb[0].mxu1 %v526_v36  ;;  %v2903_v40 = vpop.eup %2902  ;;  %v523_v23 = vadd.f32 %v2585_v28, %v510_v37  ;;  %v499_v41 = vmul.f32 %v2901_v38, %v3596_v32 }
 0x204   : > { %785 = vmatprep.mubr.bf16.mxu0 %v3269_v60  ;;  %848 = vmatprep.mubr.bf16.mxu1 %v3269_v60  ;;  %v498_v17 = vmul.f32 %v2903_v40, %v3594_v31  ;;  %v563_v31 = vlaneseq }
 0x205   : > { %v527_v24 = vpack.c.bf16 %v523_v23, %v522_v42  ;;  %v512_v43 = vmul.f32 %v2584_v21, %v499_v41 }
 0x206   : > { %v511_v44 = vmul.f32 %v2584_v21, %v498_v17  ;;  %v3627_v32 = vshrl.u32 %v563_v31, 7 }
 0x207   : > { %v525_v45 = vadd.f32 %v2585_v28, %v512_v43 }
 0x208   : > { %v524_v46 = vadd.f32 %v2585_v28, %v511_v44  ;;  %v573_v48 = vsub.s32 2, %v3627_v32  ;;  %v577_v50 = vsub.s32 3, %v3627_v32  ;;  %v3675_v23 = vsub.s32 0, %v3627_v32 }
 0x209   : > { %v3680_v43 = vsub.s32 1, %v3627_v32 }
 0x20a   : > { %v528_v47 = vpack.c.bf16 %v525_v45, %v524_v46  ;;  %v3637_v51 = vrot.slane %v3633_v49, %v573_v48  ;;  %v3640_v52 = vrot.slane %v3633_v49, %v577_v50  ;;  %v566_v48 = vrot.slane %v3633_v49, %v3675_v23 }
 0x20b   : > { %786 = vmatmul.mubr.bf16.gmra.mrb[4].mxu0 %v527_v24  ;;  %849 = vmatmul.mubr.bf16.gmra.mrb[4].mxu1 %v527_v24 }
 0x20c   : > { %795 = vmatprep.mubr.bf16.mxu0 %v3269_v60  ;;  %858 = vmatprep.mubr.bf16.mxu1 %v3269_v60 }
 0x213   : > { %796 = vmatmul.mubr.bf16.gmra.mrb[8].mxu0 %v528_v47  ;;  %859 = vmatmul.mubr.bf16.gmra.mrb[8].mxu1 %v528_v47 }
 0x2d6   : > { %v3642_v53 = vpop.f32.mrb[0].mxu0  ;;  %v840_v54 = vpop.f32.mrb[0].mxu1 }
 0x2d7   : > { %v841_v55 = vadd.f32 %v840_v54, %v3637_v51  ;;  %v3645_v56 = vpop.f32.mrb[1].mxu0  ;;  %v842_v57 = vpop.f32.mrb[1].mxu1 }
 0x2d8   : > { %v843_v58 = vadd.f32 %v842_v57, %v3640_v52  ;;  %v3648_v59 = vpop.f32.mrb[2].mxu0  ;;  %v844_v60 = vpop.f32.mrb[2].mxu1 }
 0x2d9   : > { %v2618_v61 = vmul.f32 -1.442695, %v841_v55  ;;  %v845_v62 = vadd.f32 %v844_v60, %v3637_v51  ;;  %v3651_v63 = vpop.f32.mrb[3].mxu0  ;;  %v846_v0 = vpop.f32.mrb[3].mxu1  ;;  %v570_v55 = vrot.slane %v3633_v49, %v3680_v43  ;;  %v782_v49 = vadd.f32 %v3648_v59, %v566_v48 }
 0x2da   : > { %v2619_v1 = vmul.f32 -1.442695, %v843_v58  ;;  %v847_v2 = vadd.f32 %v846_v0, %v3640_v52 }
 0x2db   : > { %2904 = vpow2.f32 %v2618_v61  ;;  %v2620_v3 = vmul.f32 -1.442695, %v845_v62  ;;  %v778_v61 = vadd.f32 %v3642_v53, %v566_v48 }
 0x2dc   : > { %2906 = vpow2.f32 %v2619_v1  ;;  %v2621_v4 = vmul.f32 -1.442695, %v847_v2  ;;  %v780_v1 = vadd.f32 %v3645_v56, %v570_v55 }
 0x2dd   : > { %2908 = vpow2.f32 %v2620_v3 }
 0x2de   : > { %2910 = vpow2.f32 %v2621_v4  ;;  %v3654_v5 = vpop.f32.mrb[4].mxu0  ;;  %v850_v6 = vpop.f32.mrb[4].mxu1 }
 0x2df   : > { %v851_v7 = vadd.f32 %v850_v6, %v3637_v51  ;;  %v3657_v8 = vpop.f32.mrb[5].mxu0  ;;  %v852_v9 = vpop.f32.mrb[5].mxu1 }
 0x2e0   : > { %v853_v10 = vadd.f32 %v852_v9, %v3640_v52  ;;  %v3660_v11 = vpop.f32.mrb[6].mxu0  ;;  %v854_v12 = vpop.f32.mrb[6].mxu1 }
 0x2e1   : > { %v2622_v13 = vmul.f32 -1.442695, %v851_v7  ;;  %v855_v14 = vadd.f32 %v854_v12, %v3637_v51  ;;  %v3663_v15 = vpop.f32.mrb[7].mxu0  ;;  %v856_v18 = vpop.f32.mrb[7].mxu1  ;;  %v784_v7 = vadd.f32 %v3651_v63, %v570_v55 }
 0x2e2   : > { %v2623_v19 = vmul.f32 -1.442695, %v853_v10  ;;  %v857_v20 = vadd.f32 %v856_v18, %v3640_v52 }
 0x2e3   : > { %2912 = vpow2.f32 %v2622_v13  ;;  %v2624_v21 = vmul.f32 -1.442695, %v855_v14 }
 0x2e4   : > { %2914 = vpow2.f32 %v2623_v19  ;;  %v2625_v22 = vmul.f32 -1.442695, %v857_v20  ;;  %v788_v20 = vadd.f32 %v3654_v5, %v566_v48 }
 0x2e5   : > { %v2905_v25 = vpop.eup %2904  ;;  %2916 = vpow2.f32 %v2624_v21 }
 0x2e6   : > { %v2907_v26 = vpop.eup %2906  ;;  %v905_v27 = vadd.f32 1.0, %v2905_v25  ;;  %2918 = vpow2.f32 %v2625_v22  ;;  %v3666_v28 = vpop.f32.mrb[8].mxu0  ;;  %v790_v22 = vadd.f32 %v3657_v8, %v570_v55 }
 0x2e7   : > { %v860_v29 = vpop.f32.mrb[8].mxu1  ;;  %v2909_v30 = vpop.eup %2908  ;;  %v906_v33 = vadd.f32 1.0, %v2907_v26  ;;  %v798_v8 = vadd.f32 %v3666_v28, %v566_v48  ;;  %v966_v28 = vadd.s32 (%p3623_p2), 8, %v3627_v32 }
 0x2e8   : > { %v861_v34 = vadd.f32 %v860_v29, %v3637_v51  ;;  %v3669_v35 = vpop.f32.mrb[9].mxu0  ;;  %v862_v16 = vpop.f32.mrb[9].mxu1  ;;  %2920 = vrcp.f32 %v905_v27  ;;  %v907_v37 = vadd.f32 1.0, %v2909_v30  ;;  %v792_v27 = vadd.f32 %v3660_v11, %v566_v48 }
 0x2e9   : > { %v2911_v36 = vpop.eup %2910  ;;  %v863_v38 = vadd.f32 %v862_v16, %v3640_v52  ;;  %v3672_v39 = vpop.f32.mrb[10].mxu0  ;;  %2922 = vrcp.f32 %v906_v33  ;;  %v794_v33 = vadd.f32 %v3663_v15, %v570_v55 }
 0x2ea   : > { %v864_v40 = vpop.f32.mrb[10].mxu1  ;;  %v908_v41 = vadd.f32 1.0, %v2911_v36  ;;  %v2626_v42 = vmul.f32 -1.442695, %v861_v34  ;;  %v3677_v17 = vpop.f32.mrb[11].mxu0  ;;  %2924 = vrcp.f32 %v907_v37  ;;  %v800_v37 = vadd.f32 %v3669_v35, %v570_v55 }
 0x2eb   : > { %v866_v24 = vpop.f32.mrb[11].mxu1  ;;  %v2627_v44 = vmul.f32 -1.442695, %v863_v38  ;;  %v865_v45 = vadd.f32 %v864_v40, %v3637_v51  ;;  %v802_v40 = vadd.f32 %v3672_v39, %v566_v48  ;;  %v804_v15 = vadd.f32 %v3677_v17, %v570_v55 }
 0x2ec   : > { %2926 = vrcp.f32 %v908_v41  ;;  %v867_v46 = vadd.f32 %v866_v24, %v3640_v52  ;;  %v967_v35 = vadd.s32 (%p3623_p2), 16, %v3627_v32  ;;  %v968_v39 = vadd.s32 (%p3623_p2), 24, %v3627_v32 }
 0x2ed   : > { %2928 = vpow2.f32 %v2626_v42  ;;  %v2628_v47 = vmul.f32 -1.442695, %v865_v45  ;;  %v2913_v31 = vpop.eup %2912  ;;  %v969_v17 = vadd.s32 (%p3623_p2), 32, %v3627_v32 }
 0x2ee   : > { %2930 = vpow2.f32 %v2627_v44  ;;  %v2629_v50 = vmul.f32 -1.442695, %v867_v46  ;;  %v2915_v54 = vpop.eup %2914  ;;  %v909_v57 = vadd.f32 1.0, %v2913_v31  ;;  %v971_v46 = vstv (%p3623_p2), %s2632_s25 }
 0x2ef   : > { %2932 = vpow2.f32 %v2628_v47  ;;  %v2917_v58 = vpop.eup %2916  ;;  %v910_v60 = vadd.f32 1.0, %v2915_v54  ;;  %v970_v47 = vadd.s32 (%p3623_p2), 40, %v3627_v32  ;;  %v972_v31 = vadd.s32 (%p3623_p2), %v971_v46, %v3627_v32 }
 0x2f0   : > { %2934 = vpow2.f32 %v2629_v50  ;;  %v2919_v51 = vpop.eup %2918  ;;  %v911_v52 = vadd.f32 1.0, %v2917_v58  ;;  %v973_v48 = vadd.s32 (%p3623_p2), %v971_v46, %v966_v28  ;;  %v974_v50 = vadd.s32 (%p3623_p2), %v971_v46, %v967_v35 }
 0x2f1   : > { %2936 = vrcp.f32 %v909_v57  ;;  %v912_v62 = vadd.f32 1.0, %v2919_v51  ;;  %v975_v54 = vadd.s32 (%p3623_p2), %v971_v46, %v968_v39  ;;  %v976_v55 = vadd.s32 (%p3623_p2), %v971_v46, %v969_v17 }
 0x2f2   : > { %2938 = vrcp.f32 %v910_v60  ;;  %v2921_v0 = vpop.eup %2920  ;;  %v977_v57 = vadd.s32 (%p3623_p2), %v971_v46, %v970_v47  ;;  %vm978_vm0 = vcmp.ge.s32.totalorder (%p3623_p2), %v972_v31, 0  ;;  %vm984_vm1 = vcmp.lt.s32.totalorder (%p3623_p2), %v972_v31, 90 }
 0x2f3   : > { %2940 = vrcp.f32 %v911_v52  ;;  %v2923_v2 = vpop.eup %2922  ;;  %v3690_v3 = vmul.f32 %v2921_v0, %v778_v61  ;;  %vm979_vm2 = vcmp.ge.s32.totalorder (%p3623_p2), %v973_v48, 0  ;;  %vm985_vm3 = vcmp.lt.s32.totalorder (%p3623_p2), %v973_v48, 90  ;;  %vm990_vm4 = vmand (%p3623_p2), %vm978_vm0, %vm984_vm1 }
 0x2f4   : > { %2942 = vrcp.f32 %v912_v62  ;;  %v2925_v4 = vpop.eup %2924  ;;  %v3693_v6 = vmul.f32 %v2923_v2, %v780_v1  ;;  %vm980_vm5 = vcmp.ge.s32.totalorder (%p3623_p2), %v974_v50, 0  ;;  %vm986_vm6 = vcmp.lt.s32.totalorder (%p3623_p2), %v974_v50, 90  ;;  %vm991_vm9 = vmand (%p3623_p2), %vm979_vm2, %vm985_vm3 }
 0x2f5   : > { %v3696_v10 = vmul.f32 %v2925_v4, %v782_v49  ;;  %vm981_vm7 = vcmp.ge.s32.totalorder (%p3623_p2), %v975_v54, 0  ;;  %vm987_vm8 = vcmp.lt.s32.totalorder (%p3623_p2), %v975_v54, 90  ;;  %v1008_v58 = vsel (%p3623_p2), %vm990_vm4, %v3690_v3, 0.0  ;;  %vm992_vm12 = vmand (%p3623_p2), %vm980_vm5, %vm986_vm6 }
 0x2f6   : > { %v2927_v9 = vpop.eup %2926  ;;  %v1009_v60 = vsel (%p3623_p2), %vm990_vm4, %v3693_v6, 0.0  ;;  %vm982_vm10 = vcmp.ge.s32.totalorder (%p3623_p2), %v976_v55, 0  ;;  %vm988_vm11 = vcmp.lt.s32.totalorder (%p3623_p2), %v976_v55, 90  ;;  %1020 = vst [vmem:[#allocation2] sm:$0xff] (%p3623_p2), %v1008_v58  ;;  %vm983_vm13 = vcmp.ge.s32.totalorder (%p3623_p2), %v977_v57, 0  ;;  %vm993_vm15 = vmand (%p3623_p2), %vm981_vm7, %vm987_vm8 }
 0x2f7   : > { %v2929_v53 = vpop.eup %2928  ;;  %v3698_v12 = vmul.f32 %v2927_v9, %v784_v7  ;;  %1021 = vst [vmem:[#allocation2 + $0x8] sm:$0xff] (%p3623_p2), %v1009_v60  ;;  %v1010_v32 = vsel (%p3623_p2), %vm991_vm9, %v3696_v10, 0.0  ;;  %vm989_vm14 = vcmp.lt.s32.totalorder (%p3623_p2), %v977_v57, 90  ;;  %vm994_vm0 = vmand (%p3623_p2), %vm982_vm10, %vm988_vm11 }
 0x2f8   : > { %v2931_v13 = vpop.eup %2930  ;;  %v913_v56 = vadd.f32 1.0, %v2929_v53  ;;  %1022 = vst [vmem:[#allocation2 + $0x10] sm:$0xff] (%p3623_p2), %v1010_v32  ;;  %vm995_vm1 = vmand (%p3623_p2), %vm983_vm13, %vm989_vm14 }
 0x2f9   : > { %v2933_v14 = vpop.eup %2932  ;;  %v914_v18 = vadd.f32 1.0, %v2931_v13  ;;  %v1011_v51 = vsel (%p3623_p2), %vm991_vm9, %v3698_v12, 0.0 }
 0x2fa   : > { %v2935_v19 = vpop.eup %2934  ;;  %2944 = vrcp.f32 %v913_v56  ;;  %v915_v59 = vadd.f32 1.0, %v2933_v14  ;;  %1023 = vst [vmem:[#allocation2 + $0x18] sm:$0xff] (%p3623_p2), %v1011_v51 }
 0x2fb   : > { %v2937_v21 = vpop.eup %2936  ;;  %2946 = vrcp.f32 %v914_v18  ;;  %v916_v63 = vadd.f32 1.0, %v2935_v19 }
 0x2fc   : > { %v2939_v25 = vpop.eup %2938  ;;  %v3702_v26 = vmul.f32 %v2937_v21, %v788_v20  ;;  %2948 = vrcp.f32 %v915_v59 }
 0x2fd   : > { %v2941_v29 = vpop.eup %2940  ;;  %v3705_v30 = vmul.f32 %v2939_v25, %v790_v22  ;;  %2950 = vrcp.f32 %v916_v63 }
 0x2fe   : > { %v2943_v5 = vpop.eup %2942  ;;  %v3708_v34 = vmul.f32 %v2941_v29, %v792_v27  ;;  %v1012_v52 = vsel (%p3623_p2), %vm992_vm12, %v3702_v26, 0.0 }
 0x2ff   : > { %v3710_v16 = vmul.f32 %v2943_v5, %v794_v33  ;;  %v1013_v61 = vsel (%p3623_p2), %vm992_vm12, %v3705_v30, 0.0  ;;  %1024 = vst [vmem:[#allocation2 + $0x20] sm:$0xff] (%p3623_p2), %v1012_v52 }
 0x300   : > { %1025 = vst [vmem:[#allocation2 + $0x28] sm:$0xff] (%p3623_p2), %v1013_v61  ;;  %v1014_v62 = vsel (%p3623_p2), %vm993_vm15, %v3708_v34, 0.0 }
 0x301   : > { %v1015_v0 = vsel (%p3623_p2), %vm993_vm15, %v3710_v16, 0.0  ;;  %1026 = vst [vmem:[#allocation2 + $0x30] sm:$0xff] (%p3623_p2), %v1014_v62 }
 0x302   : > { %961 = sbr.rel (!%p3623_p2) target bundleno = 780 (0x30c), region = 80  ;;  %1027 = vst [vmem:[#allocation2 + $0x38] sm:$0xff] (%p3623_p2), %v1015_v0 }
 0x304   : > { %v2945_v36 = vpop.eup %2944 }
 0x305   : > { %v2947_v38 = vpop.eup %2946  ;;  %v3714_v11 = vmul.f32 %v2945_v36, %v798_v8 }
 0x306   : > { %v2949_v41 = vpop.eup %2948  ;;  %v3717_v42 = vmul.f32 %v2947_v38, %v800_v37 }
 0x307   : > { %v2951_v24 = vpop.eup %2950  ;;  %v3720_v44 = vmul.f32 %v2949_v41, %v802_v40  ;;  %v1016_v1 = vsel (%p3623_p2), %vm994_vm0, %v3714_v11, 0.0 }
 0x308   : > { %v3722_v45 = vmul.f32 %v2951_v24, %v804_v15  ;;  %v1017_v2 = vsel (%p3623_p2), %vm994_vm0, %v3717_v42, 0.0  ;;  %1028 = vst [vmem:[#allocation2 + $0x40] sm:$0xff] (%p3623_p2), %v1016_v1 }
 0x309   : > { %1029 = vst [vmem:[#allocation2 + $0x48] sm:$0xff] %v1017_v2  ;;  %v1018_v49 = vsel %vm995_vm1, %v3720_v44, 0.0 }
 0x30a   : > { %v1019_v4 = vsel %vm995_vm1, %v3722_v45, 0.0  ;;  %1030 = vst [vmem:[#allocation2 + $0x50] sm:$0xff] %v1018_v49 }
 0x30b   : > { %1031 = vst [vmem:[#allocation2 + $0x58] sm:$0xff] %v1019_v4 }
 0x30c PF: > { %1034 = sbr.rel (%p3623_p2) target bundleno = 787 (0x313), region = 84  ;;  %1035 = vst [vmem:[#allocation2] sm:$0xff] (!%p3623_p2), %v3690_v3  ;;  %1036 = vst [vmem:[#allocation2 + $0x8] sm:$0xff] (!%p3623_p2), %v3693_v6 }
 0x30d   : > { %1037 = vst [vmem:[#allocation2 + $0x10] sm:$0xff] (!%p3623_p2), %v3696_v10  ;;  %1038 = vst [vmem:[#allocation2 + $0x18] sm:$0xff] (!%p3623_p2), %v3698_v12 }
 0x30e   : > { %1039 = vst [vmem:[#allocation2 + $0x20] sm:$0xff] (!%p3623_p2), %v3702_v26  ;;  %1040 = vst [vmem:[#allocation2 + $0x28] sm:$0xff] (!%p3623_p2), %v3705_v30 }
 0x30f   : > { %1041 = vst [vmem:[#allocation2 + $0x30] sm:$0xff] (!%p3623_p2), %v3708_v34  ;;  %1042 = vst [vmem:[#allocation2 + $0x38] sm:$0xff] (!%p3623_p2), %v3710_v16 }
 0x310   : > { %1043 = vst [vmem:[#allocation2 + $0x40] sm:$0xff] (!%p3623_p2), %v3714_v11  ;;  %1044 = vst [vmem:[#allocation2 + $0x48] sm:$0xff] (!%p3623_p2), %v3717_v42 }
 0x311   : > { %1045 = vst [vmem:[#allocation2 + $0x50] sm:$0xff] (!%p3623_p2), %v3720_v44  ;;  %1046 = vst [vmem:[#allocation2 + $0x58] sm:$0xff] (!%p3623_p2), %v3722_v45 }
 0x313 PF: > { %v2952_v3 = vld [vmem:[#allocation11 + $0x40] sm:$0xff]   ;;  %v2954_v7 = vld [vmem:[#allocation11 + $0x48] sm:$0xff]   ;;  %v2956_v10 = vld [vmem:[#allocation11 + $0x50] sm:$0xff]   ;;  %vm1116_vm2 = vcmask 1046528   ;;  %vm1192_vm3 = vcmask 1045504   ;;  %vm1268_vm4 = vcmask 1044480  }
 0x314   : > { %v2953_v6 = vld [vmem:[#allocation11] sm:$0xff]   ;;  %2667 = vmatprep.subr.bf16.mxu0 %v2952_v3  ;;  %2695 = vmatprep.subr.bf16.mxu1 %v2952_v3  ;;  %v2955_v9 = vld [vmem:[#allocation11 + $0x8] sm:$0xff]   ;;  %v2957_v53 = vld [vmem:[#allocation11 + $0x10] sm:$0xff]   ;;  %vm1344_vm5 = vcmask 1043456   ;;  %vm1420_vm6 = vcmask 1042432   ;;  %vm1496_vm7 = vcmask 1041408  }
 0x315   : > { %2668 = vmatpush3.bf16.msra.mxu0 %v2953_v6  ;;  %2703 = vmatpush3.bf16.msra.mxu1 %v2953_v6  ;;  %v2958_v12 = vld [vmem:[#allocation11 + $0x58] sm:$0xff]   ;;  %v2960_v56 = vld [vmem:[#allocation11 + $0x60] sm:$0xff]   ;;  %v2962_v18 = vld [vmem:[#allocation11 + $0x68] sm:$0xff]   ;;  %vm1566_vm8 = vcmask 1040384   ;;  %s4473_s6 = sld [smem:[#allocation24_spill]]  ;;  %s4484_s13 = sld [smem:[#allocation18_spill]] }
 0x316   : > { %2669 = vmatprep.subr.bf16.mxu0 %v2954_v7  ;;  %2696 = vmatprep.subr.bf16.mxu1 %v2954_v7  ;;  %v2959_v13 = vld [vmem:[#allocation11 + $0x18] sm:$0xff]   ;;  %v2961_v14 = vld [vmem:[#allocation11 + $0x20] sm:$0xff]   ;;  %v1080_v63 = vld [vmem:[#allocation2 + $0x8] sm:$0xfc]  ;;  %vm2231_vm9 = vsmask.f32 7424 }
 0x317   : > { %v1048_v19 = vld [vmem:[#allocation2 + $0x8] sm:$0xfe]  ;;  %v3770_v20 = vld [vmem:[#allocation2 + $0x18] sm:$0xff]  ;;  %s4485_s7 = sld [smem:[#allocation26_spill]]  ;;  %s2661_s19 = sshll.u32 %s3240_s12, 2 }
 0x318   : > { %v1057_v59 = vld [vmem:[#allocation9] ss:$8 sm:$0x3]  ;;  %v1084_v25 = vld [vmem:[#allocation9 + $0x1] ss:$8 sm:$0x3] }
 0x319   : > { %2670 = vmatpush3.bf16.msra.mxu0 %v2955_v9  ;;  %2704 = vmatpush3.bf16.msra.mxu1 %v2955_v9  ;;  %v3772_v21 = vld [vmem:[#allocation2 + $0x28] sm:$0xff]  ;;  %v3775_v22 = vrot.slane %v1057_v59, %v3680_v43  ;;  %v3777_v27 = vld [vmem:[#allocation2 + $0x38] sm:$0xff]  ;;  %v1093_v30 = vrot.slane %v1084_v25, %v3680_v43  ;;  %v3781_v33 = vrot.slane %v1057_v59, %v3675_v23  ;;  %s2441_s20 = sshll.u32 %s3726_s29, 4  ;;  %s4486_s3 = sld [smem:[#allocation27_spill]]  ;;  %s4359_s20 = int_to_ptr.vmem [resolvable:$true] %s2441_s20 }
 0x31a   : > { %2671 = vmatprep.subr.bf16.mxu0 %v2956_v10  ;;  %2697 = vmatprep.subr.bf16.mxu1 %v2956_v10  ;;  %v2963_v26 = vld [vmem:[#allocation11 + $0x28] sm:$0xff]   ;;  %v1082_v29 = vld [vmem:[#allocation2 + $0x48] sm:$0x3]  ;;  %v3784_v5 = vrot.slane %v1084_v25, %v3675_v23  ;;  %v2964_v34 = vld [vmem:[#allocation11 + $0x70] sm:$0xff]   ;;  %s2426_s12 = scalar_lea.sflag [#allocation5], %s3563_s22  ;;  %s3150_s25 = scalar_lea.vmem %s4359_s20, 512 }
 0x31b   : > { %v1070_v16 = vmul.f32 %v3775_v22, %v1048_v19  ;;  %v1072_v8 = vmul.f32 %v3775_v22, %v3770_v20  ;;  %v1074_v36 = vmul.f32 %v3775_v22, %v3772_v21  ;;  %v3791_v37 = vld [vmem:[#allocation9 + $0x2] ss:$8 sm:$0x3]  ;;  %v1076_v38 = vmul.f32 %v3775_v22, %v3777_v27  ;;  %v3797_v15 = vld [vmem:[#allocation9 + $0x3] ss:$8 sm:$0x3]  ;;  %p3151_p6 = scmp.ne.s32.totalorder %s4359_s20, %s3150_s25 }
 0x31c   : > { %v1097_v11 = vmul.f32 %v1093_v30, %v1080_v63  ;;  %v1099_v40 = vmul.f32 %v1093_v30, %v3770_v20  ;;  %v1101_v41 = vmul.f32 %v1093_v30, %v3772_v21  ;;  %v1156_v42 = vld [vmem:[#allocation2 + $0x8] sm:$0xf8]  ;;  %v1103_v24 = vmul.f32 %v1093_v30, %v3777_v27  ;;  %v2965_v39 = vld [vmem:[#allocation11 + $0x30] sm:$0xff]   ;;  %v2966_v48 = vld [vmem:[#allocation11 + $0x78] sm:$0xff]   ;;  %s2715_s21 = smul.u32 12, %s4484_s13  ;;  %s3270_s30 = smov [#allocation12]  }
 0x31d   : > { %2672 = vmatpush3.bf16.msra.mxu0 %v2957_v53  ;;  %2705 = vmatpush3.bf16.msra.mxu1 %v2957_v53  ;;  %v3800_v44 = vmul.f32 %v1093_v30, %v1082_v29  ;;  %v1169_v45 = vrot.slane %v3791_v37, %v3680_v43  ;;  %v1245_v28 = vrot.slane %v3797_v15, %v3680_v43  ;;  %v3806_v35 = vld [vmem:[#allocation9 + $0x4] ss:$8 sm:$0x3]  ;;  %v1158_v55 = vld [vmem:[#allocation2 + $0x48] sm:$0x7]  ;;  %v2967_v49 = vld [vmem:[#allocation11 + $0x38] sm:$0xff]   ;;  %p3152_p8 = pnand %p3151_p6, %p3504_p4 }
 0x31e   : > { %2673 = vmatprep.subr.bf16.mxu0 %v2958_v12  ;;  %2698 = vmatprep.subr.bf16.mxu1 %v2958_v12  ;;  %v1120_v17 = vrot.slane %v1097_v11, 1  ;;  %v1121_v46 = vrot.slane %v1099_v40, 1  ;;  %v1125_v47 = vrot.slane %v1101_v41, 1  ;;  %v3810_v31 = vrot.slane %v3806_v35, %v3680_v43  ;;  %v1232_v61 = vld [vmem:[#allocation2 + $0x8] sm:$0xf0]  ;;  %s2438_s23 = sadd.s32 %s2715_s21, %s2661_s19  ;;  %s3154_s17 = sshll.u32 %s3270_s30, 4  ;;  %s3155_s17 = int_to_ptr.vmem [resolvable:$false] %s3154_s17 }
 0x31f   : > { %v1129_v50 = vrot.slane %v1103_v24, 1  ;;  %v1133_v54 = vrot.slane %v3800_v44, 1  ;;  %v1173_v57 = vmul.f32 %v1169_v45, %v1156_v42  ;;  %v1175_v58 = vmul.f32 %v1169_v45, %v3770_v20  ;;  %v1234_v9 = vld [vmem:[#allocation2 + $0x48] sm:$0xf]  ;;  %v1308_v29 = vld [vmem:[#allocation2 + $0x8] sm:$0xe0]  ;;  %p3153_p3 = pneg %p3152_p8  ;;  %p3157_p7 = scmp.lt.s32.totalorder %s4359_s20, %s3155_s17 }
 0x320   : > { %v1122_v60 = vsel %vm1116_vm2, %v1120_v17, %v1121_v46  ;;  %v1126_v32 = vsel %vm1116_vm2, %v1121_v46, %v1125_v47  ;;  %v1177_v51 = vmul.f32 %v1169_v45, %v3772_v21  ;;  %v1179_v52 = vmul.f32 %v1169_v45, %v3777_v27  ;;  %v1310_v24 = vld [vmem:[#allocation2 + $0x48] sm:$0x1f]  ;;  %v4051_v44 = vld [vmem:[#allocation2 + $0x30] sm:$0xff]  ;;  %s2662_s5 = sshll.u32 %s2438_s23, 7 }
 0x321   : > { %2674 = vmatpush3.bf16.msra.mxu0 %v2959_v13  ;;  %2706 = vmatpush3.bf16.msra.mxu1 %v2959_v13  ;;  %v1130_v62 = vsel %vm1116_vm2, %v1125_v47, %v1129_v50  ;;  %v1134_v0 = vsel %vm1116_vm2, %v1129_v50, %v1133_v54  ;;  %v1146_v1 = vadd.f32 %v1122_v60, %v1070_v16  ;;  %v1196_v7 = vrot.slane %v1173_v57, 2  ;;  %v3848_v50 = vld [vmem:[#allocation9 + $0x6] ss:$8 sm:$0x3]  ;;  %s4357_s18 = scalar_lea.hbm %s4486_s3, %s2662_s5 }
 0x322   : > { %2675 = vmatprep.subr.bf16.mxu0 %v2960_v56  ;;  %2699 = vmatprep.subr.bf16.mxu1 %v2960_v56  ;;  %v1148_v2 = vadd.f32 %v1126_v32, %v1072_v8  ;;  %v1150_v4 = vadd.f32 %v1130_v62, %v1074_v36  ;;  %v1152_v3 = vadd.f32 %v1134_v0, %v1076_v38  ;;  %v1197_v10 = vrot.slane %v1175_v58, 2  ;;  %v3854_v32 = vld [vmem:[#allocation9 + $0x7] ss:$8 sm:$0x3] }
 0x323   : > { %v3822_v6 = vmul.f32 %v1169_v45, %v1158_v55  ;;  %v1201_v53 = vrot.slane %v1177_v51, 2  ;;  %v1205_v12 = vrot.slane %v1179_v52, 2  ;;  %v1249_v13 = vmul.f32 %v1245_v28, %v1232_v61  ;;  %v3856_v51 = vld [vmem:[#allocation9 + $0x10] ss:$8 sm:$0x3] }
 0x324   : > { %v1255_v19 = vmul.f32 %v1245_v28, %v3777_v27  ;;  %v1198_v59 = vsel %vm1192_vm3, %v1196_v7, %v1197_v10  ;;  %v1325_v45 = vmul.f32 %v3810_v31, %v1308_v29  ;;  %v1329_v46 = vmul.f32 %v3810_v31, %v3772_v21 }
 0x325   : > { %2676 = vmatpush3.bf16.msra.mxu0 %v2961_v14  ;;  %2707 = vmatpush3.bf16.msra.mxu1 %v2961_v14  ;;  %v4441_v56 = vrot.slane %v3822_v6, 2  ;;  %v1251_v14 = vmul.f32 %v1245_v28, %v3770_v20  ;;  %v1202_v63 = vsel %vm1192_vm3, %v1197_v10, %v1201_v53  ;;  %v1206_v25 = vsel %vm1192_vm3, %v1201_v53, %v1205_v12 }
 0x326   : > { %2677 = vmatprep.subr.bf16.mxu0 %v2962_v18  ;;  %2700 = vmatprep.subr.bf16.mxu1 %v2962_v18  ;;  %v1253_v18 = vmul.f32 %v1245_v28, %v3772_v21  ;;  %v1224_v16 = vadd.f32 %v1202_v63, %v1148_v2  ;;  %v1272_v8 = vrot.slane %v1249_v13, 3  ;;  %v1226_v36 = vadd.f32 %v1206_v25, %v1150_v4 }
 0x327   : > { %v1210_v30 = vsel %vm1192_vm3, %v1205_v12, %v4441_v56  ;;  %v1273_v11 = vrot.slane %v1251_v14, 3  ;;  %v1281_v41 = vrot.slane %v1255_v19, 3  ;;  %v1331_v47 = vmul.f32 %v3810_v31, %v3777_v27  ;;  %v1386_v14 = vld [vmem:[#allocation2 + $0x48] sm:$0x3f]  ;;  %v1460_v19 = vld [vmem:[#allocation2 + $0x8] sm:$0x80] }
 0x328   : > { %v1228_v38 = vadd.f32 %v1210_v30, %v1152_v3  ;;  %v1277_v40 = vrot.slane %v1253_v18, 3  ;;  %v3859_v62 = vmul.f32 %v3810_v31, %v1310_v24  ;;  %v1348_v0 = vrot.slane %v1325_v45, 4 }
 0x329   : > { %2678 = vmatpush3.bf16.msra.mxu0 %v2963_v26  ;;  %2708 = vmatpush3.bf16.msra.mxu1 %v2963_v26  ;;  %v3831_v26 = vmul.f32 %v1245_v28, %v1234_v9  ;;  %v1327_v28 = vmul.f32 %v3810_v31, %v3770_v20  ;;  %v1357_v4 = vrot.slane %v1331_v47, 4  ;;  %v1473_v9 = vrot.slane %v3848_v50, %v3680_v43 }
 0x32a   : > { %2679 = vmatprep.subr.bf16.mxu0 %v2964_v34  ;;  %2701 = vmatprep.subr.bf16.mxu1 %v2964_v34  ;;  %v1222_v34 = vadd.f32 %v1198_v59, %v1146_v1  ;;  %v1278_v17 = vsel %vm1268_vm4, %v1273_v11, %v1277_v40  ;;  %v1282_v55 = vsel %vm1268_vm4, %v1277_v40, %v1281_v41  ;;  %v1384_v1 = vld [vmem:[#allocation2 + $0x8] sm:$0xc0]  ;;  %v4436_v7 = vrot.slane %v3859_v62, 4 }
 0x32b   : > { %v4437_v42 = vrot.slane %v3831_v26, 3  ;;  %v1300_v60 = vadd.f32 %v1278_v17, %v1224_v16  ;;  %v1302_v52 = vadd.f32 %v1282_v55, %v1226_v36  ;;  %v1349_v2 = vrot.slane %v1327_v28, 4  ;;  %v1462_v36 = vld [vmem:[#allocation2 + $0x48] sm:$0x7f] }
 0x32c   : > { %v1547_v10 = vrot.slane %v3854_v32, %v3680_v43  ;;  %v3870_v31 = vrot.slane %v3856_v51, %v3680_v43  ;;  %v1362_v59 = vsel %vm1344_vm5, %v1357_v4, %v4436_v7  ;;  %v1477_v40 = vmul.f32 %v1473_v9, %v1460_v19 }
 0x32d   : > { %2680 = vmatpush3.bf16.msra.mxu0 %v2965_v39  ;;  %2709 = vmatpush3.bf16.msra.mxu1 %v2965_v39  ;;  %v1274_v39 = vsel %vm1268_vm4, %v1272_v8, %v1273_v11  ;;  %v1286_v57 = vsel %vm1268_vm4, %v1281_v41, %v4437_v42  ;;  %v1350_v53 = vsel %vm1344_vm5, %v1348_v0, %v1349_v2 }
 0x32e   : > { %2681 = vmatprep.subr.bf16.mxu0 %v2966_v48  ;;  %2702 = vmatprep.subr.bf16.mxu1 %v2966_v48  ;;  %v3846_v48 = vld [vmem:[#allocation9 + $0x5] ss:$8 sm:$0x3]  ;;  %v1298_v58 = vadd.f32 %v1274_v39, %v1222_v34  ;;  %v1304_v61 = vadd.f32 %v1286_v57, %v1228_v38  ;;  %v1479_v41 = vmul.f32 %v1473_v9, %v3770_v20  ;;  %v1500_v55 = vrot.slane %v1477_v40, 6 }
 0x32f   : > { %v1397_v3 = vrot.slane %v3846_v48, %v3680_v43  ;;  %v1481_v39 = vmul.f32 %v1473_v9, %v3772_v21  ;;  %v3887_v47 = vmul.f32 %v1473_v9, %v1462_v36 }
 0x330   : > { %v1374_v63 = vadd.f32 %v1350_v53, %v1298_v58  ;;  %v1380_v30 = vadd.f32 %v1362_v59, %v1304_v61 }
 0x331   : > { %2682 = vmatpush3.bf16.msra.mxu0 %v2967_v49  ;;  %2710 = vmatpush3.bf16.msra.mxu1 %v2967_v49  ;;  %v1353_v49 = vrot.slane %v1329_v46, 4  ;;  %v1401_v18 = vmul.f32 %v1397_v3, %v1384_v1  ;;  %v1403_v34 = vmul.f32 %v1397_v3, %v3770_v20  ;;  %v1405_v16 = vmul.f32 %v1397_v3, %v3772_v21 }
 0x332   : > { %v1407_v8 = vmul.f32 %v1397_v3, %v3777_v27  ;;  %v3881_v38 = vmul.f32 %v1397_v3, %v1386_v14  ;;  %v1483_v46 = vmul.f32 %v1473_v9, %v3777_v27  ;;  %v1505_v9 = vrot.slane %v1481_v39, 6 }
 0x333   : > { %v1354_v12 = vsel %vm1344_vm5, %v1349_v2, %v1353_v49  ;;  %v1358_v13 = vsel %vm1344_vm5, %v1353_v49, %v1357_v4  ;;  %v1424_v11 = vrot.slane %v1401_v18, 5  ;;  %v1425_v24 = vrot.slane %v1403_v34, 5  ;;  %v3895_v49 = vld [vmem:[#allocation2 + $0x48] sm:$0xff] }
 0x334   : > { %v1376_v25 = vadd.f32 %v1354_v12, %v1300_v60  ;;  %v1378_v29 = vadd.f32 %v1358_v13, %v1302_v52  ;;  %v1429_v45 = vrot.slane %v1405_v16, 5  ;;  %v1433_v28 = vrot.slane %v1407_v8, 5 }
 0x335   : > { %v4435_v17 = vrot.slane %v3881_v38, 5  ;;  %v1426_v57 = vsel %vm1420_vm6, %v1424_v11, %v1425_v24  ;;  %v1501_v52 = vrot.slane %v1479_v41, 6  ;;  %v1509_v53 = vrot.slane %v1483_v46, 6  ;;  %v3920_v46 = vld [vmem:[#allocation9 + $0x13] ss:$8 sm:$0x3] }
 0x336   : > { %v1430_v58 = vsel %vm1420_vm6, %v1425_v24, %v1429_v45  ;;  %v1434_v60 = vsel %vm1420_vm6, %v1429_v45, %v1433_v28  ;;  %v1450_v0 = vadd.f32 %v1426_v57, %v1374_v63  ;;  %v4434_v12 = vrot.slane %v3887_v47, 6  ;;  %v3913_v24 = vld [vmem:[#allocation9 + $0x12] ss:$8 sm:$0x3] }
 0x337   : > { %v1438_v61 = vsel %vm1420_vm6, %v1433_v28, %v4435_v17  ;;  %v1452_v1 = vadd.f32 %v1430_v58, %v1376_v25  ;;  %v1454_v2 = vadd.f32 %v1434_v60, %v1378_v29  ;;  %v1502_v3 = vsel %vm1496_vm7, %v1500_v55, %v1501_v52  ;;  %v1602_v29 = vld [vmem:[#allocation2 + $0x18] sm:$0xfe] }
 0x338   : > { %v1456_v4 = vadd.f32 %v1438_v61, %v1380_v30  ;;  %v1526_v13 = vadd.f32 %v1502_v3, %v1450_v0  ;;  %v1551_v14 = vmul.f32 %v1547_v10, %v3770_v20  ;;  %v1553_v18 = vmul.f32 %v1547_v10, %v3772_v21  ;;  %v3910_v20 = vld [vmem:[#allocation9 + $0x11] ss:$8 sm:$0x3]  ;;  %v3922_v55 = vld [vmem:[#allocation9 + $0x14] ss:$8 sm:$0x3] }
 0x339   : > { %v1506_v19 = vsel %vm1496_vm7, %v1501_v52, %v1505_v9  ;;  %v1510_v59 = vsel %vm1496_vm7, %v1505_v9, %v1509_v53  ;;  %v1555_v63 = vmul.f32 %v1547_v10, %v3777_v27  ;;  %v3905_v25 = vmul.f32 %v1547_v10, %v3895_v49  ;;  %v3931_v61 = vld [vmem:[#allocation9 + $0x15] ss:$8 sm:$0x3]  ;;  %v1647_v9 = vld [vmem:[#allocation2 + $0x58] sm:$0x3] }
 0x33a   : > { %v1514_v30 = vsel %vm1496_vm7, %v1509_v53, %v4434_v12  ;;  %v1528_v34 = vadd.f32 %v1506_v19, %v1452_v1  ;;  %v1530_v16 = vadd.f32 %v1510_v59, %v1454_v2  ;;  %v1568_v8 = vrot.slane %v1551_v14, 7  ;;  %v1645_v3 = vld [vmem:[#allocation2 + $0x18] sm:$0xfc] }
 0x33b   : > { %v1532_v36 = vadd.f32 %v1514_v30, %v1456_v4  ;;  %v1571_v11 = vrot.slane %v1553_v18, 7  ;;  %v1575_v40 = vrot.slane %v1555_v63, 7  ;;  %v4433_v41 = vrot.slane %v3905_v25, 7  ;;  %v1797_v17 = vld [vmem:[#allocation2 + $0x58] sm:$0xf] }
 0x33c   : > { %v1592_v45 = vadd.f32 %v1568_v8, %v1526_v13  ;;  %v1625_v10 = vmul.f32 %v3870_v31, %v1602_v29  ;;  %v1627_v28 = vmul.f32 %v3870_v31, %v3772_v21  ;;  %v1629_v39 = vmul.f32 %v3870_v31, %v3777_v27  ;;  %v1720_v13 = vld [vmem:[#allocation2 + $0x18] sm:$0xf8] }
 0x33d   : > { %v1572_v57 = vsel %vm1566_vm8, %v1568_v8, %v1571_v11  ;;  %v1576_v58 = vsel %vm1566_vm8, %v1571_v11, %v1575_v40  ;;  %v1580_v60 = vsel %vm1566_vm8, %v1575_v40, %v4433_v41  ;;  %v1631_v52 = vmul.f32 %v3870_v31, %v3895_v49  ;;  %v1722_v11 = vld [vmem:[#allocation2 + $0x58] sm:$0x7]  ;;  %v1795_v41 = vld [vmem:[#allocation2 + $0x18] sm:$0xf0] }
 0x33e   : > { %v1594_v0 = vadd.f32 %v1572_v57, %v1528_v34  ;;  %v1596_v1 = vadd.f32 %v1576_v58, %v1530_v16  ;;  %v1598_v2 = vadd.f32 %v1580_v60, %v1532_v36  ;;  %v1635_v4 = vadd.f32 %v1625_v10, %v1592_v45 }
 0x33f   : > { %v1658_v53 = vrot.slane %v3910_v20, %v3680_v43  ;;  %v1733_v14 = vrot.slane %v3913_v24, %v3680_v43  ;;  %v1808_v18 = vrot.slane %v3920_v46, %v3680_v43  ;;  %v3941_v19 = vrot.slane %v3922_v55, %v3680_v43 }
 0x340   : > { %v1637_v59 = vadd.f32 %v1627_v28, %v1594_v0  ;;  %v1639_v63 = vadd.f32 %v1629_v39, %v1596_v1  ;;  %v1641_v29 = vadd.f32 %v1631_v52, %v1598_v2  ;;  %v3945_v30 = vrot.slane %v3931_v61, %v3680_v43 }
 0x341   : > { %v1662_v34 = vmul.f32 %v1658_v53, %v1645_v3  ;;  %v1664_v16 = vmul.f32 %v1658_v53, %v3772_v21  ;;  %v1666_v8 = vmul.f32 %v1658_v53, %v3777_v27  ;;  %v1668_v36 = vmul.f32 %v1658_v53, %v3895_v49 }
 0x342   : > { %v3950_v40 = vmul.f32 %v1658_v53, %v1647_v9  ;;  %v1737_v45 = vmul.f32 %v1733_v14, %v1720_v13  ;;  %v1739_v10 = vmul.f32 %v1733_v14, %v3772_v21  ;;  %v1741_v28 = vmul.f32 %v1733_v14, %v3777_v27 }
 0x343   : > { %v1684_v39 = vrot.slane %v1662_v34, 1  ;;  %v1685_v57 = vrot.slane %v1664_v16, 1  ;;  %v1689_v58 = vrot.slane %v1666_v8, 1  ;;  %v1693_v60 = vrot.slane %v1668_v36, 1 }
 0x344   : > { %v4439_v52 = vrot.slane %v3950_v40, 1  ;;  %v1743_v0 = vmul.f32 %v1733_v14, %v3895_v49  ;;  %v3956_v1 = vmul.f32 %v1733_v14, %v1722_v11  ;;  %v1759_v2 = vrot.slane %v1737_v45, 2 }
 0x345   : > { %v1686_v3 = vsel %vm1116_vm2, %v1684_v39, %v1685_v57  ;;  %v1690_v9 = vsel %vm1116_vm2, %v1685_v57, %v1689_v58  ;;  %v1694_v53 = vsel %vm1116_vm2, %v1689_v58, %v1693_v60  ;;  %v1760_v13 = vrot.slane %v1739_v10, 2 }
 0x346   : > { %v1698_v34 = vsel %vm1116_vm2, %v1693_v60, %v4439_v52  ;;  %v1710_v16 = vadd.f32 %v1686_v3, %v1635_v4  ;;  %v1712_v8 = vadd.f32 %v1690_v9, %v1637_v59  ;;  %v1714_v36 = vadd.f32 %v1694_v53, %v1639_v63  ;;  %v1870_v63 = vld [vmem:[#allocation2 + $0x18] sm:$0xe0] }
 0x347   : > { %v1716_v12 = vadd.f32 %v1698_v34, %v1641_v29  ;;  %v1761_v14 = vsel %vm1192_vm3, %v1759_v2, %v1760_v13  ;;  %v1764_v11 = vrot.slane %v1741_v28, 2  ;;  %v1768_v45 = vrot.slane %v1743_v0, 2  ;;  %v1872_v34 = vld [vmem:[#allocation2 + $0x58] sm:$0x1f] }
 0x348   : > { %v4438_v39 = vrot.slane %v3956_v1, 2  ;;  %v1785_v57 = vadd.f32 %v1761_v14, %v1710_v16  ;;  %v1812_v7 = vmul.f32 %v1808_v18, %v1795_v41  ;;  %v1814_v10 = vmul.f32 %v1808_v18, %v3772_v21 }
 0x349   : > { %v1765_v58 = vsel %vm1192_vm3, %v1760_v13, %v1764_v11  ;;  %v1769_v42 = vsel %vm1192_vm3, %v1764_v11, %v1768_v45  ;;  %v1816_v4 = vmul.f32 %v1808_v18, %v3777_v27  ;;  %v1818_v59 = vmul.f32 %v1808_v18, %v3895_v49 }
 0x34a   : > { %v1773_v29 = vsel %vm1192_vm3, %v1768_v45, %v4438_v39  ;;  %v1787_v28 = vadd.f32 %v1765_v58, %v1712_v8  ;;  %v1789_v60 = vadd.f32 %v1769_v42, %v1714_v36  ;;  %v3974_v0 = vmul.f32 %v1808_v18, %v1797_v17  ;;  %v1945_v17 = vld [vmem:[#allocation2 + $0x18] sm:$0xc0] }
 0x34b   : > { %v1791_v41 = vadd.f32 %v1773_v29, %v1716_v12  ;;  %v1834_v2 = vrot.slane %v1812_v7, 3  ;;  %v1835_v3 = vrot.slane %v1814_v10, 3  ;;  %v1839_v9 = vrot.slane %v1816_v4, 3 }
 0x34c   : > { %v1843_v53 = vrot.slane %v1818_v59, 3  ;;  %v4440_v13 = vrot.slane %v3974_v0, 3  ;;  %v1887_v16 = vmul.f32 %v3941_v19, %v1870_v63  ;;  %v1889_v14 = vmul.f32 %v3941_v19, %v3772_v21  ;;  %v1947_v63 = vld [vmem:[#allocation2 + $0x58] sm:$0x3f] }
 0x34d   : > { %v1836_v11 = vsel %vm1268_vm4, %v1834_v2, %v1835_v3  ;;  %v1840_v8 = vsel %vm1268_vm4, %v1835_v3, %v1839_v9  ;;  %v1891_v42 = vmul.f32 %v3941_v19, %v3777_v27  ;;  %v1893_v7 = vmul.f32 %v3941_v19, %v3895_v49 }
 0x34e   : > { %v1844_v12 = vsel %vm1268_vm4, %v1839_v9, %v1843_v53  ;;  %v1848_v18 = vsel %vm1268_vm4, %v1843_v53, %v4440_v13  ;;  %v1860_v36 = vadd.f32 %v1836_v11, %v1785_v57  ;;  %v1862_v45 = vadd.f32 %v1840_v8, %v1787_v28 }
 0x34f   : > { %v1864_v10 = vadd.f32 %v1844_v12, %v1789_v60  ;;  %v1866_v58 = vadd.f32 %v1848_v18, %v1791_v41  ;;  %v3991_v4 = vmul.f32 %v3941_v19, %v1872_v34  ;;  %v1909_v59 = vrot.slane %v1887_v16, 4  ;;  %v4007_v34 = vld [vmem:[#allocation9 + $0x16] ss:$8 sm:$0x3] }
 0x350   : > { %v1910_v29 = vrot.slane %v1889_v14, 4  ;;  %v1914_v2 = vrot.slane %v1891_v42, 4  ;;  %v1918_v3 = vrot.slane %v1893_v7, 4  ;;  %v1962_v39 = vmul.f32 %v3945_v30, %v1945_v17  ;;  %v4012_v16 = vld [vmem:[%s4473_s6] sm:$0x3]  ;;  %s3156_s6 = scalar_lea.vmem %s3155_s17, 1024 }
 0x351   : > { %v1922_v9 = vrot.slane %v3991_v4, 4  ;;  %v1964_v52 = vmul.f32 %v3945_v30, %v3772_v21  ;;  %v1966_v57 = vmul.f32 %v3945_v30, %v3777_v27  ;;  %v1968_v28 = vmul.f32 %v3945_v30, %v3895_v49  ;;  %v1056_v7 = vld [vmem:[#allocation2 + $0x48] sm:$0x1]  ;;  %v1610_v17 = vld [vmem:[#allocation2 + $0x58] sm:$0x1]  ;;  %p3158_p12 = scmp.lt.s32.totalorder %s3156_s6, %s3150_s25 }
 0x352   : > { %v1911_v19 = vsel %vm1344_vm5, %v1909_v59, %v1910_v29  ;;  %v1915_v60 = vsel %vm1344_vm5, %v1910_v29, %v1914_v2  ;;  %v1919_v41 = vsel %vm1344_vm5, %v1914_v2, %v1918_v3  ;;  %v4005_v53 = vmul.f32 %v3945_v30, %v1947_v63  ;;  %v2020_v2 = vld [vmem:[#allocation2 + $0x18] sm:$0x80] }
 0x353   : > { %v1923_v14 = vsel %vm1344_vm5, %v1918_v3, %v1922_v9  ;;  %v1935_v11 = vadd.f32 %v1911_v19, %v1860_v36  ;;  %v1937_v8 = vadd.f32 %v1915_v60, %v1862_v45  ;;  %v1939_v42 = vadd.f32 %v1919_v41, %v1864_v10  ;;  %v2022_v10 = vld [vmem:[#allocation2 + $0x58] sm:$0x7f]  ;;  %p3159_p11 = por %p3158_p12, %p3157_p7 }
 0x354   : > { %v1941_v12 = vadd.f32 %v1923_v14, %v1866_v58  ;;  %v1984_v18 = vrot.slane %v1962_v39, 5  ;;  %v1985_v30 = vrot.slane %v1964_v52, 5  ;;  %v1989_v59 = vrot.slane %v1966_v57, 5 }
 0x355   : > { %v1993_v63 = vrot.slane %v1968_v28, 5  ;;  %v1997_v29 = vrot.slane %v4005_v53, 5  ;;  %v2033_v13 = vrot.slane %v4007_v34, %v3680_v43  ;;  %v4022_v56 = vrot.slane %v4012_v16, %v3680_v43  ;;  %v1047_v43 = vld [vmem:[#allocation2] sm:$0xfe]  ;;  %p3160_p13 = pnand %p3159_p11, %p3153_p3 }
 0x356   : > { %v1986_v36 = vsel %vm1420_vm6, %v1984_v18, %v1985_v30  ;;  %v1990_v45 = vsel %vm1420_vm6, %v1985_v30, %v1989_v59  ;;  %v1078_v39 = vmul.f32 %v3775_v22, %v1056_v7  ;;  %v4028_v52 = vmul.f32 %v3870_v31, %v1610_v17  ;;  %v4041_v17 = vld [vmem:[#allocation2 + $0x10] sm:$0xff]  ;;  %v1079_v30 = vld [vmem:[#allocation2] sm:$0xfc] }
 0x357   : > { %v1994_v58 = vsel %vm1420_vm6, %v1989_v59, %v1993_v63  ;;  %v1998_v3 = vsel %vm1420_vm6, %v1993_v63, %v1997_v29  ;;  %v2010_v57 = vadd.f32 %v1986_v36, %v1935_v11  ;;  %v2012_v28 = vadd.f32 %v1990_v45, %v1937_v8  ;;  %v4049_v63 = vld [vmem:[#allocation2 + $0x20] sm:$0xff] }
 0x358   : > { %v2014_v19 = vadd.f32 %v1994_v58, %v1939_v42  ;;  %v2016_v60 = vadd.f32 %v1998_v3, %v1941_v12  ;;  %v2037_v41 = vmul.f32 %v2033_v13, %v2020_v2  ;;  %v2039_v14 = vmul.f32 %v2033_v13, %v3772_v21 }
 0x359   : > { %v2041_v18 = vmul.f32 %v2033_v13, %v3777_v27  ;;  %v2043_v22 = vmul.f32 %v2033_v13, %v3895_v49  ;;  %v4037_v31 = vmul.f32 %v2033_v13, %v2022_v10  ;;  %v1154_v7 = vadd.f32 %v1133_v54, %v1078_v39 }
 0x35a   : > { %v2059_v11 = vrot.slane %v2037_v41, 6  ;;  %v2060_v8 = vrot.slane %v2039_v14, 6  ;;  %v1069_v42 = vmul.f32 %v3781_v33, %v1047_v43  ;;  %v1071_v12 = vmul.f32 %v3781_v33, %v4041_v17 }
 0x35b   : > { %v2064_v21 = vrot.slane %v2041_v18, 6  ;;  %v2068_v59 = vrot.slane %v2043_v22, 6  ;;  %v2072_v27 = vrot.slane %v4037_v31, 6  ;;  %v4474_v49 = vrot.slane %v3822_v6, 2  ;;  %v1081_v22 = vld [vmem:[#allocation2 + $0x40] sm:$0x3] }
 0x35c   : > { %v2061_v54 = vsel %vm1496_vm7, %v2059_v11, %v2060_v8  ;;  %v1073_v2 = vmul.f32 %v3781_v33, %v4049_v63  ;;  %v1075_v36 = vmul.f32 %v3781_v33, %v4051_v44  ;;  %v1096_v45 = vmul.f32 %v3784_v5, %v1079_v30 }
 0x35d   : > { %v1230_v13 = vadd.f32 %v4474_v49, %v1154_v7  ;;  %v2065_v10 = vsel %vm1496_vm7, %v2060_v8, %v2064_v21  ;;  %v2069_v39 = vsel %vm1496_vm7, %v2064_v21, %v2068_v59  ;;  %v2073_v6 = vsel %vm1496_vm7, %v2068_v59, %v2072_v27 }
 0x35e   : > { %v2085_v58 = vadd.f32 %v2061_v54, %v2010_v57  ;;  %v2087_v3 = vadd.f32 %v2065_v10, %v2012_v28  ;;  %v2089_v43 = vadd.f32 %v2069_v39, %v2014_v19  ;;  %v2091_v41 = vadd.f32 %v2073_v6, %v2016_v60 }
 0x35f   : > { %v4475_v14 = vrot.slane %v3831_v26, 3  ;;  %v1098_v30 = vmul.f32 %v3784_v5, %v4041_v17  ;;  %v1100_v11 = vmul.f32 %v3784_v5, %v4049_v63  ;;  %v1102_v8 = vmul.f32 %v3784_v5, %v4051_v44 }
 0x360   : > { %v4067_v7 = vadd.f32 %v4022_v56, %v2085_v58  ;;  %v4076_v57 = vadd.f32 %v4022_v56, %v2087_v3  ;;  %v4079_v28 = vadd.f32 %v4022_v56, %v2089_v43  ;;  %v4082_v26 = vadd.f32 %v4022_v56, %v2091_v41 }
 0x361   : > { %v1306_v18 = vadd.f32 %v4475_v14, %v1230_v13  ;;  %v4476_v19 = vrot.slane %v3859_v62, 4  ;;  %v4088_v59 = vmul.f32 %v3784_v5, %v1081_v22  ;;  %v1117_v49 = vrot.slane %v1096_v45, 1 }
 0x362   : > { %v2634_v21 = vmul.f32 -1.442695, %v4067_v7  ;;  %v1118_v13 = vrot.slane %v1098_v30, 1  ;;  %v2636_v54 = vmul.f32 -1.442695, %v4076_v57  ;;  %v4477_v6 = vrot.slane %v3881_v38, 5 }
 0x363   : > { %v1382_v60 = vadd.f32 %v4476_v19, %v1306_v18  ;;  %v2638_v10 = vmul.f32 -1.442695, %v4079_v28  ;;  %v2640_v39 = vmul.f32 -1.442695, %v4082_v26  ;;  %v1123_v3 = vrot.slane %v1100_v11, 1 }
 0x364   : > { %2968 = vpow2.f32 %v2634_v21  ;;  %v1119_v62 = vsel %vm1116_vm2, %v1117_v49, %v1118_v13  ;;  %v1127_v43 = vrot.slane %v1102_v8, 1  ;;  %v4478_v5 = vrot.slane %v3887_v47, 6  ;;  %v1155_v18 = vld [vmem:[#allocation2] sm:$0xf8]  ;;  %v1157_v38 = vld [vmem:[#allocation2 + $0x40] sm:$0x7] }
 0x365   : > { %v1458_v58 = vadd.f32 %v4477_v6, %v1382_v60  ;;  %2970 = vpow2.f32 %v2636_v54  ;;  %v1131_v45 = vrot.slane %v4088_v59, 1  ;;  %v1145_v14 = vadd.f32 %v1119_v62, %v1069_v42 }
 0x366   : > { %2972 = vpow2.f32 %v2638_v10  ;;  %v1124_v22 = vsel %vm1116_vm2, %v1118_v13, %v1123_v3  ;;  %v1128_v30 = vsel %vm1116_vm2, %v1123_v3, %v1127_v43  ;;  %v1165_v19 = vrot.slane %v3791_v37, %v3675_v23 }
 0x367   : > { %v1534_v41 = vadd.f32 %v4478_v5, %v1458_v58  ;;  %2974 = vpow2.f32 %v2640_v39  ;;  %v4479_v11 = vrot.slane %v3905_v25, 7  ;;  %v1132_v47 = vsel %vm1116_vm2, %v1127_v43, %v1131_v45  ;;  %v1231_v25 = vld [vmem:[#allocation2] sm:$0xf0] }
 0x368   : > { %v1147_v60 = vadd.f32 %v1124_v22, %v1071_v12  ;;  %v1149_v42 = vadd.f32 %v1128_v30, %v1073_v2  ;;  %v1151_v21 = vadd.f32 %v1132_v47, %v1075_v36  ;;  %v1172_v49 = vmul.f32 %v1165_v19, %v1155_v18 }
 0x369   : > { %v1600_v8 = vadd.f32 %v4479_v11, %v1534_v41  ;;  %v1174_v13 = vmul.f32 %v1165_v19, %v4041_v17  ;;  %v1176_v10 = vmul.f32 %v1165_v19, %v4049_v63  ;;  %v1178_v37 = vmul.f32 %v1165_v19, %v4051_v44  ;;  %v1233_v41 = vld [vmem:[#allocation2 + $0x40] sm:$0xf] }
 0x36a   : > { %v4112_v39 = vmul.f32 %v1165_v19, %v1157_v38  ;;  %v1193_v6 = vrot.slane %v1172_v49, 2  ;;  %v1241_v62 = vrot.slane %v3797_v15, %v3675_v23  ;;  %v1317_v12 = vrot.slane %v3806_v35, %v3675_v23 }
 0x36b   : > { %v1643_v54 = vadd.f32 %v4028_v52, %v1600_v8  ;;  %v1194_v58 = vrot.slane %v1174_v13, 2  ;;  %v4480_v2 = vrot.slane %v3950_v40, 1  ;;  %v1199_v3 = vrot.slane %v1176_v10, 2 }
 0x36c   : > { %v1203_v52 = vrot.slane %v1178_v37, 2  ;;  %v4442_v43 = vrot.slane %v4112_v39, 2  ;;  %v1248_v18 = vmul.f32 %v1241_v62, %v1231_v25  ;;  %v1250_v22 = vmul.f32 %v1241_v62, %v4041_v17 }
 0x36d   : > { %v1718_v36 = vadd.f32 %v4480_v2, %v1643_v54  ;;  %v1195_v5 = vsel %vm1192_vm3, %v1193_v6, %v1194_v58  ;;  %v1252_v30 = vmul.f32 %v1241_v62, %v4049_v63  ;;  %v4481_v15 = vrot.slane %v3956_v1, 2 }
 0x36e   : > { %v1200_v35 = vsel %vm1192_vm3, %v1194_v58, %v1199_v3  ;;  %v1204_v40 = vsel %vm1192_vm3, %v1199_v3, %v1203_v52  ;;  %v1208_v19 = vsel %vm1192_vm3, %v1203_v52, %v4442_v43  ;;  %v2969_v11 = vpop.eup %2968  ;;  %v1221_v8 = vadd.f32 %v1195_v5, %v1145_v14 }
 0x36f   : > { %v1793_v38 = vadd.f32 %v4481_v15, %v1718_v36  ;;  %v1223_v47 = vadd.f32 %v1200_v35, %v1147_v60  ;;  %v1225_v49 = vadd.f32 %v1204_v40, %v1149_v42  ;;  %v1227_v13 = vadd.f32 %v1208_v19, %v1151_v21  ;;  %v2971_v54 = vpop.eup %2970 }
 0x370   : > { %v2147_v10 = vadd.f32 1.0, %v2969_v11  ;;  %v4482_v37 = vrot.slane %v3974_v0, 3  ;;  %v1254_v1 = vmul.f32 %v1241_v62, %v4051_v44  ;;  %v4134_v6 = vmul.f32 %v1241_v62, %v1233_v41  ;;  %v2973_v58 = vpop.eup %2972  ;;  %v1307_v62 = vld [vmem:[#allocation2] sm:$0xe0] }
 0x371   : > { %v2149_v2 = vadd.f32 1.0, %v2971_v54  ;;  %v1269_v36 = vrot.slane %v1248_v18, 3  ;;  %v1270_v3 = vrot.slane %v1250_v22, 3  ;;  %v1275_v15 = vrot.slane %v1252_v30, 3  ;;  %v2975_v52 = vpop.eup %2974  ;;  %v1309_v22 = vld [vmem:[#allocation2 + $0x40] sm:$0x1f] }
 0x372   : > { %v1868_v25 = vadd.f32 %v4482_v37, %v1793_v38  ;;  %v2151_v43 = vadd.f32 1.0, %v2973_v58  ;;  %2976 = vrcp.f32 %v2147_v10  ;;  %v1279_v60 = vrot.slane %v1254_v1, 3  ;;  %v1385_v1 = vld [vmem:[#allocation2 + $0x40] sm:$0x3f] }
 0x373   : > { %v2153_v42 = vadd.f32 1.0, %v2975_v52  ;;  %2978 = vrcp.f32 %v2149_v2  ;;  %v1271_v0 = vsel %vm1268_vm4, %v1269_v36, %v1270_v3  ;;  %v1276_v21 = vsel %vm1268_vm4, %v1270_v3, %v1275_v15 }
 0x374   : > { %v1943_v14 = vadd.f32 %v1922_v9, %v1868_v25  ;;  %2980 = vrcp.f32 %v2151_v43  ;;  %v1280_v41 = vsel %vm1268_vm4, %v1275_v15, %v1279_v60  ;;  %v1283_v18 = vrot.slane %v4134_v6, 3  ;;  %v1459_v15 = vld [vmem:[#allocation2] sm:$0x80] }
 0x375   : > { %2982 = vrcp.f32 %v2153_v42  ;;  %v1297_v4 = vadd.f32 %v1271_v0, %v1221_v8  ;;  %v1299_v9 = vadd.f32 %v1276_v21, %v1223_v47  ;;  %v1301_v30 = vadd.f32 %v1280_v41, %v1225_v49  ;;  %v1383_v8 = vld [vmem:[#allocation2] sm:$0xc0] }
 0x376   : > { %v2018_v5 = vadd.f32 %v1997_v29, %v1943_v14  ;;  %v1284_v35 = vsel %vm1268_vm4, %v1279_v60, %v1283_v18  ;;  %v1324_v43 = vmul.f32 %v1317_v12, %v1307_v62  ;;  %v1326_v53 = vmul.f32 %v1317_v12, %v4041_v17 }
 0x377   : > { %v1303_v29 = vadd.f32 %v1284_v35, %v1227_v13  ;;  %v1328_v40 = vmul.f32 %v1317_v12, %v4049_v63  ;;  %v1330_v19 = vmul.f32 %v1317_v12, %v4051_v44  ;;  %v4152_v11 = vmul.f32 %v1317_v12, %v1309_v22 }
 0x378   : > { %v2093_v38 = vadd.f32 %v2072_v27, %v2018_v5  ;;  %v1345_v31 = vrot.slane %v1324_v43, 4  ;;  %v1346_v27 = vrot.slane %v1326_v53, 4  ;;  %v1393_v49 = vrot.slane %v3846_v48, %v3675_v23 }
 0x379   : > { %v1351_v54 = vrot.slane %v1328_v40, 4  ;;  %v1355_v10 = vrot.slane %v1330_v19, 4  ;;  %v1359_v37 = vrot.slane %v4152_v11, 4  ;;  %v1469_v13 = vrot.slane %v3848_v50, %v3675_v23 }
 0x37a   : > { %v4155_v47 = vadd.f32 %v4022_v56, %v2093_v38  ;;  %v1347_v12 = vsel %vm1344_vm5, %v1345_v31, %v1346_v27  ;;  %v1400_v58 = vmul.f32 %v1393_v49, %v1383_v8  ;;  %v1402_v56 = vmul.f32 %v1393_v49, %v4041_v17 }
 0x37b   : > { %v1352_v2 = vsel %vm1344_vm5, %v1346_v27, %v1351_v54  ;;  %v1356_v36 = vsel %vm1344_vm5, %v1351_v54, %v1355_v10  ;;  %v1360_v48 = vsel %vm1344_vm5, %v1355_v10, %v1359_v37  ;;  %v1373_v3 = vadd.f32 %v1347_v12, %v1297_v4 }
 0x37c   : > { %v2642_v25 = vmul.f32 -1.442695, %v4155_v47  ;;  %v2977_v52 = vpop.eup %2976  ;;  %v1375_v50 = vadd.f32 %v1352_v2, %v1299_v9  ;;  %v1377_v14 = vadd.f32 %v1356_v36, %v1301_v30  ;;  %v1379_v60 = vadd.f32 %v1360_v48, %v1303_v29 }
 0x37d   : > { %v2979_v42 = vpop.eup %2978  ;;  %v2177_v0 = vmul.f32 %v2977_v52, %v4067_v7  ;;  %v1404_v21 = vmul.f32 %v1393_v49, %v4049_v63  ;;  %v1406_v62 = vmul.f32 %v1393_v49, %v4051_v44  ;;  %v4173_v5 = vmul.f32 %v1393_v49, %v1385_v1  ;;  %v1461_v49 = vld [vmem:[#allocation2 + $0x40] sm:$0x7f] }
 0x37e   : > { %2984 = vpow2.f32 %v2642_v25  ;;  %v2981_v41 = vpop.eup %2980  ;;  %v2179_v22 = vmul.f32 %v2979_v42, %v4076_v57  ;;  %v1421_v4 = vrot.slane %v1400_v58, 5  ;;  %v1422_v38 = vrot.slane %v1402_v56, 5 }
 0x37f   : > { %v1476_v35 = vmul.f32 %v1469_v13, %v1459_v15  ;;  %v2983_v43 = vpop.eup %2982  ;;  %v2181_v9 = vmul.f32 %v2981_v41, %v4079_v28  ;;  %v1427_v30 = vrot.slane %v1404_v21, 5  ;;  %v1431_v53 = vrot.slane %v1406_v62, 5 }
 0x380   : > { %v1435_v7 = vrot.slane %v4173_v5, 5  ;;  %v2183_v29 = vmul.f32 %v2983_v43, %v4082_v26  ;;  %v2187_v40 = vpack.c.bf16 %v2179_v22, %v2177_v0  ;;  %v1423_v19 = vsel %vm1420_vm6, %v1421_v4, %v1422_v38 }
 0x381   : > { %v1478_v8 = vmul.f32 %v1469_v13, %v4041_v17  ;;  %v1428_v31 = vsel %vm1420_vm6, %v1422_v38, %v1427_v30  ;;  %v1432_v57 = vsel %vm1420_vm6, %v1427_v30, %v1431_v53  ;;  %v1449_v28 = vadd.f32 %v1423_v19, %v1373_v3  ;;  %v4196_v38 = vld [vmem:[#allocation2 + $0x40] sm:$0xff] }
 0x382   : > { %v1436_v27 = vsel %vm1420_vm6, %v1431_v53, %v1435_v7  ;;  %v2189_v54 = vpack.c.bf16 %v2183_v29, %v2181_v9  ;;  %v2245_v10 = vshrl.u32 %v2187_v40, 16  ;;  %v2247_v25 = vshll.u32 %v2187_v40, 16 }
 0x383   : > { %v1451_v12 = vadd.f32 %v1428_v31, %v1375_v50  ;;  %v1453_v26 = vadd.f32 %v1432_v57, %v1377_v14  ;;  %v1455_v1 = vadd.f32 %v1436_v27, %v1379_v60  ;;  %v1480_v58 = vmul.f32 %v1469_v13, %v4049_v63  ;;  %v1601_v57 = vld [vmem:[#allocation2 + $0x10] sm:$0xfe] }
 0x384   : > { %v1482_v56 = vmul.f32 %v1469_v13, %v4051_v44  ;;  %v2249_v2 = vrot.slane %v2247_v25, 1  ;;  %v2252_v36 = vshll.u32 %v2189_v54, 16  ;;  %v2264_v48 = vshrl.u32 %v2189_v54, 16 }
 0x385   : > { %v4188_v15 = vmul.f32 %v1469_v13, %v1461_v49  ;;  %v1497_v52 = vrot.slane %v1476_v35, 6  ;;  %v1498_v42 = vrot.slane %v1478_v8, 6  ;;  %v1503_v0 = vrot.slane %v1480_v58, 6 }
 0x386   : > { %v1507_v3 = vrot.slane %v1482_v56, 6  ;;  %v2250_v62 = vor.u32 %v2249_v2, %v2245_v10  ;;  %v2254_v41 = vrot.slane %v2252_v36, 1  ;;  %v1543_v14 = vrot.slane %v3854_v32, %v3675_v23  ;;  %v1646_v36 = vld [vmem:[#allocation2 + $0x50] sm:$0x3] }
 0x387   : > { %v1511_v50 = vrot.slane %v4188_v15, 6  ;;  %v1499_v22 = vsel %vm1496_vm7, %v1497_v52, %v1498_v42  ;;  %v1504_v4 = vsel %vm1496_vm7, %v1498_v42, %v1503_v0  ;;  %v4212_v27 = vrot.slane %v3856_v51, %v3675_v23 }
 0x388   : > { %v2985_v21 = vpop.eup %2984  ;;  %v1508_v13 = vsel %vm1496_vm7, %v1503_v0, %v1507_v3  ;;  %v2255_v35 = vsel %vm2231_vm9, %v2250_v62, %v2254_v41  ;;  %v4199_v43 = vor.u32 %v2264_v48, %v2254_v41  ;;  %v1525_v30 = vadd.f32 %v1499_v22, %v1449_v28 }
 0x389   : > { %v2155_v60 = vadd.f32 1.0, %v2985_v21  ;;  %v1512_v9 = vsel %vm1496_vm7, %v1507_v3, %v1511_v50  ;;  %2404 = vmatprep.mubr.bf16.mxu0 %v2255_v35  ;;  %v1527_v32 = vadd.f32 %v1504_v4, %v1451_v12  ;;  %v1529_v53 = vadd.f32 %v1508_v13, %v1453_v26  ;;  %v1644_v26 = vld [vmem:[#allocation2 + $0x10] sm:$0xfc] }
 0x38a   : > { %v1531_v29 = vadd.f32 %v1512_v9, %v1455_v1  ;;  %v1550_v40 = vmul.f32 %v1543_v14, %v4041_v17  ;;  %v1552_v19 = vmul.f32 %v1543_v14, %v4049_v63  ;;  %v1554_v8 = vmul.f32 %v1543_v14, %v4051_v44 }
 0x38b   : > { %2986 = vrcp.f32 %v2155_v60  ;;  %v4208_v31 = vmul.f32 %v1543_v14, %v4196_v38  ;;  %v1654_v28 = vrot.slane %v3910_v20, %v3675_v23  ;;  %v1729_v49 = vrot.slane %v3913_v24, %v3675_v23  ;;  %v1719_v14 = vld [vmem:[#allocation2 + $0x10] sm:$0xf8] }
 0x38c   : > { %v4220_v17 = vrot.slane %v3920_v46, %v3675_v23  ;;  %v1567_v54 = vrot.slane %v1550_v40, 7  ;;  %v1569_v10 = vrot.slane %v1552_v19, 7  ;;  %v1573_v25 = vrot.slane %v1554_v8, 7  ;;  %v1721_v40 = vld [vmem:[#allocation2 + $0x50] sm:$0x7] }
 0x38d   : > { %v1577_v12 = vrot.slane %v4208_v31, 7  ;;  %v1624_v1 = vmul.f32 %v4212_v27, %v1601_v57  ;;  %v1626_v51 = vmul.f32 %v4212_v27, %v4049_v63  ;;  %v1628_v20 = vmul.f32 %v4212_v27, %v4051_v44 }
 0x38e   : > { %v1630_v24 = vmul.f32 %v4212_v27, %v4196_v38  ;;  %v1570_v46 = vsel %vm1566_vm8, %v1567_v54, %v1569_v10  ;;  %v1574_v58 = vsel %vm1566_vm8, %v1569_v10, %v1573_v25  ;;  %v1591_v2 = vadd.f32 %v1567_v54, %v1525_v30 }
 0x38f   : > { %v1578_v56 = vsel %vm1566_vm8, %v1573_v25, %v1577_v12  ;;  %v1593_v48 = vadd.f32 %v1570_v46, %v1527_v32  ;;  %v1595_v52 = vadd.f32 %v1574_v58, %v1529_v53  ;;  %v1661_v0 = vmul.f32 %v1654_v28, %v1644_v26  ;;  %v1794_v26 = vld [vmem:[#allocation2 + $0x10] sm:$0xf0] }
 0x390   : > { %v1597_v42 = vadd.f32 %v1578_v56, %v1531_v29  ;;  %v1634_v3 = vadd.f32 %v1624_v1, %v1591_v2  ;;  %v1663_v21 = vmul.f32 %v1654_v28, %v4049_v63  ;;  %v1665_v62 = vmul.f32 %v1654_v28, %v4051_v44 }
 0x391   : > { %v1667_v41 = vmul.f32 %v1654_v28, %v4196_v38  ;;  %v1636_v60 = vadd.f32 %v1626_v51, %v1593_v48  ;;  %v1638_v22 = vadd.f32 %v1628_v20, %v1595_v52  ;;  %v4238_v13 = vmul.f32 %v1654_v28, %v1646_v36 }
 0x392   : > { %v1640_v4 = vadd.f32 %v1630_v24, %v1597_v42  ;;  %v1681_v35 = vrot.slane %v1661_v0, 1  ;;  %v1682_v9 = vrot.slane %v1663_v21, 1  ;;  %v1687_v30 = vrot.slane %v1665_v62, 1  ;;  %v1796_v62 = vld [vmem:[#allocation2 + $0x50] sm:$0xf] }
 0x393   : > { %v1691_v32 = vrot.slane %v1667_v41, 1  ;;  %v1695_v29 = vrot.slane %v4238_v13, 1  ;;  %v1736_v19 = vmul.f32 %v1729_v49, %v1719_v14  ;;  %v1738_v8 = vmul.f32 %v1729_v49, %v4049_v63 }
 0x394   : > { %v1740_v57 = vmul.f32 %v1729_v49, %v4051_v44  ;;  %v1683_v10 = vsel %vm1116_vm2, %v1681_v35, %v1682_v9  ;;  %v1688_v28 = vsel %vm1116_vm2, %v1682_v9, %v1687_v30  ;;  %v1742_v56 = vmul.f32 %v1729_v49, %v4196_v38 }
 0x395   : > { %v2987_v53 = vpop.eup %2986  ;;  %v1692_v25 = vsel %vm1116_vm2, %v1687_v30, %v1691_v32  ;;  %v1696_v1 = vsel %vm1116_vm2, %v1691_v32, %v1695_v29  ;;  %v1709_v51 = vadd.f32 %v1683_v10, %v1634_v3  ;;  %v1711_v20 = vadd.f32 %v1688_v28, %v1636_v60 }
 0x396   : > { %v2185_v54 = vmul.f32 %v2987_v53, %v4155_v47  ;;  %v1713_v24 = vadd.f32 %v1692_v25, %v1638_v22  ;;  %v1715_v58 = vadd.f32 %v1696_v1, %v1640_v4  ;;  %v4251_v2 = vmul.f32 %v1729_v49, %v1721_v40  ;;  %v1869_v25 = vld [vmem:[#allocation2 + $0x10] sm:$0xe0] }
 0x397   : > { %v1756_v47 = vrot.slane %v1736_v19, 2  ;;  %v1757_v36 = vrot.slane %v1738_v8, 2  ;;  %v1762_v48 = vrot.slane %v1740_v57, 2  ;;  %v1811_v52 = vmul.f32 %v4220_v17, %v1794_v26 }
 0x398   : > { %v2191_v46 = vpack.c.bf16 %v2185_v54, %v2185_v54  ;;  %v1766_v0 = vrot.slane %v1742_v56, 2  ;;  %v1770_v21 = vrot.slane %v4251_v2, 2  ;;  %v1813_v3 = vmul.f32 %v4220_v17, %v4049_v63 }
 0x399   : > { %v1758_v41 = vsel %vm1192_vm3, %v1756_v47, %v1757_v36  ;;  %v1763_v14 = vsel %vm1192_vm3, %v1757_v36, %v1762_v48  ;;  %v1815_v49 = vmul.f32 %v4220_v17, %v4051_v44  ;;  %v1817_v60 = vmul.f32 %v4220_v17, %v4196_v38 }
 0x39a   : > { %v2268_v42 = vshll.u32 %v2191_v46, 16  ;;  %v1767_v4 = vsel %vm1192_vm3, %v1762_v48, %v1766_v0  ;;  %v1771_v35 = vsel %vm1192_vm3, %v1766_v0, %v1770_v21  ;;  %v1784_v9 = vadd.f32 %v1758_v41, %v1709_v51 }
 0x39b   : > { %v1786_v30 = vadd.f32 %v1763_v14, %v1711_v20  ;;  %v1788_v32 = vadd.f32 %v1767_v4, %v1713_v24  ;;  %v1790_v53 = vadd.f32 %v1771_v35, %v1715_v58  ;;  %v4268_v40 = vmul.f32 %v4220_v17, %v1796_v62  ;;  %v1871_v20 = vld [vmem:[#allocation2 + $0x50] sm:$0x1f] }
 0x39c   : > { %v2270_v22 = vrot.slane %v2268_v42, 1  ;;  %v1831_v8 = vrot.slane %v1811_v52, 3  ;;  %v1832_v57 = vrot.slane %v1813_v3, 3  ;;  %v1837_v54 = vrot.slane %v1815_v49, 3 }
 0x39d   : > { %v1841_v10 = vrot.slane %v1817_v60, 3  ;;  %v1845_v28 = vrot.slane %v4268_v40, 3  ;;  %v1879_v26 = vrot.slane %v3922_v55, %v3675_v23  ;;  %v1954_v1 = vrot.slane %v3931_v61, %v3675_v23 }
 0x39e   : > { %v2271_v19 = vsel %vm2231_vm9, %v4199_v43, %v2270_v22  ;;  %v1833_v17 = vsel %vm1268_vm4, %v1831_v8, %v1832_v57  ;;  %v1838_v51 = vsel %vm1268_vm4, %v1832_v57, %v1837_v54  ;;  %v1944_v43 = vld [vmem:[#allocation2 + $0x10] sm:$0xc0]  ;;  %v2029_v24 = vrot.slane %v4007_v34, %v3675_v23  ;;  %v1946_v34 = vld [vmem:[#allocation2 + $0x50] sm:$0x3f] }
 0x39f   : > { %2412 = vmatprep.mubr.bf16.mxu1 %v2271_v19  ;;  %v1842_v46 = vsel %vm1268_vm4, %v1837_v54, %v1841_v10  ;;  %v1846_v58 = vsel %vm1268_vm4, %v1841_v10, %v1845_v28  ;;  %v1859_v56 = vadd.f32 %v1833_v17, %v1784_v9  ;;  %v1861_v55 = vadd.f32 %v1838_v51, %v1786_v30  ;;  %v2019_v10 = vld [vmem:[#allocation2 + $0x10] sm:$0x80] }
 0x3a0   : > { %v1863_v47 = vadd.f32 %v1842_v46, %v1788_v32  ;;  %v1865_v36 = vadd.f32 %v1846_v58, %v1790_v53  ;;  %v1886_v61 = vmul.f32 %v1879_v26, %v1869_v25  ;;  %v1888_v48 = vmul.f32 %v1879_v26, %v4049_v63 }
 0x3a1   : > { %v1890_v52 = vmul.f32 %v1879_v26, %v4051_v44  ;;  %v1892_v42 = vmul.f32 %v1879_v26, %v4196_v38  ;;  %v4288_v0 = vmul.f32 %v1879_v26, %v1871_v20  ;;  %v1961_v62 = vmul.f32 %v1954_v1, %v1944_v43  ;;  %v2021_v20 = vld [vmem:[#allocation2 + $0x50] sm:$0x7f] }
 0x3a2   : > { %v1906_v3 = vrot.slane %v1886_v61, 4  ;;  %v1907_v41 = vrot.slane %v1888_v48, 4  ;;  %v1963_v14 = vmul.f32 %v1954_v1, %v4049_v63  ;;  %v1965_v49 = vmul.f32 %v1954_v1, %v4051_v44 }
 0x3a3   : > { %v1912_v60 = vrot.slane %v1890_v52, 4  ;;  %v1916_v22 = vrot.slane %v1892_v42, 4  ;;  %v1920_v4 = vrot.slane %v4288_v0, 4  ;;  %v1967_v35 = vmul.f32 %v1954_v1, %v4196_v38 }
 0x3a4   : > { %v1908_v9 = vsel %vm1344_vm5, %v1906_v3, %v1907_v41  ;;  %v4295_v30 = vmul.f32 %v1954_v1, %v1946_v34  ;;  %v1981_v32 = vrot.slane %v1961_v62, 5  ;;  %v1982_v53 = vrot.slane %v1963_v14, 5  ;;  %v1055_v34 = vld [vmem:[#allocation2 + $0x40] sm:$0x1] }
 0x3a5   : > { %v1913_v19 = vsel %vm1344_vm5, %v1907_v41, %v1912_v60  ;;  %v1917_v8 = vsel %vm1344_vm5, %v1912_v60, %v1916_v22  ;;  %v1921_v57 = vsel %vm1344_vm5, %v1916_v22, %v1920_v4  ;;  %v1934_v54 = vadd.f32 %v1908_v9, %v1859_v56 }
 0x3a6   : > { %v1936_v25 = vadd.f32 %v1913_v19, %v1861_v55  ;;  %v1938_v26 = vadd.f32 %v1917_v8, %v1863_v47  ;;  %v1940_v17 = vadd.f32 %v1921_v57, %v1865_v36  ;;  %v1983_v51 = vsel %vm1420_vm6, %v1981_v32, %v1982_v53 }
 0x3a7   : > { %v1987_v1 = vrot.slane %v1965_v49, 5  ;;  %v1991_v43 = vrot.slane %v1967_v35, 5  ;;  %v1995_v46 = vrot.slane %v4295_v30, 5  ;;  %v2009_v58 = vadd.f32 %v1983_v51, %v1934_v54 }
 0x3a8   : > { %v2036_v61 = vmul.f32 %v2029_v24, %v2019_v10  ;;  %v2038_v48 = vmul.f32 %v2029_v24, %v4049_v63  ;;  %v2040_v52 = vmul.f32 %v2029_v24, %v4051_v44  ;;  %v2042_v42 = vmul.f32 %v2029_v24, %v4196_v38 }
 0x3a9   : > { %v1988_v56 = vsel %vm1420_vm6, %v1982_v53, %v1987_v1  ;;  %v1992_v55 = vsel %vm1420_vm6, %v1987_v1, %v1991_v43  ;;  %v1996_v47 = vsel %vm1420_vm6, %v1991_v43, %v1995_v46  ;;  %v2044_v36 = vmul.f32 %v2029_v24, %v2021_v20 }
 0x3aa   : > { %v2011_v62 = vadd.f32 %v1988_v56, %v1936_v25  ;;  %v2013_v3 = vadd.f32 %v1992_v55, %v1938_v26  ;;  %v2015_v41 = vadd.f32 %v1996_v47, %v1940_v17  ;;  %v2056_v14 = vrot.slane %v2036_v61, 6 }
 0x3ab   : > { %v2057_v49 = vrot.slane %v2038_v48, 6  ;;  %v2062_v63 = vrot.slane %v2040_v52, 6  ;;  %v2066_v60 = vrot.slane %v2042_v42, 6  ;;  %v2070_v44 = vrot.slane %v2044_v36, 6 }
 0x3ac   : > { %v2099_v38 = vrot.slane %v4012_v16, %v3675_v23  ;;  %v1077_v22 = vmul.f32 %v3781_v33, %v1055_v34  ;;  %v4483_v33 = vrot.slane %v4112_v39, 2 }
 0x3ad   : > { %v2058_v35 = vsel %vm1496_vm7, %v2056_v14, %v2057_v49  ;;  %v2063_v9 = vsel %vm1496_vm7, %v2057_v49, %v2062_v63  ;;  %v2067_v24 = vsel %vm1496_vm7, %v2062_v63, %v2066_v60  ;;  %v2071_v32 = vsel %vm1496_vm7, %v2066_v60, %v2070_v44 }
 0x3ae   : > { %v2084_v53 = vadd.f32 %v2058_v35, %v2009_v58  ;;  %v2086_v19 = vadd.f32 %v2063_v9, %v2011_v62  ;;  %v2088_v8 = vadd.f32 %v2067_v24, %v2013_v3  ;;  %v2090_v57 = vadd.f32 %v2071_v32, %v2015_v41 }
 0x3af   : > { %v1153_v54 = vadd.f32 %v1131_v45, %v1077_v22  ;;  %v1609_v45 = vld [vmem:[#allocation2 + $0x50] sm:$0x1] }
 0x3b0   : > { %v2106_v10 = vadd.f32 %v2099_v38, %v2084_v53  ;;  %v2108_v25 = vadd.f32 %v2099_v38, %v2086_v19  ;;  %v2110_v23 = vadd.f32 %v2099_v38, %v2088_v8  ;;  %v2112_v16 = vadd.f32 %v2099_v38, %v2090_v57  ;;  %v2643_v57 = vld [vmem:[%s4485_s7] ss:$0 sm:$0xff] }
 0x3b1   : > { %v1229_v26 = vadd.f32 %v4483_v33, %v1153_v54  ;;  %v1632_v61 = vmul.f32 %v4212_v27, %v1609_v45 }
 0x3b2   : > { %v2633_v17 = vmul.f32 -1.442695, %v2106_v10  ;;  %v2635_v51 = vmul.f32 -1.442695, %v2108_v25  ;;  %v2637_v20 = vmul.f32 -1.442695, %v2110_v23 }
 0x3b3   : > { %v2639_v1 = vmul.f32 -1.442695, %v2112_v16  ;;  %v1305_v43 = vadd.f32 %v1283_v18, %v1229_v26 }
 0x3b4   : > { %2988 = vpow2.f32 %v2633_v17 }
 0x3b5   : > { %2990 = vpow2.f32 %v2635_v51  ;;  %v1381_v59 = vadd.f32 %v1359_v37, %v1305_v43 }
 0x3b6   : > { %2992 = vpow2.f32 %v2637_v20 }
 0x3b7   : > { %2994 = vpow2.f32 %v2639_v1  ;;  %v1457_v58 = vadd.f32 %v1435_v7, %v1381_v59 }
 0x3b9   : > { %v1533_v39 = vadd.f32 %v1511_v50, %v1457_v58 }
 0x3bb   : > { %v1599_v6 = vadd.f32 %v1577_v12, %v1533_v39 }
 0x3bd   : > { %v1642_v18 = vadd.f32 %v1632_v61, %v1599_v6 }
 0x3be   : > { %v2989_v48 = vpop.eup %2988 }
 0x3bf   : > { %v2991_v52 = vpop.eup %2990  ;;  %v2146_v42 = vadd.f32 1.0, %v2989_v48  ;;  %v1717_v11 = vadd.f32 %v1695_v29, %v1642_v18 }
 0x3c0   : > { %v2993_v37 = vpop.eup %2992  ;;  %v2148_v56 = vadd.f32 1.0, %v2991_v52 }
 0x3c1   : > { %v2995_v55 = vpop.eup %2994  ;;  %v2150_v5 = vadd.f32 1.0, %v2993_v37  ;;  %2996 = vrcp.f32 %v2146_v42  ;;  %v1792_v7 = vadd.f32 %v1770_v21, %v1717_v11 }
 0x3c2   : > { %v2152_v15 = vadd.f32 1.0, %v2995_v55  ;;  %2998 = vrcp.f32 %v2148_v56 }
 0x3c3   : > { %3000 = vrcp.f32 %v2150_v5  ;;  %v1867_v50 = vadd.f32 %v1845_v28, %v1792_v7 }
 0x3c4   : > { %3002 = vrcp.f32 %v2152_v15 }
 0x3c5   : > { %v1942_v31 = vadd.f32 %v1920_v4, %v1867_v50 }
 0x3c7   : > { %v2017_v27 = vadd.f32 %v1995_v46, %v1942_v31 }
 0x3c9   : > { %v2092_v12 = vadd.f32 %v2070_v44, %v2017_v27 }
 0x3cb   : > { %v2997_v13 = vpop.eup %2996  ;;  %v2114_v29 = vadd.f32 %v2099_v38, %v2092_v12 }
 0x3cc   : > { %v2999_v47 = vpop.eup %2998  ;;  %v2176_v36 = vmul.f32 %v2997_v13, %v2106_v10 }
 0x3cd   : > { %v3001_v2 = vpop.eup %3000  ;;  %v2178_v21 = vmul.f32 %v2999_v47, %v2108_v25  ;;  %v2641_v34 = vmul.f32 -1.442695, %v2114_v29 }
 0x3ce   : > { %v3003_v62 = vpop.eup %3002  ;;  %v2180_v3 = vmul.f32 %v3001_v2, %v2110_v23 }
 0x3cf   : > { %v2182_v41 = vmul.f32 %v3003_v62, %v2112_v16  ;;  %v2186_v40 = vpack.c.bf16 %v2178_v21, %v2176_v36  ;;  %3004 = vpow2.f32 %v2641_v34 }
 0x3d1   : > { %v2188_v28 = vpack.c.bf16 %v2182_v41, %v2180_v3  ;;  %v2233_v14 = vshrl.u32 %v2186_v40, 16  ;;  %v2235_v0 = vshll.u32 %v2186_v40, 16 }
 0x3d3   : > { %v2237_v4 = vrot.slane %v2235_v0, 1  ;;  %v2240_v49 = vshll.u32 %v2188_v28, 16  ;;  %v2256_v35 = vshrl.u32 %v2188_v28, 16 }
 0x3d5   : > { %v2238_v30 = vor.u32 %v2237_v4, %v2233_v14  ;;  %v2242_v46 = vrot.slane %v2240_v49, 1 }
 0x3d7   : > { %v2243_v63 = vsel %vm2231_vm9, %v2238_v30, %v2242_v46  ;;  %v2258_v24 = vor.u32 %v2256_v35, %v2242_v46 }
 0x3d8   : > { %2405 = vmatmul.mubr.bf16.vlgmr.msra.gmra.mrb[12].mxu0 %v2243_v63 }
 0x3d9   : > { %v3005_v60 = vpop.eup %3004 }
 0x3da   : > { %v2154_v44 = vadd.f32 1.0, %v3005_v60 }
 0x3dc   : > { %3006 = vrcp.f32 %v2154_v44 }
 0x3e6   : > { %v3007_v38 = vpop.eup %3006 }
 0x3e7   : > { %v2184_v22 = vmul.f32 %v3007_v38, %v2114_v29 }
 0x3e9   : > { %v2190_v9 = vpack.c.bf16 %v2184_v22, %v2184_v22 }
 0x3eb   : > { %v2260_v32 = vshll.u32 %v2190_v9, 16 }
 0x3ed   : > { %v2262_v53 = vrot.slane %v2260_v32, 1 }
 0x3ef   : > { %v2263_v19 = vsel %vm2231_vm9, %v2258_v24, %v2262_v53 }
 0x3f0   : > { %2413 = vmatmul.mubr.bf16.vlgmr.msra.gmra.mrb[12].mxu1 %v2263_v19 }
 0x4ab   : > { %v2683_v8 = vpop.f32.mrb[12].mxu0 }
 0x4ac   : > { %v2684_v54 = vpop.f32.mrb[13].mxu0 }
 0x4ad   : > { %v2685_v10 = vadd.f32 %v2684_v54, %v2683_v8  ;;  %v2686_v25 = vpop.f32.mrb[14].mxu0 }
 0x4ae   : > { %v2687_v23 = vpop.f32.mrb[15].mxu0 }
 0x4af   : > { %v2407_v16 = vadd.f32 %v2685_v10, %v2643_v57  ;;  %v2688_v33 = vadd.f32 %v2687_v23, %v2686_v25 }
 0x4b1   : > { %2421 = vst [vmem:[%s3726_s29] sm:$0xff] %v2407_v16  ;;  %v2410_v26 = vadd.f32 %v2688_v33, %v2643_v57 }
 0x4b3   : > { %2422 = vst [vmem:[%s3726_s29 + $0x8] sm:$0xff] %v2410_v26 }
 0x4c3   : > { %v2689_v17 = vpop.f32.mrb[12].mxu1 }
 0x4c4   : > { %v2690_v51 = vpop.f32.mrb[13].mxu1 }
 0x4c5   : > { %v2691_v20 = vadd.f32 %v2690_v51, %v2689_v17  ;;  %v2692_v1 = vpop.f32.mrb[14].mxu1 }
 0x4c6   : > { %v2693_v43 = vpop.f32.mrb[15].mxu1 }
 0x4c7   : > { %v2415_v59 = vadd.f32 %v2691_v20, %v2643_v57  ;;  %v2694_v45 = vadd.f32 %v2693_v43, %v2692_v1 }
 0x4c9   : > { %2423 = vst [vmem:[%s3726_s29 + $0x10] sm:$0xff] %v2415_v59  ;;  %v2418_v58 = vadd.f32 %v2694_v45, %v2643_v57 }
 0x4cb   : > { %2424 = vst [vmem:[%s3726_s29 + $0x18] sm:$0xff] %v2418_v58 }
 0x4cc   : > { %3163 = shalt.err (!%p3160_p13)
}
 0x4cd   : > { %s3164_s29 = scalar_lea.hbm %s4357_s18, 512  ;;  %s3168_s9 = scalar_lea.hbm %s4486_s3, 3072 }
 0x4ce   : > { %p3165_p5 = scmp.ne.s32.totalorder %s4357_s18, %s3164_s29  ;;  %p3169_p0 = scmp.lt.u32.totalorder %s4357_s18, %s4486_s3 }
 0x4cf   : > { %p3170_p10 = scmp.lt.u32.totalorder %s3168_s9, %s3164_s29  ;;  %p3172_p6 = scmp.lt.u32.totalorder %s3164_s29, %s4357_s18 }
 0x4d0   : > { %p3166_p9 = pnand %p3165_p5, %p3504_p4 }
 0x4d1   : > { %p3171_p2 = por %p3170_p10, %p3169_p0 }
 0x4d2   : > { %p3167_p1 = pneg %p3166_p9 }
 0x4d3   : > { %p3173_p8 = por %p3172_p6, %p3171_p2 }
 0x4d5   : > { %p3174_p3 = pnand %p3173_p8, %p3167_p1 }
 0x4d7   : > { %3177 = shalt.err (!%p3174_p3)
}
 0x4d8   : > { %s3271_s19 = smov 128   ;;  %s3272_s23 = smov 8  }
 0x4d9   : > { %2734 = dma.vmem_to_hbm [thread:$0]  (%p3504_p4), %s4359_s20, 512, %s4357_s18, %s2426_s12, %s3271_s19, %s3271_s19, %s3272_s23  }
 0x4da PF: > { %s4487_s5 = sld [smem:[#allocation17_spill]]  ;;  %s4488_s27 = sld [smem:[#allocation19_spill]] }
 0x4db   : > { %p2766_p7 = scmp.ge.s32.totalorder %s3256_s16, 2 }
 0x4e0   : > { %s2456_s26 = sand.u32 1, %s4487_s5   ;;  %p4489_p12 = scmp.ne.s32.totalorder %s4488_s27, 0 }
 0x4e1   : > { %s2457_s25 = scalar_lea.sflag [#allocation5], %s2456_s26 }
 0x4e2   : > { %p2754_p11 = pnand %p2766_p7, %p4489_p12 }
 0x4e4   : > { %3223 = dma.done.wait (!%p2754_p11), %s2457_s25, 512  }
 0x4e5   : > { %3225 = vsyncadd (!%p2754_p11), %s2457_s25, 4294966784  ;;  %s27_s16 = sadd.s32 1, %s3256_s16   ;;  %s4490_s24 = sld [smem:[#allocation20_spill]] }
 0x4e6   : > { %p24_p13 = scmp.ge.s32.totalorder %s27_s16, 8   ;;  %s4491_s30 = smov %s3232_s10 }
 0x4e7   : > { %s4492_s10 = smov %s3236_s11  ;;  %s4493_s11 = smov %s3523_s8 }
 0x4e8   : > { %s4494_s12 = smov %s3248_s14  ;;  %s4495_s13 = smov %s3252_s15 }
 0x4e9   : > { %s4496_s14 = smov %s4499_s28  ;;  %26 = sbr.rel (!%p24_p13) target bundleno = 17 (0x11), region = 139 }
 0x4eb   : > { %s4497_s15 = smov %s4490_s24 }
 0x4f0   :  { %2462 = vsyncpa [#allocation4], 1 }
 0x4f1   :  { %2464 = vsyncpa [#allocation4 + $0x1], 1 }
 0x4f2   :  { %2465 = vsyncpa [#allocation7], 1 }
 0x4f3   :  { %2466 = vsyncpa [#allocation10], 1 }
 0x4f4   :  { %2467 = vsyncpa [#allocation5], 1 }
 0x4f5   :  { %2469 = vsyncpa [#allocation5 + $0x1], 1 }

</bundles_post_ra>
